<compile_context>
chip_gen: v7x
topology: tpu7x:2x2x1
jax: 0.10.0
libtpu: 0.0.40
codegen_flags: <defaults>
</compile_context>

<pallas_src>
import functools

import jax
import jax.numpy as jnp
import numpy as np
from jax.experimental import pallas as pl
from jax.experimental.pallas import tpu as pltpu

EPS = 1e-5  # nn.BatchNorm2d default


# --------------------------- kernel 1: conv + BN partial stats ---------------------------
def _conv_stats_kernel(x_ref, w_ref, y_ref, stats_ref, xpad_ref, *, H, W, Cin, Cout):
    """One image per grid step.

    x_ref:     (1, H, W, Cin)    f32   input image (unpadded, NHWC)
    w_ref:     (Cout, 9*Cin)     bf16  conv weight, cols ordered [tap, c_in]
    y_ref:     (1, Cout, H*W)    bf16  conv output (pre-BN), channel-major / lane-dense
    stats_ref: (1, Cout, 2)      f32   per-image [sum, sum-of-squares] over positions
    xpad_ref:  (H+2, W+2, Cin)   bf16  VMEM scratch for in-kernel zero padding
    """
    # Zero only the 1-wide halo; the interior is fully overwritten below.
    # Done every step (cheap strips) so it is correct even when the "parallel"
    # grid axis is split across TensorCores (each core has its own scratch).
    zrow = jnp.zeros((1, W + 2, Cin), jnp.bfloat16)
    xpad_ref[pl.ds(0, 1), :, :] = zrow
    xpad_ref[pl.ds(H + 1, 1), :, :] = zrow
    zcol = jnp.zeros((H + 2, 1, Cin), jnp.bfloat16)
    xpad_ref[:, pl.ds(0, 1), :] = zcol
    xpad_ref[:, pl.ds(W + 1, 1), :] = zcol

    # In-kernel "same" padding; cast to bf16 once here (im2col built in bf16).
    xpad_ref[pl.ds(1, H), pl.ds(1, W), :] = x_ref[0].astype(jnp.bfloat16)

    # im2col lhs: (H*W, 9*Cin) bf16, nine taps concatenated along K.
    cols = []
    for ky in range(3):
        for kx in range(3):
            cols.append(xpad_ref[pl.ds(ky, H), pl.ds(kx, W), :].reshape(H * W, Cin))
    lhs = jnp.concatenate(cols, axis=-1)                              # (H*W, 9*Cin) bf16

    # Single MXU matmul producing the CHANNEL-MAJOR result directly:
    #   (Cout, 9*Cin) . (H*W, 9*Cin)^T -> (Cout, H*W), f32 accumulation.
    acc = jax.lax.dot_general(
        w_ref[...], lhs,
        dimension_numbers=(((1,), (1,)), ((), ())),
        preferred_element_type=jnp.float32)                           # (Cout, H*W) f32

    # One-pass BN partial statistics from the f32 accumulator.
    s = jnp.sum(acc, axis=1, keepdims=True)                           # (Cout, 1)
    ss = jnp.sum(acc * acc, axis=1, keepdims=True)                    # (Cout, 1)
    stats_ref[0] = jnp.concatenate([s, ss], axis=1)                   # (Cout, 2)

    # bf16 store of the intermediate (halves the dominant HBM traffic).
    y_ref[0] = acc.astype(jnp.bfloat16)


# --------------------------- kernel 2: BN apply + ReLU ---------------------------
def _bn_act_kernel(y_ref, scale_ref, shift_ref, out_ref):
    """y_ref: (n, Cout, H*W) bf16; scale/shift: (1, Cout, 1) f32; out: (n, Cout, H*W) f32."""
    y = y_ref[...].astype(jnp.float32)                 # BN math in f32 (v5e: no bf16 VPU)
    out_ref[...] = jnp.maximum(y * scale_ref[...] + shift_ref[...], 0.0)


# --------------------------- wrapper ---------------------------
@jax.jit
def conv_block_forward(x_nchw, w_oihw, gamma, beta):
    """ConvBlock forward: conv3x3(no bias) -> BatchNorm2d(batch stats) -> ReLU. NCHW in/out."""
    N, Cin, H, W = x_nchw.shape
    Cout = w_oihw.shape[0]
    HW = H * W

    # Input to NHWC for the im2col path (one small XLA pass over x).
    x = jnp.transpose(x_nchw, (0, 2, 3, 1))

    # PyTorch weight (Cout, Cin, 3, 3) -> (Cout, 3, 3, Cin) -> (Cout, 9*Cin),
    # cols ordered tap-major / c_in-minor to match the im2col lhs. bf16 for MXU.
    w2 = jnp.transpose(w_oihw, (0, 2, 3, 1)).reshape(Cout, 9 * Cin).astype(jnp.bfloat16)

    x_bytes = N * HW * Cin * 4
    w_bytes = 9 * Cin * Cout * 2
    y_bytes = N * HW * Cout * 2          # bf16 intermediate
    out_bytes = N * HW * Cout * 4
    stats_bytes = N * Cout * 2 * 4

    y, stats = pl.pallas_call(
        functools.partial(_conv_stats_kernel, H=H, W=W, Cin=Cin, Cout=Cout),
        grid=(N,),
        in_specs=[
            pl.BlockSpec((1, H, W, Cin), lambda n: (n, 0, 0, 0)),
            pl.BlockSpec((Cout, 9 * Cin), lambda n: (0, 0)),
        ],
        out_specs=[
            pl.BlockSpec((1, Cout, HW), lambda n: (n, 0, 0)),
            pl.BlockSpec((1, Cout, 2), lambda n: (n, 0, 0)),
        ],
        out_shape=[
            jax.ShapeDtypeStruct((N, Cout, HW), jnp.bfloat16),
            jax.ShapeDtypeStruct((N, Cout, 2), jnp.float32),
        ],
        scratch_shapes=[pltpu.VMEM((H + 2, W + 2, Cin), jnp.bfloat16)],
        compiler_params=pltpu.CompilerParams(
            dimension_semantics=("parallel",),
            vmem_limit_bytes=32 * 1024 * 1024),
        cost_estimate=pl.CostEstimate(
            flops=2 * N * HW * 9 * Cin * Cout,
            transcendentals=0,
            bytes_accessed=x_bytes + w_bytes + y_bytes + stats_bytes),
    )(x, w2)

    # Reduce the tiny per-image partials and fold BN into one scale/shift pair.
    # NOTE: var = E[x^2] - E[x]^2 in f32 can cancel catastrophically for huge
    # counts / large means; fine at these scales (see review).
    count = float(N * HW)
    s = jnp.sum(stats[:, :, 0], axis=0)                               # (Cout,)
    ss = jnp.sum(stats[:, :, 1], axis=0)                              # (Cout,)
    mean = s / count
    var = jnp.maximum(ss / count - mean * mean, 0.0)                  # biased (training-mode) var
    inv = jax.lax.rsqrt(var + EPS)
    scale = (gamma * inv).astype(jnp.float32).reshape(1, Cout, 1)
    shift = (beta - mean * gamma * inv).astype(jnp.float32).reshape(1, Cout, 1)

    # Flat, lane-dense BN-apply pass: multi-image blocks (whole batch at demo shapes).
    per_img_bytes = Cout * HW * (2 + 4)                               # bf16 in + f32 out
    n_tile = max(1, min(N, (8 * 1024 * 1024) // max(per_img_bytes, 1)))
    while N % n_tile:                                                 # keep the grid exact
        n_tile -= 1

    out = pl.pallas_call(
        _bn_act_kernel,
        grid=(N // n_tile,),
        in_specs=[
            pl.BlockSpec((n_tile, Cout, HW), lambda i: (i, 0, 0)),
            pl.BlockSpec((1, Cout, 1), lambda i: (0, 0, 0)),
            pl.BlockSpec((1, Cout, 1), lambda i: (0, 0, 0)),
        ],
        out_specs=pl.BlockSpec((n_tile, Cout, HW), lambda i: (i, 0, 0)),
        out_shape=jax.ShapeDtypeStruct((N, Cout, HW), jnp.float32),
        compiler_params=pltpu.CompilerParams(
            dimension_semantics=("parallel",),
            vmem_limit_bytes=32 * 1024 * 1024),
        cost_estimate=pl.CostEstimate(
            flops=3 * N * HW * Cout,
            transcendentals=0,
            bytes_accessed=y_bytes + out_bytes + 2 * Cout * 4),
    )(y, scale, shift)

    # Already channel-major: NCHW result is a free reshape (no transpose pass).
    return out.reshape(N, Cout, H, W)


# --------------------------- pure-JAX reference (sanity) ---------------------------
def _ref_forward(x_nchw, w_oihw, gamma, beta):
    x = jnp.transpose(x_nchw, (0, 2, 3, 1))
    y = jax.lax.conv_general_dilated(
        x, jnp.transpose(w_oihw, (2, 3, 1, 0)),
        window_strides=(1, 1), padding=((1, 1), (1, 1)),
        dimension_numbers=('NHWC', 'HWIO', 'NHWC'))
    mean = y.mean(axis=(0, 1, 2))
    var = ((y - mean) ** 2).mean(axis=(0, 1, 2))
    y = (y - mean) * jax.lax.rsqrt(var + EPS) * gamma + beta
    y = jnp.maximum(y, 0.0)
    return jnp.transpose(y, (0, 3, 1, 2))


if __name__ == "__main__":
    key = jax.random.PRNGKey(0)
    kx, kw, kg, kb = jax.random.split(key, 4)

    N, C, H, W = 2, 4, 16, 16
    x = jax.random.normal(kx, (N, C, H, W), jnp.float32)
    w = jax.random.normal(kw, (C, C, 3, 3), jnp.float32) * 0.1
    gamma = 1.0 + 0.1 * jax.random.normal(kg, (C,), jnp.float32)
    beta = 0.1 * jax.random.normal(kb, (C,), jnp.float32)

    out = conv_block_forward(x, w, gamma, beta)
    out = jax.block_until_ready(out)

    ref = _ref_forward(x, w, gamma, beta)
    # Tolerance reflects bf16 MXU operands AND the bf16-stored intermediate
    # (f32 accumulation / f32 BN math); BN re-normalizes most of the error.
    np.testing.assert_allclose(np.asarray(out), np.asarray(ref), atol=3e-2, rtol=3e-2)

    print("KERNEL_OK")
</pallas_src>

<mosaic_0001>
module attributes {stable_mosaic.version = 11 : i64} {
  func.func @_conv_stats_kernel(%arg0: i32, %arg1: memref<1x16x16x4xf32, #tpu.memory_space<vmem>>, %arg2: memref<4x36xbf16, #tpu.memory_space<vmem>>, %arg3: memref<1x4x256xbf16, #tpu.memory_space<vmem>>, %arg4: memref<1x4x2xf32, #tpu.memory_space<vmem>>, %arg5: memref<18x18x4xbf16, #tpu.memory_space<vmem>>) attributes {dimension_semantics = [#tpu.dimension_semantics<parallel>], iteration_bounds = array<i64: 2>, scalar_prefetch = 0 : i64, scratch_operands = 1 : i64, tpu.core_type = #tpu.core_type<tc>, window_params = [{transform_indices = @transform_0, window_bounds = array<i64: 1, 16, 16, 4>}, {pipeline_mode = #tpu.pipeline_mode<synchronous>, transform_indices = @transform_1, window_bounds = array<i64: 4, 36>}, {transform_indices = @transform_2, window_bounds = array<i64: 1, 4, 256>}, {transform_indices = @transform_3, window_bounds = array<i64: 1, 4, 2>}]} {
    %cst = arith.constant 0.000000e+00 : bf16
    %0 = vector.broadcast %cst : bf16 to vector<1x18x4xbf16>
    %c0 = arith.constant 0 : index
    %c0_0 = arith.constant 0 : index
    %c0_1 = arith.constant 0 : index
    %1 = vector.load %arg5[%c0, %c0_0, %c0_1] : memref<18x18x4xbf16, #tpu.memory_space<vmem>>, vector<1x18x4xbf16>
    tpu.vector_store %arg5[%c0, %c0_0, %c0_1], %0 {strides = array<i32>} : memref<18x18x4xbf16, #tpu.memory_space<vmem>>, vector<1x18x4xbf16>,
    %c17 = arith.constant 17 : index
    %c0_2 = arith.constant 0 : index
    %c0_3 = arith.constant 0 : index
    %2 = vector.load %arg5[%c17, %c0_2, %c0_3] : memref<18x18x4xbf16, #tpu.memory_space<vmem>>, vector<1x18x4xbf16>
    tpu.vector_store %arg5[%c17, %c0_2, %c0_3], %0 {strides = array<i32>} : memref<18x18x4xbf16, #tpu.memory_space<vmem>>, vector<1x18x4xbf16>,
    %cst_4 = arith.constant 0.000000e+00 : bf16
    %3 = vector.broadcast %cst_4 : bf16 to vector<18x1x4xbf16>
    %c0_5 = arith.constant 0 : index
    %c0_6 = arith.constant 0 : index
    %c0_7 = arith.constant 0 : index
    %4 = vector.load %arg5[%c0_5, %c0_6, %c0_7] : memref<18x18x4xbf16, #tpu.memory_space<vmem>>, vector<18x1x4xbf16>
    tpu.vector_store %arg5[%c0_5, %c0_6, %c0_7], %3 {strides = array<i32>} : memref<18x18x4xbf16, #tpu.memory_space<vmem>>, vector<18x1x4xbf16>,
    %c0_8 = arith.constant 0 : index
    %c17_9 = arith.constant 17 : index
    %c0_10 = arith.constant 0 : index
    %5 = vector.load %arg5[%c0_8, %c17_9, %c0_10] : memref<18x18x4xbf16, #tpu.memory_space<vmem>>, vector<18x1x4xbf16>
    tpu.vector_store %arg5[%c0_8, %c17_9, %c0_10], %3 {strides = array<i32>} : memref<18x18x4xbf16, #tpu.memory_space<vmem>>, vector<18x1x4xbf16>,
    %c0_11 = arith.constant 0 : index
    %c0_12 = arith.constant 0 : index
    %c0_13 = arith.constant 0 : index
    %c0_14 = arith.constant 0 : index
    %6 = vector.load %arg1[%c0_11, %c0_12, %c0_13, %c0_14] : memref<1x16x16x4xf32, #tpu.memory_space<vmem>>, vector<1x16x16x4xf32>
    %7 = vector.shape_cast %6 : vector<1x16x16x4xf32> to vector<16x16x4xf32>
    %8 = arith.truncf %7 : vector<16x16x4xf32> to vector<16x16x4xbf16>
    %c1 = arith.constant 1 : index
    %c1_15 = arith.constant 1 : index
    %c0_16 = arith.constant 0 : index
    %9 = vector.load %arg5[%c1, %c1_15, %c0_16] : memref<18x18x4xbf16, #tpu.memory_space<vmem>>, vector<16x16x4xbf16>
    tpu.vector_store %arg5[%c1, %c1_15, %c0_16], %8 {strides = array<i32>} : memref<18x18x4xbf16, #tpu.memory_space<vmem>>, vector<16x16x4xbf16>,
    %c0_17 = arith.constant 0 : index
    %c0_18 = arith.constant 0 : index
    %c0_19 = arith.constant 0 : index
    %10 = vector.load %arg5[%c0_17, %c0_18, %c0_19] : memref<18x18x4xbf16, #tpu.memory_space<vmem>>, vector<16x16x4xbf16>
    %11 = vector.shape_cast %10 : vector<16x16x4xbf16> to vector<256x4xbf16>
    %c0_20 = arith.constant 0 : index
    %c1_21 = arith.constant 1 : index
    %c0_22 = arith.constant 0 : index
    %12 = vector.load %arg5[%c0_20, %c1_21, %c0_22] : memref<18x18x4xbf16, #tpu.memory_space<vmem>>, vector<16x16x4xbf16>
    %13 = vector.shape_cast %12 : vector<16x16x4xbf16> to vector<256x4xbf16>
    %c0_23 = arith.constant 0 : index
    %c2 = arith.constant 2 : index
    %c0_24 = arith.constant 0 : index
    %14 = vector.load %arg5[%c0_23, %c2, %c0_24] : memref<18x18x4xbf16, #tpu.memory_space<vmem>>, vector<16x16x4xbf16>
    %15 = vector.shape_cast %14 : vector<16x16x4xbf16> to vector<256x4xbf16>
    %c1_25 = arith.constant 1 : index
    %c0_26 = arith.constant 0 : index
    %c0_27 = arith.constant 0 : index
    %16 = vector.load %arg5[%c1_25, %c0_26, %c0_27] : memref<18x18x4xbf16, #tpu.memory_space<vmem>>, vector<16x16x4xbf16>
    %17 = vector.shape_cast %16 : vector<16x16x4xbf16> to vector<256x4xbf16>
    %c1_28 = arith.constant 1 : index
    %c1_29 = arith.constant 1 : index
    %c0_30 = arith.constant 0 : index
    %18 = vector.load %arg5[%c1_28, %c1_29, %c0_30] : memref<18x18x4xbf16, #tpu.memory_space<vmem>>, vector<16x16x4xbf16>
    %19 = vector.shape_cast %18 : vector<16x16x4xbf16> to vector<256x4xbf16>
    %c1_31 = arith.constant 1 : index
    %c2_32 = arith.constant 2 : index
    %c0_33 = arith.constant 0 : index
    %20 = vector.load %arg5[%c1_31, %c2_32, %c0_33] : memref<18x18x4xbf16, #tpu.memory_space<vmem>>, vector<16x16x4xbf16>
    %21 = vector.shape_cast %20 : vector<16x16x4xbf16> to vector<256x4xbf16>
    %c2_34 = arith.constant 2 : index
    %c0_35 = arith.constant 0 : index
    %c0_36 = arith.constant 0 : index
    %22 = vector.load %arg5[%c2_34, %c0_35, %c0_36] : memref<18x18x4xbf16, #tpu.memory_space<vmem>>, vector<16x16x4xbf16>
    %23 = vector.shape_cast %22 : vector<16x16x4xbf16> to vector<256x4xbf16>
    %c2_37 = arith.constant 2 : index
    %c1_38 = arith.constant 1 : index
    %c0_39 = arith.constant 0 : index
    %24 = vector.load %arg5[%c2_37, %c1_38, %c0_39] : memref<18x18x4xbf16, #tpu.memory_space<vmem>>, vector<16x16x4xbf16>
    %25 = vector.shape_cast %24 : vector<16x16x4xbf16> to vector<256x4xbf16>
    %c2_40 = arith.constant 2 : index
    %c2_41 = arith.constant 2 : index
    %c0_42 = arith.constant 0 : index
    %26 = vector.load %arg5[%c2_40, %c2_41, %c0_42] : memref<18x18x4xbf16, #tpu.memory_space<vmem>>, vector<16x16x4xbf16>
    %27 = vector.shape_cast %26 : vector<16x16x4xbf16> to vector<256x4xbf16>
    %28 = tpu.concatenate %11, %13, %15, %17, %19, %21, %23, %25, %27 in 1 : vector<256x4xbf16>, vector<256x4xbf16>, vector<256x4xbf16>, vector<256x4xbf16>, vector<256x4xbf16>, vector<256x4xbf16>, vector<256x4xbf16>, vector<256x4xbf16>, vector<256x4xbf16> -> vector<256x36xbf16>
    %c0_43 = arith.constant 0 : index
    %c0_44 = arith.constant 0 : index
    %29 = vector.load %arg2[%c0_43, %c0_44] : memref<4x36xbf16, #tpu.memory_space<vmem>>, vector<4x36xbf16>
    %cst_45 = arith.constant dense<0.000000e+00> : vector<4x256xf32>
    %30 = tpu.matmul %29, %28, %cst_45 {dimension_numbers = #tpu.dot_dimension_numbers<[1], [1], [0], [0], [0, 0, 1, 0], [], []>} : vector<4x36xbf16>, vector<256x36xbf16>, vector<4x256xf32> -> vector<4x256xf32>
    %cst_46 = arith.constant dense<0.000000e+00> : vector<4xf32>
    %31 = vector.multi_reduction <add>, %30, %cst_46 [1] : vector<4x256xf32> to vector<4xf32>
    %32 = vector.shape_cast %31 : vector<4xf32> to vector<4x1xf32>
    %33 = arith.mulf %30, %30 : vector<4x256xf32>
    %cst_47 = arith.constant dense<0.000000e+00> : vector<4xf32>
    %34 = vector.multi_reduction <add>, %33, %cst_47 [1] : vector<4x256xf32> to vector<4xf32>
    %35 = vector.shape_cast %34 : vector<4xf32> to vector<4x1xf32>
    %36 = tpu.concatenate %32, %35 in 1 : vector<4x1xf32>, vector<4x1xf32> -> vector<4x2xf32>
    %c0_48 = arith.constant 0 : index
    %c0_49 = arith.constant 0 : index
    %c0_50 = arith.constant 0 : index
    %37 = vector.load %arg4[%c0_48, %c0_49, %c0_50] : memref<1x4x2xf32, #tpu.memory_space<vmem>>, vector<1x4x2xf32>
    %38 = vector.shape_cast %37 : vector<1x4x2xf32> to vector<4x2xf32>
    %39 = vector.shape_cast %36 : vector<4x2xf32> to vector<1x4x2xf32>
    tpu.vector_store %arg4[%c0_48, %c0_49, %c0_50], %39 {strides = array<i32>} : memref<1x4x2xf32, #tpu.memory_space<vmem>>, vector<1x4x2xf32>,
    %40 = arith.truncf %30 : vector<4x256xf32> to vector<4x256xbf16>
    %c0_51 = arith.constant 0 : index
    %c0_52 = arith.constant 0 : index
    %c0_53 = arith.constant 0 : index
    %41 = vector.load %arg3[%c0_51, %c0_52, %c0_53] : memref<1x4x256xbf16, #tpu.memory_space<vmem>>, vector<1x4x256xbf16>
    %42 = vector.shape_cast %41 : vector<1x4x256xbf16> to vector<4x256xbf16>
    %43 = vector.shape_cast %40 : vector<4x256xbf16> to vector<1x4x256xbf16>
    tpu.vector_store %arg3[%c0_51, %c0_52, %c0_53], %43 {strides = array<i32>} : memref<1x4x256xbf16, #tpu.memory_space<vmem>>, vector<1x4x256xbf16>,
    return
  }
  func.func @transform_0(%arg0: i32) -> (i32, i32, i32, i32) {
    %c0_i32 = arith.constant 0 : i32
    %c0_i32_0 = arith.constant 0 : i32
    %c0_i32_1 = arith.constant 0 : i32
    %c0_i32_2 = arith.constant 0 : i32
    return %arg0, %c0_i32, %c0_i32_0, %c0_i32_1 : i32, i32, i32, i32
  }
  func.func @transform_1(%arg0: i32) -> (i32, i32) {
    %c0_i32 = arith.constant 0 : i32
    %c0_i32_0 = arith.constant 0 : i32
    %c0_i32_1 = arith.constant 0 : i32
    return %c0_i32, %c0_i32_0 : i32, i32
  }
  func.func @transform_2(%arg0: i32) -> (i32, i32, i32) {
    %c0_i32 = arith.constant 0 : i32
    %c0_i32_0 = arith.constant 0 : i32
    %c0_i32_1 = arith.constant 0 : i32
    return %arg0, %c0_i32, %c0_i32_0 : i32, i32, i32
  }
  func.func @transform_3(%arg0: i32) -> (i32, i32, i32) {
    %c0_i32 = arith.constant 0 : i32
    %c0_i32_0 = arith.constant 0 : i32
    %c0_i32_1 = arith.constant 0 : i32
    return %arg0, %c0_i32, %c0_i32_0 : i32, i32, i32
  }
}

module attributes {stable_mosaic.version = 11 : i64} {
  func.func @_bn_act_kernel(%arg0: i32, %arg1: memref<2x4x256xbf16, #tpu.memory_space<vmem>>, %arg2: memref<1x4x1xf32, #tpu.memory_space<vmem>>, %arg3: memref<1x4x1xf32, #tpu.memory_space<vmem>>, %arg4: memref<2x4x256xf32, #tpu.memory_space<vmem>>) attributes {dimension_semantics = [#tpu.dimension_semantics<parallel>], iteration_bounds = array<i64: 1>, scalar_prefetch = 0 : i64, scratch_operands = 0 : i64, tpu.core_type = #tpu.core_type<tc>, window_params = [{transform_indices = @transform_0, window_bounds = array<i64: 2, 4, 256>}, {pipeline_mode = #tpu.pipeline_mode<synchronous>, transform_indices = @transform_1, window_bounds = array<i64: 1, 4, 1>}, {pipeline_mode = #tpu.pipeline_mode<synchronous>, transform_indices = @transform_2, window_bounds = array<i64: 1, 4, 1>}, {transform_indices = @transform_3, window_bounds = array<i64: 2, 4, 256>}]} {
    %c0 = arith.constant 0 : index
    %c0_0 = arith.constant 0 : index
    %c0_1 = arith.constant 0 : index
    %0 = vector.load %arg1[%c0, %c0_0, %c0_1] : memref<2x4x256xbf16, #tpu.memory_space<vmem>>, vector<2x4x256xbf16>
    %1 = arith.extf %0 : vector<2x4x256xbf16> to vector<2x4x256xf32>
    %c0_2 = arith.constant 0 : index
    %c0_3 = arith.constant 0 : index
    %c0_4 = arith.constant 0 : index
    %2 = vector.load %arg2[%c0_2, %c0_3, %c0_4] : memref<1x4x1xf32, #tpu.memory_space<vmem>>, vector<1x4x1xf32>
    %3 = vector.broadcast %2 : vector<1x4x1xf32> to vector<2x4x256xf32>
    %4 = arith.mulf %1, %3 : vector<2x4x256xf32>
    %c0_5 = arith.constant 0 : index
    %c0_6 = arith.constant 0 : index
    %c0_7 = arith.constant 0 : index
    %5 = vector.load %arg3[%c0_5, %c0_6, %c0_7] : memref<1x4x1xf32, #tpu.memory_space<vmem>>, vector<1x4x1xf32>
    %6 = vector.broadcast %5 : vector<1x4x1xf32> to vector<2x4x256xf32>
    %7 = arith.addf %4, %6 : vector<2x4x256xf32>
    %cst = arith.constant 0.000000e+00 : f32
    %8 = vector.broadcast %cst : f32 to vector<2x4x256xf32>
    %9 = arith.maximumf %7, %8 : vector<2x4x256xf32>
    %c0_8 = arith.constant 0 : index
    %c0_9 = arith.constant 0 : index
    %c0_10 = arith.constant 0 : index
    %10 = vector.load %arg4[%c0_8, %c0_9, %c0_10] : memref<2x4x256xf32, #tpu.memory_space<vmem>>, vector<2x4x256xf32>
    tpu.vector_store %arg4[%c0_8, %c0_9, %c0_10], %9 {strides = array<i32>} : memref<2x4x256xf32, #tpu.memory_space<vmem>>, vector<2x4x256xf32>,
    return
  }
  func.func @transform_0(%arg0: i32) -> (i32, i32, i32) {
    %c0_i32 = arith.constant 0 : i32
    %c0_i32_0 = arith.constant 0 : i32
    %c0_i32_1 = arith.constant 0 : i32
    return %arg0, %c0_i32, %c0_i32_0 : i32, i32, i32
  }
  func.func @transform_1(%arg0: i32) -> (i32, i32, i32) {
    %c0_i32 = arith.constant 0 : i32
    %c0_i32_0 = arith.constant 0 : i32
    %c0_i32_1 = arith.constant 0 : i32
    %c0_i32_2 = arith.constant 0 : i32
    return %c0_i32, %c0_i32_0, %c0_i32_1 : i32, i32, i32
  }
  func.func @transform_2(%arg0: i32) -> (i32, i32, i32) {
    %c0_i32 = arith.constant 0 : i32
    %c0_i32_0 = arith.constant 0 : i32
    %c0_i32_1 = arith.constant 0 : i32
    %c0_i32_2 = arith.constant 0 : i32
    return %c0_i32, %c0_i32_0, %c0_i32_1 : i32, i32, i32
  }
  func.func @transform_3(%arg0: i32) -> (i32, i32, i32) {
    %c0_i32 = arith.constant 0 : i32
    %c0_i32_0 = arith.constant 0 : i32
    %c0_i32_1 = arith.constant 0 : i32
    return %arg0, %c0_i32, %c0_i32_0 : i32, i32, i32
  }
}

</mosaic_0001>

<bundles_post_ra>
// kernel: conv_block_forward.3
= control target key start
LH: loop header
LB: loop body
LE: loop exit
PB: predicated region body
PF: predicated region fallthrough
CT: control target
= control target key end

     0   :  { %v63_v0 = vmov 0   ;;  %v64_v3 = vmov 839922192   ;;  %v26_v5 = vlaneseq  ;;  %s100_s1 = inlined_call_operand.vmem [shape: f32[1,4,1], index: 1, kind: input, shape index: {}]   ;;  %s101_s2 = inlined_call_operand.vmem [shape: f32[1,4,1], index: 2, kind: input, shape index: {}]   ;;  %s102_s0 = inlined_call_operand.vmem [shape: bf16[2,4,256], index: 0, kind: input, shape index: {}]   ;;  %s103_s3 = inlined_call_operand.vmem [shape: f32[2,4,256], index: 3, kind: output, shape index: {}]  }
   0x1   :  { %62 = vset.pattern.permute.xlu0 %v63_v0  ;;  %v18_v1 = vld [vmem:[%s100_s1] sm:$0xf]  ;;  %v24_v4 = vunpack.c.l.s4 %v64_v3 }
   0x2   :  { %21 = vperm.xlu0 %62, %v18_v1   ;;  %v33_v2 = vld [vmem:[%s101_s2] sm:$0xf]  ;;  %v27_v7 = vshrl.u32 %v26_v5, 7 }
   0x3   :  { %v25_v6 = vunpack.c.0.s8 %v24_v4  ;;  %v57_v9 = vld [vmem:[%s102_s0] sm:$0xff]  }
   0x4   :  { %v58_v11 = vunpack.c.l.bf16 %v57_v9  ;;  %v59_v12 = vunpack.c.h.bf16 %v57_v9 }
   0x5   :  { %v28_v8 = vsub.s32 %v25_v6, %v27_v7 }
   0x6   :  { %36 = vperm.xlu0 %62, %v33_v2  }
  0x81   :  { %v22_v10 = vpop.permute.xlu0 %21 }
  0x82   :  { %v29_v13 = vrot.slane %v22_v10, %v28_v8 }
  0x84   :  { %v31_v15 = vmul.f32 %v58_v11, %v29_v13  ;;  %v32_v16 = vmul.f32 %v59_v12, %v29_v13 }
  0x85   :  { %v37_v14 = vpop.permute.xlu0 %36 }
  0x86   :  { %v44_v17 = vrot.slane %v37_v14, %v28_v8 }
  0x88   :  { %v46_v18 = vadd.f32 %v44_v17, %v31_v15  ;;  %v47_v19 = vadd.f32 %v44_v17, %v32_v16 }
  0x8a   :  { %v48_v20 = vmax.f32 %v46_v18, 0.0  ;;  %v49_v21 = vmax.f32 %v47_v19, 0.0 }
  0x8c   :  { %50 = vst [vmem:[%s103_s3] sm:$0xff] %v48_v20  ;;  %51 = vst [vmem:[%s103_s3 + $0x8] sm:$0xff] %v49_v21 }

// kernel: conv_block_forward.2
= control target key start
LH: loop header
LB: loop body
LE: loop exit
PB: predicated region body
PF: predicated region fallthrough
CT: control target
= control target key end

     0   :  { %s4327_s12 = smov 0   ;;  %s6267_s0 = inlined_call_operand.vmem [shape: f32[2,16,16,4], index: 0, kind: input, shape index: {}]   ;;  %s6268_s1 = inlined_call_operand.vmem [shape: bf16[4,36], index: 1, kind: input, shape index: {}]   ;;  %s6269_s2 = inlined_call_operand.vmem [shape: bf16[2,4,256], index: 2, kind: output, shape index: {0}]   ;;  %s6270_s3 = inlined_call_operand.vmem [shape: f32[2,4,2], index: 3, kind: output, shape index: {1}]  }
   0x1 LB: > { %s3912_s13 = sadd.s32 4294967295, %s4296_s12   ;;  %p3916_p0 = scmp.ge.s32.totalorder %s4296_s12, 1  ;;  %s4296_s12 = sphi %s4327_s12, %s14_s12  }
   0x2   : > { %p140_p1 = scmp.lt.s32.totalorder %s4296_s12, 3 }
   0x4   : > { %p141_p2 = pnand %p3916_p0, %p140_p1 }
   0x5   : > { %vm183_vm0 = vcmask (!%p141_p2), 27648   ;;  %vm186_vm1 = vcmask (!%p141_p2), 24576   ;;  %vm193_vm2 = vsmask.f32 (!%p141_p2), 256  ;;  %v4298_v0 = vmov (!%p141_p2), 0   ;;  %p168_p3 = scmp.lt.s32.totalorder (!%p141_p2), %s3912_s13, 1 }
   0x6   : > { %144 = sbr.rel (%p141_p2) target bundleno = 901 (0x385), region = 28  ;;  %184 = vst.msk [vmem:[#allocation2] sm:$0xf] (!%p141_p2), %vm183_vm0, %v4298_v0  ;;  %185 = vst.msk [vmem:[#allocation2 + $0x4] sm:$0xf] (!%p141_p2), %vm183_vm0, %v4298_v0  ;;  %vm1369_vm5 = vcmask (!%p141_p2), 1042432  }
   0x7   : > { %187 = vst.msk [vmem:[#allocation2 + $0x8] sm:$0x1] (!%p141_p2), %vm186_vm1, %v4298_v0  ;;  %vm4340_vm3 = vmand (!%p141_p2), %vm186_vm1, %vm193_vm2  ;;  %vm249_vm4 = vsmask.f32 (!%p141_p2), 7938  ;;  %v198_v2 = vld [vmem:[#allocation2 + $0xc] sm:$0x1] (!%p141_p2) }
   0x8   : > { %189 = vst.msk [vmem:[#allocation2 + $0xcc] sm:$0xf] (!%p141_p2), %vm183_vm0, %v4298_v0  ;;  %190 = vst.msk [vmem:[#allocation2 + $0xd0] sm:$0xf] (!%p141_p2), %vm183_vm0, %v4298_v0  ;;  %v222_v3 = vld [vmem:[#allocation2 + $0x6c] sm:$0x1] (!%p141_p2) }
   0x9   : > { %191 = vst.msk [vmem:[#allocation2 + $0xd4] sm:$0x1] (!%p141_p2), %vm186_vm1, %v4298_v0  ;;  %vm1370_vm6 = vcmask (!%p141_p2), 1046532   ;;  %v199_v4 = vsel (!%p141_p2), %vm4340_vm3, 0, %v198_v2  ;;  %v223_v5 = vsel (!%p141_p2), %vm4340_vm3, 0, %v222_v3  ;;  %vm4357_vm7 = vmand (!%p141_p2), %vm186_vm1, %vm249_vm4  ;;  %s4299_s18 = smov (!%p141_p2), 8  }
   0xa   : > { %v201_v6 = vld [vmem:[#allocation2 + $0x18] sm:$0x1] (!%p141_p2)  ;;  %200 = vst [vmem:[#allocation2 + $0xc] sm:$0x1] (!%p141_p2), %v199_v4  ;;  %224 = vst [vmem:[#allocation2 + $0x6c] sm:$0x1] (!%p141_p2), %v223_v5 }
   0xb   : > { %v202_v7 = vsel (!%p141_p2), %vm4340_vm3, 0, %v201_v6  ;;  %v225_v8 = vld [vmem:[#allocation2 + $0x78] sm:$0x1] (!%p141_p2)  ;;  %vm4365_vm8 = vmor (!%p141_p2), %vm1369_vm5, %vm1370_vm6  ;;  %vm433_vm9 = vsmask.f32 (!%p141_p2), 4368  ;;  %s4300_s19 = smov (!%p141_p2), 12  }
   0xc   : > { %203 = vst [vmem:[#allocation2 + $0x18] sm:$0x1] (!%p141_p2), %v202_v7  ;;  %v226_v10 = vsel (!%p141_p2), %vm4340_vm3, 0, %v225_v8  ;;  %v219_v12 = vld [vmem:[#allocation2 + $0x60] sm:$0x1] (!%p141_p2)  ;;  %vm4397_vm10 = vmand (!%p141_p2), %vm183_vm0, %vm249_vm4  ;;  %s4301_s20 = smov (!%p141_p2), 24  }
   0xd   : > { %s6287_s13 = smov (!%p168_p3, %s3912_s13), 1  ;;  %227 = vst [vmem:[#allocation2 + $0x78] sm:$0x1] %v226_v10  ;;  %v275_v13 = vld [vmem:[#allocation2 + $0x68] sm:$0x1]  ;;  %v220_v17 = vsel %vm4340_vm3, 0, %v219_v12  ;;  %vm4405_vm11 = vmor %vm193_vm2, %vm433_vm9 }
   0xe   : > { %s4151_s14 = sshll.u32 %s6287_s13, 8  ;;  %v276_v18 = vsel %vm4357_vm7, 0, %v275_v13  ;;  %v251_v19 = vld [vmem:[#allocation2 + $0x8] sm:$0x1]  ;;  %v4381_v20 = vld [vmem:[#allocation2 + $0x4] sm:$0xf] }
   0xf   : > { %s4372_s17 = scalar_lea.vmem %s6267_s0, %s4151_s14  ;;  %v1305_v21 = vld [vmem:[#allocation2] sm:$0xe]  ;;  %221 = vst [vmem:[#allocation2 + $0x60] sm:$0x1] %v220_v17  ;;  %277 = vst [vmem:[#allocation2 + $0x68] sm:$0x1] %v276_v18 }
  0x10   : > { %v305_v14 = vld [vmem:[%s4372_s17] sm:$0xff]  ;;  %v306_v15 = vld [vmem:[%s4372_s17 + $0x8] sm:$0xff]  ;;  %v252_v25 = vsel %vm4357_vm7, 0, %v251_v19  ;;  %v3954_v26 = vrot.slane %v1305_v21, 9  ;;  %v1374_v27 = vrot.slane %v4381_v20, 5  ;;  %v307_v34 = vld [vmem:[%s4372_s17 + $0x10] sm:$0xff] }
  0x11   : > { %v321_v16 = vld [vmem:[%s4372_s17 + $0x80] sm:$0xff]  ;;  %v4153_v22 = vpack.c.bf16 %v305_v14, %v305_v14  ;;  %v4154_v23 = vpack.c.bf16 %v306_v15, %v306_v15  ;;  %v322_v29 = vld [vmem:[%s4372_s17 + $0x88] sm:$0xff]  ;;  %253 = vst [vmem:[#allocation2 + $0x8] sm:$0x1] %v252_v25  ;;  %v308_v35 = vld [vmem:[%s4372_s17 + $0x18] sm:$0xff]  ;;  %v4155_v49 = vpack.c.bf16 %v307_v34, %v307_v34  ;;  %s4302_s21 = smov 4  }
  0x12   : > { %v4169_v24 = vpack.c.bf16 %v321_v16, %v321_v16  ;;  %v195_v28 = vld [vmem:[#allocation2] sm:$0x1]  ;;  %v4393_v36 = vsel %vm4365_vm8, %v3954_v26, %v1374_v27  ;;  %v1376_v37 = vrot.slane %v1374_v27, 4  ;;  %v4170_v39 = vpack.c.bf16 %v322_v29, %v322_v29  ;;  %v758_v46 = vld [vmem:[#allocation2 + $0xc] sm:$0xf]  ;;  %v323_v0 = vld [vmem:[%s4372_s17 + $0x90] sm:$0xff] }
  0x13   : > { %v196_v30 = vsel %vm4340_vm3, 0, %v195_v28  ;;  %v436_v31 = vshrl.u32 %v4153_v22, 16  ;;  %v439_v32 = vshll.u32 %v4153_v22, 16  ;;  %v444_v33 = vshrl.u32 %v4154_v23, 16  ;;  %v814_v61 = vld [vmem:[#allocation2 + $0x6c] sm:$0xf] }
  0x14   : > { %197 = vst [vmem:[#allocation2] sm:$0x1] %v196_v30  ;;  %v447_v38 = vshll.u32 %v4154_v23, 16  ;;  %v572_v43 = vshrl.u32 %v4169_v24, 16  ;;  %v575_v44 = vshll.u32 %v4169_v24, 16  ;;  %v580_v47 = vshrl.u32 %v4170_v39, 16 }
  0x15   : > { %v438_v41 = vrot.slane %v436_v31, 7  ;;  %v4401_v42 = vrot.slane %v444_v33, 7  ;;  %v583_v48 = vshll.u32 %v4170_v39, 16  ;;  %v4156_v50 = vpack.c.bf16 %v308_v35, %v308_v35  ;;  %v324_v2 = vld [vmem:[%s4372_s17 + $0x98] sm:$0xff]  ;;  %v319_v29 = vld [vmem:[%s4372_s17 + $0x70] sm:$0xff]  ;;  %v325_v39 = vld [vmem:[%s4372_s17 + $0xa0] sm:$0xff] }
  0x16   : > { %v574_v55 = vrot.slane %v572_v43, 7  ;;  %v4411_v56 = vrot.slane %v580_v47, 7  ;;  %v453_v57 = vshrl.u32 %v4155_v49, 16  ;;  %v456_v58 = vshll.u32 %v4155_v49, 16  ;;  %v765_v16 = vld [vmem:[#allocation2 + $0x18] sm:$0xf] }
  0x17   : > { %v441_v51 = vor.u32 %v439_v32, %v438_v41  ;;  %v442_v52 = vrot.slane %v438_v41, 4  ;;  %v449_v53 = vor.u32 %v447_v38, %v4401_v42  ;;  %v451_v54 = vrot.slane %v4401_v42, 4  ;;  %v320_v30 = vld [vmem:[%s4372_s17 + $0x78] sm:$0xff]  ;;  %v326_v41 = vld [vmem:[%s4372_s17 + $0xa8] sm:$0xff]  ;;  %s4303_s22 = smov 20   ;;  %s4304_s23 = smov 32  }
  0x18   : > { %v461_v62 = vshrl.u32 %v4156_v50, 16  ;;  %v464_v63 = vshll.u32 %v4156_v50, 16  ;;  %v4419_v3 = vld [vmem:[#allocation2 + $0x8] sm:$0x1]  ;;  %v577_v4 = vor.u32 %v575_v44, %v574_v55  ;;  %v578_v5 = vrot.slane %v574_v55, 4  ;;  %s4305_s24 = smov 16  }
  0x19   : > { %v450_v59 = vsel %vm4405_vm11, %v442_v52, %v449_v53  ;;  %v759_v60 = vsel %vm4397_vm10, %v441_v51, %v758_v46  ;;  %v585_v6 = vor.u32 %v583_v48, %v4411_v56  ;;  %v587_v7 = vrot.slane %v4411_v56, 4  ;;  %s4306_s25 = smov 28   ;;  %v302_v1 = vld [vmem:[#allocation2 + $0xd4] sm:$0x1]  ;;  %s4152_s28 = sshll.u32 %s6287_s13, 2 }
  0x1a   : > { %760 = vst [vmem:[#allocation2 + $0xc] sm:$0xf] %v759_v60  ;;  %761 = vst.msk [vmem:[#allocation2 + $0x10] sm:$0xf] %vm183_vm0, %v450_v59  ;;  %v941_v8 = vshll.u32 %v4419_v3, 16  ;;  %v1377_v10 = vrot.slane %v4419_v3, 5  ;;  %v815_v15 = vsel %vm4397_vm10, %v577_v4, %v814_v61  ;;  %v4171_v17 = vpack.c.bf16 %v323_v0, %v323_v0  ;;  %s177_s4 = scalar_lea.vmem %s6269_s2, %s4152_s28  ;;  %s181_s7 = scalar_lea.vmem %s6270_s3, %s4152_s28 }
  0x1b   : > { %v455_v12 = vrot.slane %v453_v57, 7  ;;  %v4426_v13 = vrot.slane %v461_v62, 7  ;;  %v586_v14 = vsel %vm4405_vm11, %v578_v5, %v585_v6  ;;  %v4172_v18 = vpack.c.bf16 %v324_v2, %v324_v2  ;;  %816 = vst [vmem:[#allocation2 + $0x6c] sm:$0xf] %v815_v15  ;;  %v4436_v24 = vld [vmem:[#allocation2] sm:$0xf] }
  0x1c   : > { %v1378_v19 = vsel %vm4365_vm8, %v1376_v37, %v1377_v10  ;;  %817 = vst.msk [vmem:[#allocation2 + $0x70] sm:$0xf] %vm183_vm0, %v586_v14  ;;  %v589_v27 = vshrl.u32 %v4171_v17, 16  ;;  %v592_v28 = vshll.u32 %v4171_v17, 16  ;;  %v925_v37 = vshll.u32 %v4436_v24, 16 }
  0x1d   : > { %v458_v21 = vor.u32 %v456_v58, %v455_v12  ;;  %v459_v22 = vrot.slane %v455_v12, 4  ;;  %v466_v23 = vor.u32 %v464_v63, %v4426_v13  ;;  %v4034_v25 = vcombine.low %v4393_v36, %v1378_v19  ;;  %v821_v60 = vld [vmem:[#allocation2 + $0x78] sm:$0xf] }
  0x1e   : > { %v468_v26 = vrot.slane %v4426_v13, 4  ;;  %v597_v33 = vshrl.u32 %v4172_v18, 16  ;;  %v600_v34 = vshll.u32 %v4172_v18, 16  ;;  %v591_v35 = vrot.slane %v589_v27, 7 }
  0x1f   : > { %v467_v31 = vsel %vm4405_vm11, %v459_v22, %v466_v23  ;;  %v766_v32 = vsel %vm4397_vm10, %v458_v21, %v765_v16  ;;  %2893 = vrot.lane.b32.xlu1 %v4034_v25, %s4299_s18  ;;  %v922_v36 = vshrl.u32 %v4436_v24, 16  ;;  %v931_v38 = vshll.u32 %v4381_v20, 16 }
  0x20   : > { %767 = vst [vmem:[#allocation2 + $0x18] sm:$0xf] %v766_v32  ;;  %768 = vst.msk [vmem:[#allocation2 + $0x1c] sm:$0xf] %vm183_vm0, %v467_v31  ;;  %v4455_v46 = vrot.slane %v597_v33, 7  ;;  %v935_v47 = vshrl.u32 %v4381_v20, 16  ;;  %v4458_v48 = vpack.c.bf16 %v319_v29, %v319_v29  ;;  %v4460_v49 = vpack.c.bf16 %v320_v30, %v320_v30 }
  0x21   : > { %v1484_v43 = vld [vmem:[#allocation2 + $0xc] sm:$0xf]  ;;  %v4453_v44 = vld [vmem:[#allocation2 + $0x10] sm:$0xf]  ;;  %vm918_vm12 = vsmask.f32 3328  ;;  %v594_v57 = vor.u32 %v592_v28, %v591_v35  ;;  %v4472_v2 = vpack.c.bf16 %v325_v39, %v325_v39  ;;  %v4474_v4 = vpack.c.bf16 %v326_v41, %v326_v41 }
  0x22   : > { %v1542_v50 = vshll.u32 %v4453_v44, 16  ;;  %v1546_v51 = vshrl.u32 %v4453_v44, 16  ;;  %v4050_v52 = vcombine.low %v1484_v43, %v4453_v44  ;;  %v1533_v53 = vshrl.u32 %v1484_v43, 16  ;;  %v309_v20 = vld [vmem:[%s4372_s17 + $0x20] sm:$0xff]  ;;  %v1500_v63 = vld [vmem:[#allocation2 + $0x6c] sm:$0xf] }
  0x23   : > { %vm919_vm13 = vsmask.f32 7440  ;;  %v1536_v55 = vshll.u32 %v1484_v43, 16  ;;  %v595_v58 = vrot.slane %v591_v35, 4  ;;  %v602_v59 = vor.u32 %v600_v34, %v4455_v46  ;;  %v4470_v0 = vld [vmem:[#allocation2 + $0x70] sm:$0xf] }
  0x24   : > { %v4467_v61 = vrot.slane %v1546_v51, 4  ;;  %2989 = vrot.lane.b32.xlu0 %v4050_v52, %s4300_s19  ;;  %v1535_v62 = vrot.slane %v1533_v53, 4  ;;  %v1738_v6 = vshrl.u32 %v4470_v0, 16  ;;  %v4058_v10 = vcombine.low %v1500_v63, %v4470_v0  ;;  %v254_v30 = vld [vmem:[#allocation2 + $0x14] sm:$0x1]  ;;  %vm4512_vm14 = vmor %vm918_vm12, %vm919_vm13 }
  0x25   : > { %v1538_v5 = vrot.slane %v1536_v55, 5  ;;  %v1725_v12 = vshrl.u32 %v1500_v63, 16  ;;  %v1728_v14 = vshll.u32 %v1500_v63, 16  ;;  %v603_v15 = vsel %vm4405_vm11, %v595_v58, %v602_v59  ;;  %v1916_v35 = vld [vmem:[#allocation2 + $0xc] sm:$0xe] }
  0x26   : > { %v604_v16 = vrot.slane %v4455_v46, 4  ;;  %v822_v17 = vsel %vm4397_vm10, %v594_v57, %v821_v60  ;;  %3005 = vrot.lane.b32.xlu1 %v4058_v10, %s4300_s19  ;;  %824 = vst.msk [vmem:[#allocation2 + $0x7c] sm:$0xf] %vm183_vm0, %v603_v15  ;;  %v924_v23 = vrot.slane %v922_v36, 4  ;;  %v4489_v24 = vpack.c.bf16 %v309_v20, %v309_v20 }
  0x27   : > { %v1539_v18 = vor.u32 %v1538_v5, %v1535_v62  ;;  %v4484_v19 = vrot.slane %v1725_v12, 4  ;;  %v2093_v21 = vld [vmem:[#allocation2 + $0x18] sm:$0xf]  ;;  %v4486_v22 = vld [vmem:[#allocation2 + $0x1c] sm:$0xf]  ;;  %v4491_v25 = vrot.slane %v1728_v14, 5 }
  0x28   : > { %823 = vst [vmem:[#allocation2 + $0x78] sm:$0xf] %v822_v17  ;;  %v2142_v27 = vshrl.u32 %v2093_v21, 16  ;;  %v2145_v28 = vshll.u32 %v2093_v21, 16  ;;  %v2155_v29 = vshrl.u32 %v4486_v22, 16  ;;  %v4098_v32 = vcombine.low %v2093_v21, %v4486_v22 }
  0x29   : > { %v4494_v31 = vrot.slane %v1539_v18, 4  ;;  %v927_v33 = vrot.slane %v925_v37, 5  ;;  %v933_v34 = vrot.slane %v931_v38, 5  ;;  %v937_v36 = vrot.slane %v935_v47, 4  ;;  %v278_v38 = vld [vmem:[#allocation2 + $0x74] sm:$0x1] }
  0x2a   : > { %v4497_v39 = vrot.slane %v2142_v27, 4  ;;  %v4499_v41 = vrot.slane %v2145_v28, 5  ;;  %v943_v43 = vrot.slane %v941_v8, 5  ;;  %3245 = vrot.lane.b32.xlu0 %v4098_v32, %s4301_s20  ;;  %v555_v52 = vshrl.u32 %v4458_v48, 16  ;;  %v811_v21 = vld [vmem:[#allocation2 + $0x68] sm:$0x1] }
  0x2b   : > { %v928_v51 = vor.u32 %v927_v33, %v924_v23  ;;  %v558_v53 = vshll.u32 %v4458_v48, 16  ;;  %v563_v37 = vshrl.u32 %v4460_v49, 16  ;;  %v938_v55 = vor.u32 %v937_v36, %v933_v34  ;;  %v807_v48 = vld [vmem:[#allocation2 + $0x60] sm:$0xf] }
  0x2c   : > { %v566_v57 = vshll.u32 %v4460_v49, 16  ;;  %v255_v47 = vsel %vm4357_vm7, 0, %v254_v30  ;;  %v3970_v58 = vrot.slane %v1916_v35, 9  ;;  %v557_v59 = vrot.slane %v555_v52, 7  ;;  %v281_v52 = vld [vmem:[#allocation2 + $0x80] sm:$0x1] }
  0x2d   : > { %v929_v8 = vrot.slane %v928_v51, 4  ;;  %v565_v60 = vrot.slane %v563_v37, 7  ;;  %256 = vst [vmem:[#allocation2 + $0x14] sm:$0x1] %v255_v47  ;;  %v1982_v20 = vrot.slane %v4453_v44, 5  ;;  %v939_v49 = vrot.slane %v938_v55, 4 }
  0x2e   : > { %v4517_v63 = vld [vmem:[#allocation2 + $0x7c] sm:$0xf]  ;;  %v279_v5 = vsel %vm4357_vm7, 0, %v278_v38  ;;  %v1731_v10 = vor.u32 %v4491_v25, %v4484_v19  ;;  %v2148_v12 = vor.u32 %v4499_v41, %v4497_v39  ;;  %v560_v28 = vor.u32 %v558_v53, %v557_v59  ;;  %v1924_v19 = vld [vmem:[#allocation2 + $0x6c] sm:$0xe] }
  0x2f   : > { %v2109_v62 = vld [vmem:[#allocation2 + $0x78] sm:$0xf]  ;;  %v2347_v17 = vshrl.u32 %v4517_v63, 16  ;;  %280 = vst [vmem:[#allocation2 + $0x74] sm:$0x1] %v279_v5  ;;  %v934_v23 = vsel %vm4512_vm14, %v929_v8, %v933_v34  ;;  %v944_v27 = vsel %vm4512_vm14, %v939_v49, %v943_v43  ;;  %v561_v30 = vrot.slane %v557_v59, 4 }
  0x30   : > { %v2334_v14 = vshrl.u32 %v2109_v62, 16  ;;  %v2337_v15 = vshll.u32 %v2109_v62, 16  ;;  %v4106_v18 = vcombine.low %v2109_v62, %v4517_v63  ;;  %v257_v25 = vld [vmem:[#allocation2 + $0x20] sm:$0x1]  ;;  %v4018_v35 = vcombine.low %v934_v23, %v944_v27  ;;  %v2525_v51 = vld [vmem:[#allocation2 + $0x18] sm:$0xe] }
  0x31   : > { %v568_v36 = vor.u32 %v566_v57, %v565_v60  ;;  %v570_v37 = vrot.slane %v565_v60, 4  ;;  %v808_v38 = vsel %vm4397_vm10, %v560_v28, %v807_v48  ;;  %v4536_v34 = vsel %vm4365_vm8, %v3970_v58, %v1982_v20  ;;  %v2533_v53 = vld [vmem:[#allocation2 + $0x78] sm:$0xe] }
  0x32   : > { %v2336_v32 = vrot.slane %v2334_v14, 4  ;;  %v2339_v33 = vrot.slane %v2337_v15, 5  ;;  %3261 = vrot.lane.b32.xlu1 %v4106_v18, %s4301_s20  ;;  %v4538_v43 = vrot.slane %v1982_v20, 4  ;;  %2813 = vrot.lane.b32.xlu0 %v4018_v35, %s4302_s21  ;;  %809 = vst [vmem:[#allocation2 + $0x60] sm:$0xf] %v808_v38  ;;  %v3978_v57 = vrot.slane %v1924_v19, 9 }
  0x33   : > { %v569_v55 = vsel %vm4405_vm11, %v561_v30, %v568_v36  ;;  %v2038_v47 = vrot.slane %v4470_v0, 5  ;;  %v258_v8 = vsel %vm4357_vm7, 0, %v257_v25  ;;  %v812_v58 = vsel %vm4340_vm3, %v570_v37, %v811_v21  ;;  %v4591_v35 = vld [vmem:[#allocation2 + $0x1c] sm:$0xf]  ;;  %v4603_v36 = vld [vmem:[#allocation2 + $0x78] sm:$0xf] }
  0x34   : > { %810 = vst.msk [vmem:[#allocation2 + $0x64] sm:$0xf] %vm183_vm0, %v569_v55  ;;  %v762_v59 = vld [vmem:[#allocation2 + $0x14] sm:$0x1]  ;;  %259 = vst [vmem:[#allocation2 + $0x20] sm:$0x1] %v258_v8  ;;  %v2340_v56 = vor.u32 %v2339_v33, %v2336_v32 }
  0x35   : > { %v3986_v60 = vrot.slane %v2525_v51, 9  ;;  %v2591_v48 = vrot.slane %v4486_v22, 5  ;;  %v282_v20 = vsel %vm4357_vm7, 0, %v281_v52  ;;  %813 = vst [vmem:[#allocation2 + $0x68] sm:$0x1] %v812_v58  ;;  %v763_v62 = vsel %vm4340_vm3, %v451_v54, %v762_v59 }
  0x36   : > { %v4558_v49 = vsel %vm4365_vm8, %v3978_v57, %v2038_v47  ;;  %v4560_v5 = vrot.slane %v2038_v47, 4  ;;  %283 = vst [vmem:[#allocation2 + $0x80] sm:$0x1] %v282_v20  ;;  %v3994_v14 = vrot.slane %v2533_v53, 9  ;;  %764 = vst [vmem:[#allocation2 + $0x14] sm:$0x1] %v763_v62 }
  0x37   : > { %v818_v15 = vld [vmem:[#allocation2 + $0x74] sm:$0x1]  ;;  %v4564_v18 = vsel %vm4365_vm8, %v3986_v60, %v2591_v48  ;;  %v4566_v21 = vrot.slane %v2591_v48, 4  ;;  %v2647_v42 = vrot.slane %v4517_v63, 5  ;;  %v4569_v23 = vrot.slane %v1731_v10, 4 }
  0x38   : > { %v819_v54 = vsel %vm4340_vm3, %v587_v7, %v818_v15  ;;  %v1734_v27 = vshll.u32 %v4470_v0, 16  ;;  %v1740_v28 = vrot.slane %v1738_v6, 4  ;;  %v4580_v30 = vrot.slane %v1542_v50, 5  ;;  %v4589_v7 = vld [vmem:[#allocation2 + $0x18] sm:$0xf] }
  0x39   : > { %820 = vst [vmem:[#allocation2 + $0x74] sm:$0x1] %v819_v54  ;;  %v4584_v19 = vsel %vm4365_vm8, %v3994_v14, %v2647_v42  ;;  %v4586_v10 = vrot.slane %v2647_v42, 4  ;;  %v2343_v25 = vshll.u32 %v4517_v63, 16  ;;  %v4601_v6 = vrot.slane %v2347_v17, 4 }
  0x3a   : > { %v4593_v0 = vrot.slane %v1734_v27, 5  ;;  %v1545_v44 = vsel %vm4512_vm14, %v4494_v31, %v4580_v30  ;;  %v1549_v50 = vor.u32 %v4467_v61, %v4580_v30  ;;  %v4605_v32 = vld [vmem:[#allocation2 + $0x7c] sm:$0xf]  ;;  %v1313_v63 = vld [vmem:[#allocation2 + $0x60] sm:$0xe]  ;;  %v4607_v51 = vrot.slane %v2340_v56, 4 }
  0x3b   : > { %v886_v33 = vld [vmem:[#allocation2 + $0x60] sm:$0xf]  ;;  %v4609_v52 = vrot.slane %v2343_v25, 5  ;;  %v4059_v37 = vcombine.low %v4603_v36, %v4605_v32  ;;  %v4051_v38 = vcombine.low %v4589_v7, %v4591_v35  ;;  %v887_v53 = vld [vmem:[#allocation2 + $0x64] sm:$0xf]  ;;  %v3962_v61 = vrot.slane %v1313_v63, 9 }
  0x3c   : > { %v769_v17 = vld [vmem:[#allocation2 + $0x20] sm:$0x1]  ;;  %v1114_v55 = vshrl.u32 %v886_v33, 16  ;;  %v1737_v57 = vsel %vm4512_vm14, %v4569_v23, %v4593_v0  ;;  %v1741_v47 = vor.u32 %v1740_v28, %v4593_v0  ;;  %v910_v8 = vld [vmem:[#allocation2 + $0x68] sm:$0x1]  ;;  %v1430_v58 = vrot.slane %v887_v53, 5 }
  0x3d   : > { %v770_v59 = vsel %vm4340_vm3, %v468_v26, %v769_v17  ;;  %v825_v60 = vld [vmem:[#allocation2 + $0x80] sm:$0x1]  ;;  %v1117_v48 = vshll.u32 %v886_v33, 16  ;;  %v2346_v20 = vsel %vm4512_vm14, %v4607_v51, %v4609_v52  ;;  %v1433_v62 = vrot.slane %v910_v8, 5  ;;  %v1516_v14 = vld [vmem:[#allocation2 + $0x14] sm:$0x1] }
  0x3e   : > { %771 = vst [vmem:[#allocation2 + $0x20] sm:$0x1] %v770_v59  ;;  %v826_v15 = vsel %vm4340_vm3, %v604_v16, %v825_v60  ;;  %v1116_v42 = vrot.slane %v1114_v55, 4  ;;  %v1123_v13 = vshll.u32 %v887_v53, 16  ;;  %v1431_v26 = vsel %vm4365_vm8, %v3962_v61, %v1430_v58 }
  0x3f   : > { %v1432_v23 = vrot.slane %v1430_v58, 4  ;;  %v1985_v54 = vrot.slane %v1516_v14, 5  ;;  %827 = vst [vmem:[#allocation2 + $0x80] sm:$0x1] %v826_v15  ;;  %v1119_v27 = vrot.slane %v1117_v48, 5  ;;  %v1127_v25 = vshrl.u32 %v887_v53, 16 }
  0x40   : > { %v1524_v28 = vld [vmem:[#allocation2 + $0x74] sm:$0x1]  ;;  %v1125_v56 = vrot.slane %v1123_v13, 5  ;;  %v1133_v0 = vshll.u32 %v910_v8, 16  ;;  %v1742_v63 = vrot.slane %v1741_v47, 4  ;;  %v1550_v60 = vrot.slane %v1549_v50, 4 }
  0x41   : > { %v1434_v46 = vsel %vm4365_vm8, %v1432_v23, %v1433_v62  ;;  %v1986_v16 = vsel %vm4365_vm8, %v4538_v43, %v1985_v54  ;;  %v2041_v33 = vrot.slane %v1524_v28, 5  ;;  %v1120_v17 = vor.u32 %v1119_v27, %v1116_v42 }
  0x42   : > { %v4042_v55 = vcombine.low %v1431_v26, %v1434_v46  ;;  %v4082_v61 = vcombine.low %v4536_v34, %v1986_v16  ;;  %v1129_v58 = vrot.slane %v1127_v25, 4  ;;  %v1135_v59 = vrot.slane %v1133_v0, 5  ;;  %v888_v0 = vld [vmem:[#allocation2 + $0x6c] sm:$0xf]  ;;  %v4664_v46 = vld [vmem:[#allocation2 + $0x70] sm:$0xf] }
  0x43   : > { %v2042_v53 = vsel %vm4365_vm8, %v4560_v5, %v2041_v33  ;;  %v1121_v8 = vrot.slane %v1120_v17, 4  ;;  %v1744_v47 = vshll.u32 %v1524_v28, 16  ;;  %v1552_v62 = vshll.u32 %v1516_v14, 16 }
  0x44   : > { %2909 = vrot.lane.b32.xlu1 %v4042_v55, %s4299_s18  ;;  %3149 = vrot.lane.b32.xlu0 %v4082_v61, %s4303_s22  ;;  %v4090_v43 = vcombine.low %v4558_v49, %v2042_v53  ;;  %v1130_v48 = vor.u32 %v1129_v58, %v1125_v56  ;;  %v2350_v34 = vor.u32 %v4601_v6, %v4609_v52  ;;  %v2149_v50 = vrot.slane %v2148_v12, 4 }
  0x45   : > { %v2125_v15 = vld [vmem:[#allocation2 + $0x20] sm:$0x1]  ;;  %v1126_v42 = vsel %vm4512_vm14, %v1121_v8, %v1125_v56  ;;  %v1746_v5 = vrot.slane %v1744_v47, 5  ;;  %v2151_v13 = vshll.u32 %v4486_v22, 16  ;;  %v1554_v49 = vrot.slane %v1552_v62, 5 }
  0x46   : > { %v2594_v26 = vrot.slane %v2125_v15, 5  ;;  %v2133_v23 = vld [vmem:[#allocation2 + $0x80] sm:$0x1]  ;;  %v1131_v54 = vrot.slane %v1130_v48, 4  ;;  %v2351_v27 = vrot.slane %v2350_v34, 4  ;;  %v1138_v58 = vshrl.u32 %v888_v0, 16 }
  0x47   : > { %v2650_v14 = vrot.slane %v2133_v23, 5  ;;  %v1747_v6 = vsel %vm4512_vm14, %v1742_v63, %v1746_v5  ;;  %v2353_v28 = vshll.u32 %v2133_v23, 16  ;;  %v2153_v25 = vrot.slane %v2151_v13, 5  ;;  %v872_v22 = vld [vmem:[#allocation2 + $0xc] sm:$0xf] }
  0x48   : > { %3165 = vrot.lane.b32.xlu1 %v4090_v43, %s4303_s22  ;;  %v2595_v39 = vsel %vm4365_vm8, %v4566_v21, %v2594_v26  ;;  %v1136_v41 = vsel %vm4512_vm14, %v1131_v54, %v1135_v59  ;;  %v4074_v12 = vcombine.low %v1737_v57, %v1747_v6  ;;  %v1555_v56 = vsel %vm4512_vm14, %v1550_v60, %v1554_v49  ;;  %v4675_v57 = vld [vmem:[#allocation2 + $0x74] sm:$0x1]  ;;  %v1314_v54 = vld [vmem:[#allocation2 + $0x6c] sm:$0xe] }
  0x49   : > { %v4130_v63 = vcombine.low %v4564_v18, %v2595_v39  ;;  %v2651_v16 = vsel %vm4365_vm8, %v4586_v10, %v2650_v14  ;;  %v4026_v33 = vcombine.low %v1126_v42, %v1136_v41  ;;  %v4066_v21 = vcombine.low %v1545_v44, %v1555_v56  ;;  %v4694_v48 = vld [vmem:[#allocation2 + $0x14] sm:$0x1] }
  0x4a   : > { %v4138_v17 = vcombine.low %v4584_v19, %v2651_v16  ;;  %v2355_v55 = vrot.slane %v2353_v28, 5  ;;  %v2154_v61 = vsel %vm4512_vm14, %v2149_v50, %v2153_v25  ;;  %v2157_v18 = vrot.slane %v2155_v29, 4  ;;  %v873_v29 = vld [vmem:[#allocation2 + $0x10] sm:$0xf]  ;;  %v1306_v28 = vld [vmem:[#allocation2 + $0xc] sm:$0xe] }
  0x4b   : > { %3405 = vrot.lane.b32.xlu0 %v4130_v63, %s4304_s23  ;;  %v2161_v10 = vshll.u32 %v2125_v15, 16  ;;  %v1141_v59 = vshll.u32 %v888_v0, 16  ;;  %v1147_v31 = vshll.u32 %v4664_v46, 16  ;;  %v1151_v44 = vshrl.u32 %v4664_v46, 16 }
  0x4c   : > { %3421 = vrot.lane.b32.xlu1 %v4138_v17, %s4304_s23  ;;  %v2356_v30 = vsel %vm4512_vm14, %v2351_v27, %v2355_v55  ;;  %v2158_v19 = vor.u32 %v2157_v18, %v2153_v25  ;;  %v1157_v53 = vshll.u32 %v4675_v57, 16  ;;  %v1140_v60 = vrot.slane %v1138_v58, 4 }
  0x4d   : > { %v4122_v8 = vcombine.low %v2346_v20, %v2356_v30  ;;  %v2163_v47 = vrot.slane %v2161_v10, 5  ;;  %v1143_v43 = vrot.slane %v1141_v59, 5  ;;  %v1149_v34 = vrot.slane %v1147_v31, 5 }
  0x4e   : > { %v2159_v62 = vrot.slane %v2158_v19, 4  ;;  %v1153_v15 = vrot.slane %v1151_v44, 4  ;;  %v1159_v42 = vrot.slane %v1157_v53, 5  ;;  %v946_v50 = vshrl.u32 %v872_v22, 16 }
  0x4f   : > { %2829 = vrot.lane.b32.xlu0 %v4026_v33, %s4302_s21  ;;  %v1144_v5 = vor.u32 %v1143_v43, %v1140_v60  ;;  %v949_v13 = vshll.u32 %v872_v22, 16  ;;  %v955_v26 = vshll.u32 %v873_v29, 16  ;;  %v959_v20 = vshrl.u32 %v873_v29, 16  ;;  %v1925_v60 = vld [vmem:[#allocation2 + $0x78] sm:$0xe] }
  0x50   : > { %3085 = vrot.lane.b32.xlu1 %v4074_v12, %s4305_s24  ;;  %v2164_v51 = vsel %vm4512_vm14, %v2159_v62, %v2163_v47  ;;  %v1154_v52 = vor.u32 %v1153_v15, %v1149_v34  ;;  %v965_v23 = vshll.u32 %v4694_v48, 16  ;;  %v948_v14 = vrot.slane %v946_v50, 4  ;;  %v1525_v15 = vld [vmem:[#allocation2 + $0x80] sm:$0x1] }
  0x51   : > { %v4114_v49 = vcombine.low %v2154_v61, %v2164_v51  ;;  %v1145_v27 = vrot.slane %v1144_v5, 4  ;;  %v951_v6 = vrot.slane %v949_v13, 5  ;;  %v957_v39 = vrot.slane %v955_v26, 5  ;;  %v1517_v26 = vld [vmem:[#allocation2 + $0x20] sm:$0x1] }
  0x52   : > { %v1155_v25 = vrot.slane %v1154_v52, 4  ;;  %v961_v41 = vrot.slane %v959_v20, 4  ;;  %v967_v56 = vrot.slane %v965_v23, 5  ;;  %v3963_v63 = vrot.slane %v1314_v54, 9 }
  0x53   : > { %3069 = vrot.lane.b32.xlu0 %v4066_v21, %s4305_s24  ;;  %v1150_v12 = vsel %vm4512_vm14, %v1145_v27, %v1149_v34  ;;  %v952_v0 = vor.u32 %v951_v6, %v948_v14  ;;  %v1437_v16 = vrot.slane %v4664_v46, 5  ;;  %v1440_v55 = vrot.slane %v4675_v57, 5 }
  0x54   : > { %3341 = vrot.lane.b32.xlu1 %v4122_v8, %s4306_s25  ;;  %v1160_v33 = vsel %vm4512_vm14, %v1155_v25, %v1159_v42  ;;  %v962_v17 = vor.u32 %v961_v41, %v957_v39  ;;  %v3955_v61 = vrot.slane %v1306_v28, 9  ;;  %v1381_v31 = vrot.slane %v873_v29, 5  ;;  %v1917_v41 = vld [vmem:[#allocation2 + $0x18] sm:$0xe] }
  0x55   : > { %v4027_v18 = vcombine.low %v1150_v12, %v1160_v33  ;;  %v953_v10 = vrot.slane %v952_v0, 4  ;;  %v1438_v21 = vsel %vm4365_vm8, %v3963_v63, %v1437_v16  ;;  %v1439_v58 = vrot.slane %v1437_v16, 4 }
  0x56   : > { %v963_v59 = vrot.slane %v962_v17, 4  ;;  %v1384_v46 = vrot.slane %v4694_v48, 5  ;;  %v1749_v30 = vshrl.u32 %v4603_v36, 16  ;;  %v1752_v44 = vshll.u32 %v4603_v36, 16 }
  0x57   : > { %3325 = vrot.lane.b32.xlu0 %v4114_v49, %s4306_s25  ;;  %v958_v19 = vsel %vm4512_vm14, %v953_v10, %v957_v39  ;;  %v1441_v57 = vsel %vm4365_vm8, %v1439_v58, %v1440_v55  ;;  %v1762_v53 = vshrl.u32 %v4605_v32, 16  ;;  %v1382_v8 = vsel %vm4365_vm8, %v3955_v61, %v1381_v31  ;;  %v228_v61 = vld [vmem:[#allocation2 + $0x84] sm:$0x1] }
  0x58   : > { %2831 = vrot.lane.b32.xlu1 %v4027_v18, %s4302_s21  ;;  %v968_v22 = vsel %vm4512_vm14, %v963_v59, %v967_v56  ;;  %v4043_v29 = vcombine.low %v1438_v21, %v1441_v57  ;;  %v1383_v47 = vrot.slane %v1381_v31, 4  ;;  %v1751_v48 = vrot.slane %v1749_v30, 4 }
  0x59   : > { %v4019_v43 = vcombine.low %v958_v19, %v968_v22  ;;  %v1754_v62 = vrot.slane %v1752_v44, 5  ;;  %v1557_v34 = vshrl.u32 %v4589_v7, 16  ;;  %v1560_v5 = vshll.u32 %v4589_v7, 16 }
  0x5a   : > { %v1385_v42 = vsel %vm4365_vm8, %v1383_v47, %v1384_v46  ;;  %v1570_v50 = vshrl.u32 %v4591_v35, 16  ;;  %v1758_v13 = vshll.u32 %v4605_v32, 16  ;;  %v1764_v23 = vrot.slane %v1762_v53, 4 }
  0x5b   : > { %2815 = vrot.lane.b32.xlu0 %v4019_v43, %s4302_s21  ;;  %v4035_v51 = vcombine.low %v1382_v8, %v1385_v42  ;;  %v1559_v52 = vrot.slane %v1557_v34, 4  ;;  %v1755_v20 = vor.u32 %v1754_v62, %v1751_v48  ;;  %v1562_v54 = vrot.slane %v1560_v5, 5  ;;  %v310_v8 = vld [vmem:[%s4372_s17 + $0x28] sm:$0xff] }
  0x5c   : > { %2911 = vrot.lane.b32.xlu1 %v4043_v29, %s4299_s18  ;;  %v1760_v49 = vrot.slane %v1758_v13, 5  ;;  %v1768_v27 = vshll.u32 %v1525_v15, 16  ;;  %v1566_v14 = vshll.u32 %v4591_v35, 16  ;;  %v1572_v28 = vrot.slane %v1570_v50, 4  ;;  %v204_v29 = vld [vmem:[#allocation2 + $0x24] sm:$0x1] }
  0x5d   : > { %v1756_v6 = vrot.slane %v1755_v20, 4  ;;  %v1576_v25 = vshll.u32 %v1517_v26, 16  ;;  %v3979_v39 = vrot.slane %v1925_v60, 9  ;;  %v1563_v0 = vor.u32 %v1562_v54, %v1559_v52  ;;  %v260_v13 = vld [vmem:[#allocation2 + $0x2c] sm:$0x1] }
  0x5e   : > { %v1765_v56 = vor.u32 %v1764_v23, %v1760_v49  ;;  %v1770_v12 = vrot.slane %v1768_v27, 5  ;;  %v1568_v63 = vrot.slane %v1566_v14, 5  ;;  %v2045_v17 = vrot.slane %v4605_v32, 5  ;;  %v874_v14 = vld [vmem:[#allocation2 + $0x18] sm:$0xf] }
  0x5f   : > { %2895 = vrot.lane.b32.xlu0 %v4035_v51, %s4299_s18  ;;  %v1761_v16 = vsel %vm4512_vm14, %v1756_v6, %v1760_v49  ;;  %v1578_v33 = vrot.slane %v1576_v25, 5  ;;  %v2048_v55 = vrot.slane %v1525_v15, 5  ;;  %v1564_v10 = vrot.slane %v1563_v0, 4 }
  0x60   : > { %3007 = vrot.lane.b32.xlu1 %v4059_v37, %s4300_s19  ;;  %v1766_v18 = vrot.slane %v1765_v56, 4  ;;  %v1573_v21 = vor.u32 %v1572_v28, %v1568_v63  ;;  %v3971_v58 = vrot.slane %v1917_v41, 9  ;;  %v2046_v59 = vsel %vm4365_vm8, %v3979_v39, %v2045_v17 }
  0x61   : > { %v2047_v31 = vrot.slane %v2045_v17, 4  ;;  %v1989_v46 = vrot.slane %v4591_v35, 5  ;;  %v1992_v30 = vrot.slane %v1517_v26, 5  ;;  %v1569_v57 = vsel %vm4512_vm14, %v1564_v10, %v1568_v63  ;;  %v284_v35 = vld [vmem:[#allocation2 + $0x8c] sm:$0x1] }
  0x62   : > { %v1771_v19 = vsel %vm4512_vm14, %v1766_v18, %v1770_v12  ;;  %v1574_v36 = vrot.slane %v1573_v21, 4  ;;  %v229_v32 = vsel %vm4340_vm3, 0, %v228_v61  ;;  %v606_v43 = vshrl.u32 %v4472_v2, 16  ;;  %v890_v26 = vld [vmem:[#allocation2 + $0x78] sm:$0xf] }
  0x63   : > { %2991 = vrot.lane.b32.xlu0 %v4051_v38, %s4300_s19  ;;  %v4075_v37 = vcombine.low %v1761_v16, %v1771_v19  ;;  %v2049_v44 = vsel %vm4365_vm8, %v2047_v31, %v2048_v55  ;;  %v1990_v53 = vsel %vm4365_vm8, %v3971_v58, %v1989_v46  ;;  %v1991_v22 = vrot.slane %v1989_v46, 4  ;;  %230 = vst [vmem:[#allocation2 + $0x84] sm:$0x1] %v229_v32  ;;  %v4789_v61 = vld [vmem:[#allocation2 + $0x1c] sm:$0xf] }
  0x64   : > { %v1579_v47 = vsel %vm4512_vm14, %v1574_v36, %v1578_v33  ;;  %v4091_v60 = vcombine.low %v2046_v59, %v2049_v44  ;;  %v609_v7 = vshll.u32 %v4472_v2, 16  ;;  %v614_v62 = vshrl.u32 %v4474_v4, 16  ;;  %v4796_v19 = vld [vmem:[#allocation2 + $0x78] sm:$0xe] }
  0x65   : > { %3087 = vrot.lane.b32.xlu1 %v4075_v37, %s4305_s24  ;;  %v4067_v38 = vcombine.low %v1569_v57, %v1579_v47  ;;  %v1993_v48 = vsel %vm4365_vm8, %v1991_v22, %v1992_v30  ;;  %v617_v34 = vshll.u32 %v4474_v4, 16  ;;  %v608_v42 = vrot.slane %v606_v43, 7  ;;  %v4776_v4 = vld [vmem:[#allocation2 + $0x7c] sm:$0xf]  ;;  %v4800_v37 = vld [vmem:[#allocation2 + $0x20] sm:$0x1] }
  0x66   : > { %v4083_v15 = vcombine.low %v1990_v53, %v1993_v48  ;;  %v205_v5 = vsel %vm4340_vm3, 0, %v204_v29  ;;  %v4158_v50 = vpack.c.bf16 %v310_v8, %v310_v8  ;;  %v616_v2 = vrot.slane %v614_v62, 7  ;;  %v327_v43 = vld [vmem:[%s4372_s17 + $0xb0] sm:$0xff]  ;;  %v328_v62 = vld [vmem:[%s4372_s17 + $0xb8] sm:$0xff] }
  0x67   : > { %3071 = vrot.lane.b32.xlu0 %v4067_v38, %s4305_s24  ;;  %206 = vst [vmem:[#allocation2 + $0x24] sm:$0x1] %v205_v5  ;;  %v470_v51 = vshrl.u32 %v4489_v24, 16  ;;  %v473_v52 = vshll.u32 %v4489_v24, 16  ;;  %v285_v20 = vsel %vm4357_vm7, 0, %v284_v35  ;;  %v611_v23 = vor.u32 %v609_v7, %v608_v42 }
  0x68   : > { %v612_v54 = vrot.slane %v608_v42, 4  ;;  %v478_v49 = vshrl.u32 %v4158_v50, 16  ;;  %v481_v27 = vshll.u32 %v4158_v50, 16  ;;  %286 = vst [vmem:[#allocation2 + $0x8c] sm:$0x1] %v285_v20  ;;  %v619_v6 = vor.u32 %v617_v34, %v616_v2  ;;  %v311_v34 = vld [vmem:[%s4372_s17 + $0x30] sm:$0xff] }
  0x69   : > { %3167 = vrot.lane.b32.xlu1 %v4091_v60, %s4303_s22  ;;  %v621_v28 = vrot.slane %v616_v2, 4  ;;  %v472_v25 = vrot.slane %v470_v51, 7  ;;  %v261_v39 = vsel %vm4357_vm7, 0, %v260_v13  ;;  %v4781_v24 = vld [vmem:[#allocation2 + $0x80] sm:$0x1]  ;;  %v1162_v12 = vshrl.u32 %v890_v26, 16 }
  0x6a   : > { %v828_v41 = vld [vmem:[#allocation2 + $0x84] sm:$0xf]  ;;  %v480_v56 = vrot.slane %v478_v49, 7  ;;  %262 = vst [vmem:[#allocation2 + $0x2c] sm:$0x1] %v261_v39  ;;  %v1165_v0 = vshll.u32 %v890_v26, 16  ;;  %v620_v16 = vsel %vm4405_vm11, %v612_v54, %v619_v6  ;;  %v4833_v6 = vpack.c.bf16 %v311_v34, %v311_v34 }
  0x6b   : > { %v1171_v63 = vshll.u32 %v4776_v4, 16  ;;  %3151 = vrot.lane.b32.xlu0 %v4083_v15, %s4303_s22  ;;  %v829_v33 = vsel %vm4397_vm10, %v611_v23, %v828_v41  ;;  %v475_v17 = vor.u32 %v473_v52, %v472_v25  ;;  %v476_v55 = vrot.slane %v472_v25, 4  ;;  %831 = vst.msk [vmem:[#allocation2 + $0x88] sm:$0xf] %vm183_vm0, %v620_v16  ;;  %v312_v15 = vld [vmem:[%s4372_s17 + $0x38] sm:$0xff] }
  0x6c   : > { %830 = vst [vmem:[#allocation2 + $0x84] sm:$0xf] %v829_v33  ;;  %v483_v18 = vor.u32 %v481_v27, %v480_v56  ;;  %v485_v10 = vrot.slane %v480_v56, 4  ;;  %v1164_v21 = vrot.slane %v1162_v12, 4  ;;  %v1167_v58 = vrot.slane %v1165_v0, 5 }
  0x6d   : > { %v4792_v59 = vrot.slane %v1171_v63, 5  ;;  %v1175_v31 = vshrl.u32 %v4776_v4, 16  ;;  %v1181_v46 = vshll.u32 %v4781_v24, 16  ;;  %v970_v30 = vshrl.u32 %v874_v14, 16 }
  0x6e   : > { %v484_v57 = vsel %vm4405_vm11, %v476_v55, %v483_v18  ;;  %v772_v36 = vld [vmem:[#allocation2 + $0x24] sm:$0xf]  ;;  %v1168_v32 = vor.u32 %v1167_v58, %v1164_v21  ;;  %v973_v44 = vshll.u32 %v874_v14, 16  ;;  %v979_v53 = vshll.u32 %v4789_v61, 16 }
  0x6f   : > { %v773_v22 = vsel %vm4397_vm10, %v475_v17, %v772_v36  ;;  %775 = vst.msk [vmem:[#allocation2 + $0x28] sm:$0xf] %vm183_vm0, %v484_v57  ;;  %v832_v29 = vld [vmem:[#allocation2 + $0x8c] sm:$0x1]  ;;  %v1177_v8 = vrot.slane %v1175_v31, 4  ;;  %v4806_v47 = vrot.slane %v1181_v46, 5  ;;  %v4829_v27 = vpack.c.bf16 %v327_v43, %v327_v43 }
  0x70   : > { %v972_v60 = vrot.slane %v970_v30, 4  ;;  %774 = vst [vmem:[#allocation2 + $0x24] sm:$0xf] %v773_v22  ;;  %v833_v7 = vsel %vm4340_vm3, %v621_v28, %v832_v29  ;;  %v4811_v35 = vrot.slane %v1168_v32, 4  ;;  %v975_v38 = vrot.slane %v973_v44, 5 }
  0x71   : > { %v4813_v48 = vrot.slane %v979_v53, 5  ;;  %834 = vst [vmem:[#allocation2 + $0x8c] sm:$0x1] %v833_v7  ;;  %v776_v42 = vld [vmem:[#allocation2 + $0x2c] sm:$0x1]  ;;  %v1178_v5 = vor.u32 %v1177_v8, %v4792_v59  ;;  %v983_v50 = vshrl.u32 %v4789_v61, 16  ;;  %v4831_v14 = vpack.c.bf16 %v328_v62, %v328_v62 }
  0x72   : > { %v989_v13 = vshll.u32 %v4800_v37, 16  ;;  %v3964_v26 = vrot.slane %v4796_v19, 9  ;;  %v777_v2 = vsel %vm4340_vm3, %v485_v10, %v776_v42  ;;  %v1174_v51 = vsel %vm4512_vm14, %v4811_v35, %v4792_v59  ;;  %v2112_v54 = vld [vmem:[#allocation2 + $0x88] sm:$0xf] }
  0x73   : > { %v976_v52 = vor.u32 %v975_v38, %v972_v60  ;;  %v1444_v20 = vrot.slane %v4776_v4, 5  ;;  %v2111_v23 = vld [vmem:[#allocation2 + $0x84] sm:$0xf]  ;;  %778 = vst [vmem:[#allocation2 + $0x2c] sm:$0x1] %v777_v2  ;;  %v4835_v28 = vpack.c.bf16 %v312_v15, %v312_v15  ;;  %v2371_v41 = vshrl.u32 %v2112_v54, 16 }
  0x74   : > { %v2534_v49 = vld [vmem:[#allocation2 + $0x84] sm:$0xe]  ;;  %v2358_v25 = vshrl.u32 %v2111_v23, 16  ;;  %v2361_v39 = vshll.u32 %v2111_v23, 16  ;;  %v4107_v56 = vcombine.low %v2111_v23, %v2112_v54  ;;  %v2367_v12 = vshll.u32 %v2112_v54, 16 }
  0x75   : > { %v3995_v0 = vrot.slane %v2534_v49, 9  ;;  %v2654_v63 = vrot.slane %v2112_v54, 5  ;;  %v1179_v16 = vrot.slane %v1178_v5, 4  ;;  %v2373_v18 = vrot.slane %v2371_v41, 4 }
  0x76   : > { %v2360_v33 = vrot.slane %v2358_v25, 4  ;;  %v2363_v17 = vrot.slane %v2361_v39, 5  ;;  %3263 = vrot.lane.b32.xlu1 %v4107_v56, %s4301_s20  ;;  %v2096_v55 = vld [vmem:[#allocation2 + $0x28] sm:$0xf]  ;;  %v4838_v10 = vrot.slane %v976_v52, 4  ;;  %v2369_v31 = vrot.slane %v2367_v12, 5 }
  0x77   : > { %v2095_v21 = vld [vmem:[#allocation2 + $0x24] sm:$0xf]  ;;  %v2179_v58 = vshrl.u32 %v2096_v55, 16  ;;  %v2175_v46 = vshll.u32 %v2096_v55, 16  ;;  %v2655_v30 = vsel %vm4365_vm8, %v3995_v0, %v2654_v63  ;;  %v2656_v15 = vrot.slane %v2654_v63, 4 }
  0x78   : > { %v2166_v57 = vshrl.u32 %v2095_v21, 16  ;;  %v2169_v36 = vshll.u32 %v2095_v21, 16  ;;  %v4099_v32 = vcombine.low %v2095_v21, %v2096_v55  ;;  %v2134_v44 = vld [vmem:[#allocation2 + $0x8c] sm:$0x1]  ;;  %v2364_v53 = vor.u32 %v2363_v17, %v2360_v33  ;;  %v2526_v43 = vld [vmem:[#allocation2 + $0x24] sm:$0xe] }
  0x79   : > { %v2374_v22 = vor.u32 %v2373_v18, %v2369_v31  ;;  %v2377_v29 = vshll.u32 %v2134_v44, 16  ;;  %v2177_v8 = vrot.slane %v2175_v46, 5  ;;  %v2181_v60 = vrot.slane %v2179_v58, 4  ;;  %v4895_v4 = vld [vmem:[#allocation2 + $0x24] sm:$0xf] }
  0x7a   : > { %v2168_v7 = vrot.slane %v2166_v57, 4  ;;  %v2171_v38 = vrot.slane %v2169_v36, 5  ;;  %3247 = vrot.lane.b32.xlu0 %v4099_v32, %s4301_s20  ;;  %v2365_v62 = vrot.slane %v2364_v53, 4  ;;  %v2126_v34 = vld [vmem:[#allocation2 + $0x2c] sm:$0x1]  ;;  %v2657_v49 = vrot.slane %v2134_v44, 5 }
  0x7b   : > { %v2375_v42 = vrot.slane %v2374_v22, 4  ;;  %v2379_v5 = vrot.slane %v2377_v29, 5  ;;  %v2182_v2 = vor.u32 %v2181_v60, %v2177_v8  ;;  %v2185_v52 = vshll.u32 %v2126_v34, 16  ;;  %v1307_v36 = vld [vmem:[#allocation2 + $0x18] sm:$0xe] }
  0x7c   : > { %v2370_v23 = vsel %vm4512_vm14, %v2365_v62, %v2369_v31  ;;  %v2172_v54 = vor.u32 %v2171_v38, %v2168_v7  ;;  %v3987_v25 = vrot.slane %v2526_v43, 9  ;;  %v2598_v12 = vrot.slane %v2096_v55, 5  ;;  %v4903_v43 = vld [vmem:[#allocation2 + $0x28] sm:$0xf] }
  0x7d   : > { %v2380_v39 = vsel %vm4512_vm14, %v2375_v42, %v2379_v5  ;;  %v2183_v41 = vrot.slane %v2182_v2, 4  ;;  %v2187_v56 = vrot.slane %v2185_v52, 5  ;;  %v2658_v63 = vsel %vm4365_vm8, %v2656_v15, %v2657_v49  ;;  %v1526_v52 = vld [vmem:[#allocation2 + $0x8c] sm:$0x1] }
  0x7e   : > { %v4123_v0 = vcombine.low %v2370_v23, %v2380_v39  ;;  %v2173_v33 = vrot.slane %v2172_v54, 4  ;;  %v2601_v17 = vrot.slane %v2126_v34, 5  ;;  %v4139_v21 = vcombine.low %v2655_v30, %v2658_v63  ;;  %v1518_v39 = vld [vmem:[#allocation2 + $0x2c] sm:$0x1] }
  0x7f   : > { %v2188_v18 = vsel %vm4512_vm14, %v2183_v41, %v2187_v56  ;;  %v2599_v58 = vsel %vm4365_vm8, %v3987_v25, %v2598_v12  ;;  %v2600_v31 = vrot.slane %v2598_v12, 4  ;;  %v1184_v55 = vsel %vm4512_vm14, %v1179_v16, %v4806_v47  ;;  %v4874_v16 = vld [vmem:[#allocation2 + $0x84] sm:$0xf] }
  0x80   : > { %3343 = vrot.lane.b32.xlu1 %v4123_v0, %s4306_s25  ;;  %v2178_v46 = vsel %vm4512_vm14, %v2173_v33, %v2177_v8  ;;  %v982_v57 = vsel %vm4512_vm14, %v4838_v10, %v4813_v48  ;;  %v985_v30 = vrot.slane %v983_v50, 4  ;;  %v4028_v53 = vcombine.low %v1174_v51, %v1184_v55  ;;  %v4876_v10 = vld [vmem:[#allocation2 + $0x88] sm:$0xf]  ;;  %v1926_v41 = vld [vmem:[#allocation2 + $0x84] sm:$0xe] }
  0x81   : > { %v4115_v32 = vcombine.low %v2178_v46, %v2188_v18  ;;  %v2602_v44 = vsel %vm4365_vm8, %v2600_v31, %v2601_v17  ;;  %v991_v47 = vrot.slane %v989_v13, 5  ;;  %v1445_v29 = vsel %vm4365_vm8, %v3964_v26, %v1444_v20 }
  0x82   : > { %v4131_v22 = vcombine.low %v2599_v58, %v2602_v44  ;;  %v986_v50 = vor.u32 %v985_v30, %v4813_v48  ;;  %v1446_v59 = vrot.slane %v1444_v20, 4  ;;  %v1447_v35 = vrot.slane %v4781_v24, 5 }
  0x83   : > { %3327 = vrot.lane.b32.xlu0 %v4115_v32, %s4306_s25  ;;  %v3956_v13 = vrot.slane %v1307_v36, 9  ;;  %v1388_v51 = vrot.slane %v4789_v61, 5  ;;  %v1391_v8 = vrot.slane %v4800_v37, 5  ;;  %v1773_v19 = vshrl.u32 %v4874_v16, 16 }
  0x84   : > { %3423 = vrot.lane.b32.xlu1 %v4139_v21, %s4304_s23  ;;  %v987_v48 = vrot.slane %v986_v50, 4  ;;  %v1776_v60 = vshll.u32 %v4874_v16, 16  ;;  %v1786_v26 = vshrl.u32 %v4876_v10, 16  ;;  %v1448_v20 = vsel %vm4365_vm8, %v1446_v59, %v1447_v35  ;;  %v231_v50 = vld [vmem:[#allocation2 + $0x90] sm:$0x1] }
  0x85   : > { %v1389_v24 = vsel %vm4365_vm8, %v3956_v13, %v1388_v51  ;;  %v1390_v61 = vrot.slane %v1388_v51, 4  ;;  %v4060_v37 = vcombine.low %v4874_v16, %v4876_v10  ;;  %v4044_v38 = vcombine.low %v1445_v29, %v1448_v20 }
  0x86   : > { %v992_v7 = vsel %vm4512_vm14, %v987_v48, %v991_v47  ;;  %v1775_v62 = vrot.slane %v1773_v19, 4  ;;  %v1778_v34 = vrot.slane %v1776_v60, 5  ;;  %v1581_v5 = vshrl.u32 %v4895_v4, 16 }
  0x87   : > { %3407 = vrot.lane.b32.xlu0 %v4131_v22, %s4304_s23  ;;  %v4020_v15 = vcombine.low %v982_v57, %v992_v7  ;;  %v1392_v42 = vsel %vm4365_vm8, %v1390_v61, %v1391_v8  ;;  %v1584_v2 = vshll.u32 %v4895_v4, 16  ;;  %v1594_v54 = vshrl.u32 %v4903_v43, 16  ;;  %v1918_v57 = vld [vmem:[#allocation2 + $0x24] sm:$0xe]  ;;  %v207_v7 = vld [vmem:[#allocation2 + $0x30] sm:$0x1] }
  0x88   : > { %2833 = vrot.lane.b32.xlu1 %v4028_v53, %s4302_s21  ;;  %v4036_v23 = vcombine.low %v1389_v24, %v1392_v42  ;;  %v4052_v49 = vcombine.low %v4895_v4, %v4903_v43  ;;  %v1779_v25 = vor.u32 %v1778_v34, %v1775_v62  ;;  %v1583_v56 = vrot.slane %v1581_v5, 4 }
  0x89   : > { %v1586_v12 = vrot.slane %v1584_v2, 5  ;;  %v1782_v0 = vshll.u32 %v4876_v10, 16  ;;  %v1788_v33 = vrot.slane %v1786_v26, 4  ;;  %v1792_v17 = vshll.u32 %v1526_v52, 16 }
  0x8a   : > { %v1780_v63 = vrot.slane %v1779_v25, 4  ;;  %v1590_v18 = vshll.u32 %v4903_v43, 16  ;;  %v1596_v21 = vrot.slane %v1594_v54, 4  ;;  %v1600_v46 = vshll.u32 %v1518_v39, 16  ;;  %v892_v54 = vld [vmem:[#allocation2 + $0x84] sm:$0xf] }
  0x8b   : > { %2817 = vrot.lane.b32.xlu0 %v4020_v15, %s4302_s21  ;;  %v1784_v58 = vrot.slane %v1782_v0, 5  ;;  %v1587_v31 = vor.u32 %v1586_v12, %v1583_v56  ;;  %v3980_v55 = vrot.slane %v1926_v41, 9  ;;  %v1794_v30 = vrot.slane %v1792_v17, 5  ;;  %v287_v15 = vld [vmem:[#allocation2 + $0x98] sm:$0x1] }
  0x8c   : > { %2913 = vrot.lane.b32.xlu1 %v4044_v38, %s4299_s18  ;;  %v1592_v36 = vrot.slane %v1590_v18, 5  ;;  %v2052_v32 = vrot.slane %v4876_v10, 5  ;;  %v2055_v44 = vrot.slane %v1526_v52, 5  ;;  %v1602_v22 = vrot.slane %v1600_v46, 5  ;;  %v4962_v18 = vld [vmem:[#allocation2 + $0x8c] sm:$0x1] }
  0x8d   : > { %v1785_v53 = vsel %vm4512_vm14, %v1780_v63, %v1784_v58  ;;  %v1789_v47 = vor.u32 %v1788_v33, %v1784_v58  ;;  %v1588_v16 = vrot.slane %v1587_v31, 4  ;;  %v3972_v13 = vrot.slane %v1918_v57, 9 }
  0x8e   : > { %v1597_v29 = vor.u32 %v1596_v21, %v1592_v36  ;;  %v2053_v59 = vsel %vm4365_vm8, %v3980_v55, %v2052_v32  ;;  %v2054_v35 = vrot.slane %v2052_v32, 4  ;;  %v1996_v8 = vrot.slane %v4903_v43, 5 }
  0x8f   : > { %2897 = vrot.lane.b32.xlu0 %v4036_v23, %s4299_s18  ;;  %v1790_v51 = vrot.slane %v1789_v47, 4  ;;  %v1593_v10 = vsel %vm4512_vm14, %v1588_v16, %v1592_v36  ;;  %v1999_v48 = vrot.slane %v1518_v39, 5  ;;  %v232_v26 = vsel %vm4340_vm3, 0, %v231_v50  ;;  %v263_v23 = vld [vmem:[#allocation2 + $0x38] sm:$0x1] }
  0x90   : > { %3009 = vrot.lane.b32.xlu1 %v4060_v37, %s4300_s19  ;;  %v1598_v19 = vrot.slane %v1597_v29, 4  ;;  %v2056_v60 = vsel %vm4365_vm8, %v2054_v35, %v2055_v44  ;;  %v623_v4 = vshrl.u32 %v4829_v27, 16  ;;  %v1997_v61 = vsel %vm4365_vm8, %v3972_v13, %v1996_v8  ;;  %233 = vst [vmem:[#allocation2 + $0x90] sm:$0x1] %v232_v26 }
  0x91   : > { %v1795_v20 = vsel %vm4512_vm14, %v1790_v51, %v1794_v30  ;;  %v4092_v24 = vcombine.low %v2053_v59, %v2056_v60  ;;  %v1998_v43 = vrot.slane %v1996_v8, 4  ;;  %v626_v34 = vshll.u32 %v4829_v27, 16 }
  0x92   : > { %v4076_v37 = vcombine.low %v1785_v53, %v1795_v20  ;;  %v1603_v38 = vsel %vm4512_vm14, %v1598_v19, %v1602_v22  ;;  %v625_v62 = vrot.slane %v623_v4, 7  ;;  %v631_v2 = vshrl.u32 %v4831_v14, 16  ;;  %v4974_v22 = vld [vmem:[#allocation2 + $0x28] sm:$0xf] }
  0x93   : > { %2993 = vrot.lane.b32.xlu0 %v4052_v49, %s4300_s19  ;;  %v4068_v42 = vcombine.low %v1593_v10, %v1603_v38  ;;  %v2000_v5 = vsel %vm4365_vm8, %v1998_v43, %v1999_v48  ;;  %v634_v52 = vshll.u32 %v4831_v14, 16  ;;  %v208_v27 = vsel %vm4340_vm3, 0, %v207_v7  ;;  %v4955_v14 = vld [vmem:[#allocation2 + $0x88] sm:$0xf]  ;;  %v329_v48 = vld [vmem:[%s4372_s17 + $0xc0] sm:$0xff] }
  0x94   : > { %3089 = vrot.lane.b32.xlu1 %v4076_v37, %s4305_s24  ;;  %v4084_v25 = vcombine.low %v1997_v61, %v2000_v5  ;;  %v628_v39 = vor.u32 %v626_v34, %v625_v62  ;;  %v629_v41 = vrot.slane %v625_v62, 4  ;;  %v4950_v56 = vrot.slane %v631_v2, 7  ;;  %209 = vst [vmem:[#allocation2 + $0x30] sm:$0x1] %v208_v27  ;;  %v330_v19 = vld [vmem:[%s4372_s17 + $0xc8] sm:$0xff]  ;;  %v313_v62 = vld [vmem:[%s4372_s17 + $0x40] sm:$0xff] }
  0x95   : > { %v487_v49 = vshrl.u32 %v4833_v6, 16  ;;  %v490_v12 = vshll.u32 %v4833_v6, 16  ;;  %v495_v0 = vshrl.u32 %v4835_v28, 16  ;;  %v498_v33 = vshll.u32 %v4835_v28, 16  ;;  %v876_v28 = vld [vmem:[#allocation2 + $0x24] sm:$0xf] }
  0x96   : > { %v288_v63 = vsel %vm4357_vm7, 0, %v287_v15  ;;  %v264_v17 = vsel %vm4357_vm7, 0, %v263_v23  ;;  %v1186_v21 = vshrl.u32 %v892_v54, 16  ;;  %v636_v58 = vor.u32 %v634_v52, %v4950_v56  ;;  %v4988_v37 = vld [vmem:[#allocation2 + $0x2c] sm:$0x1] }
  0x97   : > { %3073 = vrot.lane.b32.xlu0 %v4068_v42, %s4305_s24  ;;  %v638_v6 = vrot.slane %v4950_v56, 4  ;;  %v489_v31 = vrot.slane %v487_v49, 7  ;;  %v497_v46 = vrot.slane %v495_v0, 7  ;;  %289 = vst [vmem:[#allocation2 + $0x98] sm:$0x1] %v288_v63  ;;  %v1189_v30 = vshll.u32 %v892_v54, 16 }
  0x98   : > { %265 = vst [vmem:[#allocation2 + $0x38] sm:$0x1] %v264_v17  ;;  %3169 = vrot.lane.b32.xlu1 %v4092_v24, %s4303_s22  ;;  %v835_v55 = vld [vmem:[#allocation2 + $0x90] sm:$0xf]  ;;  %v1188_v57 = vrot.slane %v1186_v21, 4  ;;  %v1195_v36 = vshll.u32 %v4955_v14, 16  ;;  %v637_v44 = vsel %vm4405_vm11, %v629_v41, %v636_v58  ;;  %v4992_v52 = vpack.c.bf16 %v329_v48, %v329_v48 }
  0x99   : > { %v1199_v32 = vshrl.u32 %v4955_v14, 16  ;;  %v836_v53 = vsel %vm4397_vm10, %v628_v39, %v835_v55  ;;  %v492_v47 = vor.u32 %v490_v12, %v489_v31  ;;  %v493_v16 = vrot.slane %v489_v31, 4  ;;  %838 = vst.msk [vmem:[#allocation2 + $0x94] sm:$0xf] %vm183_vm0, %v637_v44  ;;  %v314_v34 = vld [vmem:[%s4372_s17 + $0x48] sm:$0xff] }
  0x9a   : > { %837 = vst [vmem:[#allocation2 + $0x90] sm:$0xf] %v836_v53  ;;  %v500_v50 = vor.u32 %v498_v33, %v497_v46  ;;  %v502_v29 = vrot.slane %v497_v46, 4  ;;  %v1191_v59 = vrot.slane %v1189_v30, 5  ;;  %v1197_v35 = vrot.slane %v1195_v36, 5 }
  0x9b   : > { %3153 = vrot.lane.b32.xlu0 %v4084_v25, %s4303_s22  ;;  %v1201_v13 = vrot.slane %v1199_v32, 4  ;;  %v1205_v51 = vshll.u32 %v4962_v18, 16  ;;  %v994_v10 = vshrl.u32 %v876_v28, 16  ;;  %v997_v8 = vshll.u32 %v876_v28, 16  ;;  %v779_v26 = vld [vmem:[#allocation2 + $0x30] sm:$0xf] }
  0x9c   : > { %v501_v60 = vsel %vm4405_vm11, %v493_v16, %v500_v50  ;;  %v1192_v4 = vor.u32 %v1191_v59, %v1188_v57  ;;  %v1003_v20 = vshll.u32 %v4974_v22, 16  ;;  %v1007_v24 = vshrl.u32 %v4974_v22, 16  ;;  %v5015_v31 = vld [vmem:[#allocation2] sm:$0xf] }
  0x9d   : > { %v780_v61 = vsel %vm4397_vm10, %v492_v47, %v779_v26  ;;  %782 = vst.msk [vmem:[#allocation2 + $0x34] sm:$0xf] %vm183_vm0, %v501_v60  ;;  %v1202_v43 = vor.u32 %v1201_v13, %v1197_v35  ;;  %v1207_v7 = vrot.slane %v1205_v51, 5  ;;  %v996_v38 = vrot.slane %v994_v10, 4 }
  0x9e   : > { %781 = vst [vmem:[#allocation2 + $0x30] sm:$0xf] %v780_v61  ;;  %v839_v15 = vld [vmem:[#allocation2 + $0x98] sm:$0x1]  ;;  %v1193_v5 = vrot.slane %v1192_v4, 4  ;;  %v999_v2 = vrot.slane %v997_v8, 5  ;;  %v4994_v23 = vpack.c.bf16 %v330_v19, %v330_v19  ;;  %v5009_v21 = vpack.c.bf16 %v313_v62, %v313_v62  ;;  %v5030_v19 = vpop.permute.xlu0 %2989 }
  0x9f   : > { %v783_v42 = vld [vmem:[#allocation2 + $0x38] sm:$0x1]  ;;  %v840_v54 = vsel %vm4340_vm3, %v638_v6, %v839_v15  ;;  %v1203_v39 = vrot.slane %v1202_v43, 4  ;;  %v5000_v41 = vrot.slane %v1003_v20, 5  ;;  %v5004_v49 = vrot.slane %v1007_v24, 4 }
  0xa0   : > { %v784_v25 = vsel %vm4340_vm3, %v502_v29, %v783_v42  ;;  %841 = vst [vmem:[#allocation2 + $0x98] sm:$0x1] %v840_v54  ;;  %v1198_v27 = vsel %vm4512_vm14, %v1193_v5, %v1197_v35  ;;  %v1000_v56 = vor.u32 %v999_v2, %v996_v38  ;;  %v1013_v12 = vshll.u32 %v4988_v37, 16  ;;  %v2114_v33 = vld [vmem:[#allocation2 + $0x94] sm:$0xf]  ;;  %v5024_v35 = vpop.permute.xlu1 %2893 }
  0xa1   : > { %785 = vst [vmem:[#allocation2 + $0x38] sm:$0x1] %v784_v25  ;;  %v2113_v0 = vld [vmem:[#allocation2 + $0x90] sm:$0xf]  ;;  %v1208_v17 = vsel %vm4512_vm14, %v1203_v39, %v1207_v7  ;;  %v5011_v58 = vpack.c.bf16 %v314_v34, %v314_v34  ;;  %v5013_v6 = vld [vmem:[#allocation2 + $0x4] sm:$0xf] }
  0xa2   : > { %v2535_v63 = vld [vmem:[#allocation2 + $0x90] sm:$0xe]  ;;  %v4002_v46 = vcombine.low %v5015_v31, %v5013_v6  ;;  %v2382_v28 = vshrl.u32 %v2113_v0, 16  ;;  %v2385_v55 = vshll.u32 %v2113_v0, 16  ;;  %v2395_v57 = vshrl.u32 %v2114_v33, 16 }
  0xa3   : > { %v4108_v30 = vcombine.low %v2113_v0, %v2114_v33  ;;  %v2391_v36 = vshll.u32 %v2114_v33, 16  ;;  %v3996_v32 = vrot.slane %v2535_v63, 9  ;;  %v2661_v44 = vrot.slane %v2114_v33, 5 }
  0xa4   : > { %v5019_v53 = vcombine.low %v1198_v27, %v1208_v17  ;;  %v2384_v47 = vrot.slane %v2382_v28, 4  ;;  %v2387_v16 = vrot.slane %v2385_v55, 5  ;;  %v2098_v50 = vld [vmem:[#allocation2 + $0x34] sm:$0xf]  ;;  %v2397_v29 = vrot.slane %v2395_v57, 4  ;;  %v5039_v17 = vpop.permute.xlu1 %3005 }
  0xa5   : > { %3265 = vrot.lane.b32.xlu1 %v4108_v30, %s4301_s20  ;;  %v5022_v59 = vrot.slane %v1000_v56, 4  ;;  %v2097_v13 = vld [vmem:[#allocation2 + $0x30] sm:$0xf]  ;;  %v2203_v51 = vshrl.u32 %v2098_v50, 16  ;;  %v2393_v10 = vrot.slane %v2391_v36, 5  ;;  %v2199_v8 = vshll.u32 %v2098_v50, 16  ;;  %v5041_v36 = vpop.permute.xlu0 %3245 }
  0xa6   : > { %v5028_v48 = vsel %vm4365_vm8, %v3996_v32, %v2661_v44  ;;  %v2190_v60 = vshrl.u32 %v2097_v13, 16  ;;  %v2193_v26 = vshll.u32 %v2097_v13, 16  ;;  %v4100_v4 = vcombine.low %v2097_v13, %v2098_v50  ;;  %v2527_v2 = vld [vmem:[#allocation2 + $0x30] sm:$0xe] }
  0xa7   : > { %v2388_v20 = vor.u32 %v2387_v16, %v2384_v47  ;;  %v2135_v24 = vld [vmem:[#allocation2 + $0x98] sm:$0x1]  ;;  %v2398_v61 = vor.u32 %v2397_v29, %v2393_v10  ;;  %v2201_v7 = vrot.slane %v2199_v8, 5  ;;  %v2205_v38 = vrot.slane %v2203_v51, 4  ;;  %v1316_v29 = vld [vmem:[#allocation2 + $0x84] sm:$0xe] }
  0xa8   : > { %v2127_v43 = vld [vmem:[#allocation2 + $0x38] sm:$0x1]  ;;  %v1006_v62 = vsel %vm4512_vm14, %v5022_v59, %v5000_v41  ;;  %v2192_v34 = vrot.slane %v2190_v60, 4  ;;  %v2195_v15 = vrot.slane %v2193_v26, 5  ;;  %3249 = vrot.lane.b32.xlu0 %v4100_v4, %s4301_s20  ;;  %v2401_v5 = vshll.u32 %v2135_v24, 16 }
  0xa9   : > { %v2389_v42 = vrot.slane %v2388_v20, 4  ;;  %v2399_v54 = vrot.slane %v2398_v61, 4  ;;  %v2206_v25 = vor.u32 %v2205_v38, %v2201_v7  ;;  %v2209_v39 = vshll.u32 %v2127_v43, 16 }
  0xaa   : > { %v2663_v27 = vrot.slane %v2661_v44, 4  ;;  %v2403_v0 = vrot.slane %v2401_v5, 5  ;;  %v2196_v33 = vor.u32 %v2195_v15, %v2192_v34  ;;  %v2664_v63 = vrot.slane %v2135_v24, 5  ;;  %v5074_v5 = vpop.permute.xlu0 %2813 }
  0xab   : > { %v2394_v56 = vsel %vm4512_vm14, %v2389_v42, %v2393_v10  ;;  %v2207_v28 = vrot.slane %v2206_v25, 4  ;;  %v2211_v55 = vrot.slane %v2209_v39, 5  ;;  %v3988_v57 = vrot.slane %v2527_v2, 9  ;;  %v1308_v10 = vld [vmem:[#allocation2 + $0x24] sm:$0xe] }
  0xac   : > { %v2605_v30 = vrot.slane %v2098_v50, 5  ;;  %v2404_v32 = vsel %vm4512_vm14, %v2399_v54, %v2403_v0  ;;  %v2197_v47 = vrot.slane %v2196_v33, 4  ;;  %v2665_v44 = vsel %vm4365_vm8, %v2663_v27, %v2664_v63  ;;  %v5081_v39 = vld [vmem:[#allocation2 + $0x30] sm:$0xf]  ;;  %v5088_v33 = vld [vmem:[#allocation2 + $0x34] sm:$0xf] }
  0xad   : > { %v2608_v16 = vrot.slane %v2127_v43, 5  ;;  %v4124_v59 = vcombine.low %v2394_v56, %v2404_v32  ;;  %v2212_v13 = vsel %vm4512_vm14, %v2207_v28, %v2211_v55  ;;  %v4140_v51 = vcombine.low %v5028_v48, %v2665_v44  ;;  %v5061_v43 = vld [vmem:[#allocation2 + $0x90] sm:$0xf] }
  0xae   : > { %v2606_v50 = vsel %vm4365_vm8, %v3988_v57, %v2605_v30  ;;  %v2202_v8 = vsel %vm4512_vm14, %v2197_v47, %v2201_v7  ;;  %v2607_v60 = vrot.slane %v2605_v30, 4  ;;  %v1010_v26 = vor.u32 %v5004_v49, %v5000_v41  ;;  %v5066_v49 = vld [vmem:[#allocation2 + $0x94] sm:$0xf]  ;;  %v1527_v30 = vld [vmem:[#allocation2 + $0x98] sm:$0x1] }
  0xaf   : > { %v1015_v4 = vrot.slane %v1013_v12, 5  ;;  %3345 = vrot.lane.b32.xlu1 %v4124_v59, %s4306_s25  ;;  %v4116_v20 = vcombine.low %v2202_v8, %v2212_v13  ;;  %v3965_v24 = vrot.slane %v1316_v29, 9  ;;  %v1451_v48 = vrot.slane %v4955_v14, 5  ;;  %v5068_v12 = vpop.permute.xlu1 %3261 }
  0xb0   : > { %v1454_v61 = vrot.slane %v4962_v18, 5  ;;  %v2609_v7 = vsel %vm4365_vm8, %v2607_v60, %v2608_v16  ;;  %v1011_v38 = vrot.slane %v1010_v26, 4  ;;  %v3957_v34 = vrot.slane %v1308_v10, 9  ;;  %v5097_v16 = vld [vmem:[#allocation2 + $0x38] sm:$0x1] }
  0xb1   : > { %v1395_v41 = vrot.slane %v4974_v22, 5  ;;  %3329 = vrot.lane.b32.xlu0 %v4116_v20, %s4306_s25  ;;  %v4132_v15 = vcombine.low %v2606_v50, %v2609_v7  ;;  %v1452_v14 = vsel %vm4365_vm8, %v3965_v24, %v1451_v48  ;;  %v1453_v18 = vrot.slane %v1451_v48, 4  ;;  %v1927_v50 = vld [vmem:[#allocation2 + $0x90] sm:$0xe] }
  0xb2   : > { %v1398_v42 = vrot.slane %v4988_v37, 5  ;;  %v1016_v2 = vsel %vm4512_vm14, %v1011_v38, %v1015_v4  ;;  %v1797_v25 = vshrl.u32 %v5061_v43, 16  ;;  %v1800_v37 = vshll.u32 %v5061_v43, 16  ;;  %v1919_v7 = vld [vmem:[#allocation2 + $0x30] sm:$0xe] }
  0xb3   : > { %v1396_v22 = vsel %vm4365_vm8, %v3957_v34, %v1395_v41  ;;  %v1397_v54 = vrot.slane %v1395_v41, 4  ;;  %3425 = vrot.lane.b32.xlu1 %v4140_v51, %s4304_s23  ;;  %v4021_v27 = vcombine.low %v1006_v62, %v1016_v2  ;;  %v1455_v56 = vsel %vm4365_vm8, %v1453_v18, %v1454_v61  ;;  %v234_v2 = vld [vmem:[#allocation2 + $0x9c] sm:$0x1] }
  0xb4   : > { %v1810_v0 = vshrl.u32 %v5066_v49, 16  ;;  %v4045_v63 = vcombine.low %v1452_v14, %v1455_v56  ;;  %v1799_v55 = vrot.slane %v1797_v25, 4  ;;  %v4061_v57 = vcombine.low %v5061_v43, %v5066_v49 }
  0xb5   : > { %v1399_v28 = vsel %vm4365_vm8, %v1397_v54, %v1398_v42  ;;  %3409 = vrot.lane.b32.xlu0 %v4132_v15, %s4304_s23  ;;  %v1802_v32 = vrot.slane %v1800_v37, 5  ;;  %v1605_v47 = vshrl.u32 %v5081_v39, 16  ;;  %v1608_v44 = vshll.u32 %v5081_v39, 16 }
  0xb6   : > { %v4037_v62 = vcombine.low %v1396_v22, %v1399_v28  ;;  %v1618_v29 = vshrl.u32 %v5088_v33, 16  ;;  %v4053_v59 = vcombine.low %v5081_v39, %v5088_v33  ;;  %v1806_v13 = vshll.u32 %v5066_v49, 16  ;;  %v5103_v10 = vpop.permute.xlu1 %2909  ;;  %v5107_v20 = vpop.permute.xlu0 %3149 }
  0xb7   : > { %v1812_v51 = vrot.slane %v1810_v0, 4  ;;  %2835 = vrot.lane.b32.xlu1 %v5019_v53, %s4302_s21  ;;  %v1607_v8 = vrot.slane %v1605_v47, 4  ;;  %v1610_v60 = vrot.slane %v1608_v44, 5  ;;  %v1803_v26 = vor.u32 %v1802_v32, %v1799_v55 }
  0xb8   : > { %v1816_v4 = vshll.u32 %v1527_v30, 16  ;;  %v1808_v24 = vrot.slane %v1806_v13, 5  ;;  %v1614_v48 = vshll.u32 %v5088_v33, 16  ;;  %v1620_v61 = vrot.slane %v1618_v29, 4  ;;  %v210_v13 = vld [vmem:[#allocation2 + $0x3c] sm:$0x1] }
  0xb9   : > { %v1624_v43 = vshll.u32 %v5097_v16, 16  ;;  %2819 = vrot.lane.b32.xlu0 %v4021_v27, %s4302_s21  ;;  %v1804_v38 = vrot.slane %v1803_v26, 4  ;;  %v1611_v41 = vor.u32 %v1610_v60, %v1607_v8  ;;  %v3981_v15 = vrot.slane %v1927_v50, 9 }
  0xba   : > { %v1818_v34 = vrot.slane %v1816_v4, 5  ;;  %v1813_v53 = vor.u32 %v1812_v51, %v1808_v24  ;;  %v1616_v14 = vrot.slane %v1614_v48, 5  ;;  %v2059_v42 = vrot.slane %v5066_v49, 5  ;;  %v5113_v22 = vpop.permute.xlu1 %3165 }
  0xbb   : > { %v1626_v18 = vrot.slane %v1624_v43, 5  ;;  %2915 = vrot.lane.b32.xlu1 %v4045_v63, %s4299_s18  ;;  %v1809_v54 = vsel %vm4512_vm14, %v1804_v38, %v1808_v24  ;;  %v1612_v25 = vrot.slane %v1611_v41, 4  ;;  %v2062_v39 = vrot.slane %v1527_v30, 5  ;;  %v266_v38 = vld [vmem:[#allocation2 + $0x44] sm:$0x1] }
  0xbc   : > { %v3973_v27 = vrot.slane %v1919_v7, 9  ;;  %v1814_v56 = vrot.slane %v1813_v53, 4  ;;  %v1621_v37 = vor.u32 %v1620_v61, %v1616_v14  ;;  %v5120_v0 = vsel %vm4365_vm8, %v3981_v15, %v2059_v42  ;;  %v290_v7 = vld [vmem:[#allocation2 + $0xa4] sm:$0x1] }
  0xbd   : > { %v2061_v28 = vrot.slane %v2059_v42, 4  ;;  %2899 = vrot.lane.b32.xlu0 %v4037_v62, %s4299_s18  ;;  %v1617_v49 = vsel %vm4512_vm14, %v1612_v25, %v1616_v14  ;;  %v2003_v63 = vrot.slane %v5088_v33, 5  ;;  %v2006_v55 = vrot.slane %v5097_v16, 5  ;;  %v5129_v32 = vpop.permute.xlu0 %3405  ;;  %v894_v42 = vld [vmem:[#allocation2 + $0x90] sm:$0xf] }
  0xbe   : > { %v235_v30 = vsel %vm4340_vm3, 0, %v234_v2  ;;  %v1819_v47 = vsel %vm4512_vm14, %v1814_v56, %v1818_v34  ;;  %v1622_v44 = vrot.slane %v1621_v37, 4  ;;  %v640_v62 = vshrl.u32 %v4992_v52, 16  ;;  %v5140_v8 = vpop.permute.xlu1 %3421 }
  0xbf   : > { %v2063_v29 = vsel %vm4365_vm8, %v2061_v28, %v2062_v39  ;;  %236 = vst [vmem:[#allocation2 + $0x9c] sm:$0x1] %v235_v30  ;;  %3011 = vrot.lane.b32.xlu1 %v4061_v57, %s4300_s19  ;;  %v4077_v33 = vcombine.low %v1809_v54, %v1819_v47  ;;  %v2004_v51 = vsel %vm4365_vm8, %v3973_v27, %v2003_v63  ;;  %v2005_v50 = vrot.slane %v2003_v63, 4  ;;  %v5167_v27 = vld [vmem:[#allocation2 + $0x94] sm:$0xf] }
  0xc0   : > { %v4093_v16 = vcombine.low %v5120_v0, %v2063_v29  ;;  %v1627_v60 = vsel %vm4512_vm14, %v1622_v44, %v1626_v18  ;;  %v642_v26 = vrot.slane %v640_v62, 7  ;;  %v643_v4 = vshll.u32 %v4992_v52, 16  ;;  %v5181_v63 = vld [vmem:[#allocation2 + $0x98] sm:$0x1]  ;;  %v878_v30 = vld [vmem:[#allocation2 + $0x30] sm:$0xf] }
  0xc1   : > { %v648_v24 = vshrl.u32 %v4994_v23, 16  ;;  %2995 = vrot.lane.b32.xlu0 %v4053_v59, %s4300_s19  ;;  %v4069_v57 = vcombine.low %v1617_v49, %v1627_v60  ;;  %v2007_v48 = vsel %vm4365_vm8, %v2005_v50, %v2006_v55  ;;  %v651_v61 = vshll.u32 %v4994_v23, 16  ;;  %v5154_v52 = vpop.permute.xlu0 %2829 }
  0xc2   : > { %v211_v43 = vsel %vm4340_vm3, 0, %v210_v13  ;;  %v4085_v34 = vcombine.low %v2004_v51, %v2007_v48  ;;  %v645_v41 = vor.u32 %v643_v4, %v642_v26  ;;  %v646_v15 = vrot.slane %v642_v26, 4 }
  0xc3   : > { %v5152_v53 = vrot.slane %v648_v24, 7  ;;  %212 = vst [vmem:[#allocation2 + $0x3c] sm:$0x1] %v211_v43  ;;  %3091 = vrot.lane.b32.xlu1 %v4077_v33, %s4305_s24  ;;  %v504_v59 = vshrl.u32 %v5009_v21, 16  ;;  %v507_v14 = vshll.u32 %v5009_v21, 16  ;;  %v512_v23 = vshrl.u32 %v5011_v58, 16 }
  0xc4   : > { %v515_v18 = vshll.u32 %v5011_v58, 16  ;;  %v291_v25 = vsel %vm4357_vm7, 0, %v290_v7  ;;  %v267_v39 = vsel %vm4357_vm7, 0, %v266_v38  ;;  %vm3437_vm15 = vcmask 31744   ;;  %v5170_v58 = vpop.permute.xlu1 %3085 }
  0xc5   : > { %v653_v2 = vor.u32 %v651_v61, %v5152_v53  ;;  %v655_v54 = vrot.slane %v5152_v53, 4  ;;  %3075 = vrot.lane.b32.xlu0 %v4069_v57, %s4305_s24  ;;  %v506_v56 = vrot.slane %v504_v59, 7  ;;  %v514_v37 = vrot.slane %v512_v23, 7  ;;  %292 = vst [vmem:[#allocation2 + $0xa4] sm:$0x1] %v291_v25  ;;  %v5192_v33 = vpop.permute.xlu0 %3069 }
  0xc6   : > { %v842_v21 = vld [vmem:[#allocation2 + $0x9c] sm:$0xf]  ;;  %268 = vst [vmem:[#allocation2 + $0x44] sm:$0x1] %v267_v39  ;;  %vm3486_vm1 = vcmask 64512   ;;  %v3440_v49 = vsel %vm3437_vm15, %v4002_v46, %v5074_v5  ;;  %v1210_v55 = vshrl.u32 %v894_v42, 16 }
  0xc7   : > { %v654_v0 = vsel %vm4405_vm11, %v646_v15, %v653_v2  ;;  %v843_v28 = vsel %vm4397_vm10, %v645_v41, %v842_v21  ;;  %3171 = vrot.lane.b32.xlu1 %v4093_v16, %s4303_s22  ;;  %v509_v47 = vor.u32 %v507_v14, %v506_v56  ;;  %v510_v44 = vrot.slane %v506_v56, 4  ;;  %v5190_v5 = vld [vmem:[#allocation2 + $0x34] sm:$0xf]  ;;  %v4264_v23 = vld [vmem:[#allocation2 + $0x60] sm:$0xf] }
  0xc8   : > { %844 = vst [vmem:[#allocation2 + $0x9c] sm:$0xf] %v843_v28  ;;  %845 = vst.msk [vmem:[#allocation2 + $0xa0] sm:$0xf] %vm183_vm0, %v654_v0  ;;  %v517_v29 = vor.u32 %v515_v18, %v514_v37  ;;  %v519_v62 = vrot.slane %v514_v37, 4  ;;  %v5187_v13 = vsel %vm3486_vm1, %v3440_v49, %v5024_v35  ;;  %v1212_v6 = vrot.slane %v1210_v55, 4  ;;  %v5209_v38 = vpop.permute.xlu1 %3341 }
  0xc9   : > { %v1213_v31 = vshll.u32 %v894_v42, 16  ;;  %v1219_v46 = vshll.u32 %v5167_v27, 16  ;;  %3155 = vrot.lane.b32.xlu0 %v4085_v34, %s4303_s22  ;;  %v1223_v50 = vshrl.u32 %v5167_v27, 16  ;;  %v1229_v35 = vshll.u32 %v5181_v63, 16  ;;  %v331_v34 = vld [vmem:[%s4372_s17 + $0xd0] sm:$0xff] }
  0xca   : > { %v518_v16 = vsel %vm4405_vm11, %v510_v44, %v517_v29  ;;  %v786_v51 = vld [vmem:[#allocation2 + $0x3c] sm:$0xf]  ;;  %v1018_v60 = vshrl.u32 %v878_v30, 16  ;;  %v1021_v57 = vshll.u32 %v878_v30, 16  ;;  %v1027_v7 = vshll.u32 %v5190_v5, 16 }
  0xcb   : > { %v787_v26 = vsel %vm4397_vm10, %v509_v47, %v786_v51  ;;  %789 = vst.msk [vmem:[#allocation2 + $0x40] sm:$0xf] %vm183_vm0, %v518_v16  ;;  %v1215_v4 = vrot.slane %v1213_v31, 5  ;;  %v5202_v24 = vrot.slane %v1219_v46, 5  ;;  %v1225_v48 = vrot.slane %v1223_v50, 4 }
  0xcc   : > { %788 = vst [vmem:[#allocation2 + $0x3c] sm:$0xf] %v787_v26  ;;  %v5204_v61 = vrot.slane %v1229_v35, 5  ;;  %v5206_v43 = vrot.slane %v1018_v60, 4  ;;  %v846_v41 = vld [vmem:[#allocation2 + $0xa4] sm:$0x1]  ;;  %v5236_v44 = vpack.c.bf16 %v331_v34, %v331_v34 }
  0xcd   : > { %v790_v15 = vld [vmem:[#allocation2 + $0x44] sm:$0x1]  ;;  %v1216_v53 = vor.u32 %v1215_v4, %v1212_v6  ;;  %v5212_v59 = vrot.slane %v1021_v57, 5  ;;  %v847_v2 = vsel %vm4340_vm3, %v655_v54, %v846_v41  ;;  %v1226_v39 = vor.u32 %v1225_v48, %v5202_v24  ;;  %v5228_v54 = vpop.permute.xlu0 %3325  ;;  %v5230_v55 = vld [vmem:[#allocation2 + $0x6c] sm:$0xf]  ;;  %v5239_v57 = vpop.permute.xlu1 %2831 }
  0xce   : > { %v4265_v18 = vld [vmem:[#allocation2 + $0x64] sm:$0xf]  ;;  %v791_v25 = vsel %vm4340_vm3, %v519_v62, %v790_v15  ;;  %v5220_v21 = vrot.slane %v1027_v7, 5  ;;  %848 = vst [vmem:[#allocation2 + $0xa4] sm:$0x1] %v847_v2  ;;  %vm3519_vm2 = vcmask 97280  }
  0xcf   : > { %v4010_v42 = vcombine.low %v4264_v23, %v4265_v18  ;;  %v2115_v56 = vld [vmem:[#allocation2 + $0x9c] sm:$0xf]  ;;  %v2116_v37 = vld [vmem:[#allocation2 + $0xa0] sm:$0xf]  ;;  %792 = vst [vmem:[#allocation2 + $0x44] sm:$0x1] %v791_v25 }
  0xd0   : > { %v2536_v0 = vld [vmem:[#allocation2 + $0x9c] sm:$0xe]  ;;  %v5232_v30 = vld [vmem:[#allocation2 + $0x70] sm:$0xf]  ;;  %v2406_v29 = vshrl.u32 %v2115_v56, 16  ;;  %v2409_v62 = vshll.u32 %v2115_v56, 16  ;;  %v4109_v31 = vcombine.low %v2115_v56, %v2116_v37 }
  0xd1   : > { %v5226_v49 = vsel %vm3437_vm15, %v4010_v42, %v5154_v52  ;;  %v2419_v6 = vshrl.u32 %v2116_v37, 16  ;;  %v2415_v46 = vshll.u32 %v2116_v37, 16  ;;  %v3997_v16 = vrot.slane %v2536_v0, 9 }
  0xd2   : > { %v2668_v51 = vrot.slane %v2116_v37, 5  ;;  %v1217_v52 = vrot.slane %v1216_v53, 4  ;;  %v2408_v50 = vrot.slane %v2406_v29, 4  ;;  %v2411_v35 = vrot.slane %v2409_v62, 5  ;;  %3267 = vrot.lane.b32.xlu1 %v4109_v31, %s4301_s20  ;;  %v2100_v60 = vld [vmem:[#allocation2 + $0x40] sm:$0xf] }
  0xd3   : > { %v2421_v26 = vrot.slane %v2419_v6, 4  ;;  %v1227_v4 = vrot.slane %v1226_v39, 4  ;;  %v2099_v48 = vld [vmem:[#allocation2 + $0x3c] sm:$0xf]  ;;  %v2227_v7 = vshrl.u32 %v2100_v60, 16  ;;  %v2417_v34 = vrot.slane %v2415_v46, 5  ;;  %v5245_v39 = vpop.permute.xlu0 %2815 }
  0xd4   : > { %v2223_v41 = vshll.u32 %v2100_v60, 16  ;;  %v5243_v15 = vsel %vm4365_vm8, %v3997_v16, %v2668_v51  ;;  %v2214_v23 = vshrl.u32 %v2099_v48, 16  ;;  %v2217_v18 = vshll.u32 %v2099_v48, 16  ;;  %v2528_v2 = vld [vmem:[#allocation2 + $0x3c] sm:$0xe] }
  0xd5   : > { %v4101_v53 = vcombine.low %v2099_v48, %v2100_v60  ;;  %v2412_v42 = vor.u32 %v2411_v35, %v2408_v50  ;;  %v2422_v25 = vor.u32 %v2421_v26, %v2417_v34  ;;  %v2229_v37 = vrot.slane %v2227_v7, 4  ;;  %v2136_v6 = vld [vmem:[#allocation2 + $0xa4] sm:$0x1]  ;;  %v5250_v7 = vpop.permute.xlu1 %2911 }
  0xd6   : > { %v2225_v56 = vrot.slane %v2223_v41, 5  ;;  %v2670_v0 = vrot.slane %v2668_v51, 4  ;;  %v2216_v29 = vrot.slane %v2214_v23, 4  ;;  %v2219_v62 = vrot.slane %v2217_v18, 5  ;;  %v2128_v14 = vld [vmem:[#allocation2 + $0x44] sm:$0x1] }
  0xd7   : > { %3251 = vrot.lane.b32.xlu0 %v4101_v53, %s4301_s20  ;;  %v2413_v31 = vrot.slane %v2412_v42, 4  ;;  %v3989_v46 = vrot.slane %v2528_v2, 9  ;;  %v2423_v16 = vrot.slane %v2422_v25, 4  ;;  %v2425_v47 = vshll.u32 %v2136_v6, 16 }
  0xd8   : > { %v2230_v28 = vor.u32 %v2229_v37, %v2225_v56  ;;  %v2671_v48 = vrot.slane %v2136_v6, 5  ;;  %v2220_v35 = vor.u32 %v2219_v62, %v2216_v29  ;;  %v2233_v26 = vshll.u32 %v2128_v14, 16 }
  0xd9   : > { %v2418_v50 = vsel %vm4512_vm14, %v2413_v31, %v2417_v34  ;;  %v2612_v51 = vrot.slane %v2100_v60, 5  ;;  %v2427_v41 = vrot.slane %v2425_v47, 5  ;;  %v2615_v53 = vrot.slane %v2128_v14, 5  ;;  %v906_v14 = vld [vmem:[#allocation2 + $0x38] sm:$0x1] }
  0xda   : > { %v2231_v23 = vrot.slane %v2230_v28, 4  ;;  %v2672_v18 = vsel %vm4365_vm8, %v2670_v0, %v2671_v48  ;;  %v2221_v42 = vrot.slane %v2220_v35, 4  ;;  %v2235_v2 = vrot.slane %v2233_v26, 5  ;;  %v1317_v60 = vld [vmem:[#allocation2 + $0x90] sm:$0xe]  ;;  %v5265_v0 = vpop.permute.xlu0 %2895 }
  0xdb   : > { %v4141_v25 = vcombine.low %v5243_v15, %v2672_v18  ;;  %v2613_v37 = vsel %vm4365_vm8, %v3989_v46, %v2612_v51  ;;  %v2428_v34 = vsel %vm4512_vm14, %v2423_v16, %v2427_v41  ;;  %v2614_v29 = vrot.slane %v2612_v51, 4  ;;  %v1309_v46 = vld [vmem:[#allocation2 + $0x30] sm:$0xe]  ;;  %v5280_v51 = vld [vmem:[#allocation2 + $0x9c] sm:$0xf]  ;;  %v5282_v41 = vpop.permute.xlu1 %3007 }
  0xdc   : > { %v1222_v47 = vsel %vm4512_vm14, %v1217_v52, %v5202_v24  ;;  %v1232_v28 = vsel %vm4512_vm14, %v1227_v4, %v5204_v61  ;;  %v4125_v15 = vcombine.low %v2418_v50, %v2428_v34  ;;  %v2226_v62 = vsel %vm4512_vm14, %v2221_v42, %v2225_v56 }
  0xdd   : > { %v2236_v6 = vsel %vm4512_vm14, %v2231_v23, %v2235_v2  ;;  %v4030_v31 = vcombine.low %v1222_v47, %v1232_v28  ;;  %v2616_v24 = vsel %vm4365_vm8, %v2614_v29, %v2615_v53  ;;  %v6283_v61 = vor.u32 %v5212_v59, %v5206_v43  ;;  %v5290_v53 = vld [vmem:[#allocation2 + $0xa0] sm:$0xf] }
  0xde   : > { %v4117_v16 = vcombine.low %v2226_v62, %v2236_v6  ;;  %v6284_v4 = vshrl.u32 %v5190_v5, 16  ;;  %3347 = vrot.lane.b32.xlu1 %v4125_v15, %s4306_s25  ;;  %v4133_v50 = vcombine.low %v2613_v37, %v2616_v24  ;;  %v1037_v56 = vshll.u32 %v906_v14, 16  ;;  %v5308_v24 = vld [vmem:[#allocation2 + $0x40] sm:$0xf] }
  0xdf   : > { %v1025_v52 = vrot.slane %v6283_v61, 4  ;;  %v3966_v35 = vrot.slane %v1317_v60, 9  ;;  %v1458_v26 = vrot.slane %v5167_v27, 5  ;;  %v1461_v23 = vrot.slane %v5181_v63, 5  ;;  %v5297_v60 = vpop.permute.xlu0 %2991 }
  0xe0   : > { %v1033_v48 = vrot.slane %v6284_v4, 4  ;;  %3331 = vrot.lane.b32.xlu0 %v4117_v16, %s4306_s25  ;;  %v3958_v18 = vrot.slane %v1309_v46, 9  ;;  %v1039_v42 = vrot.slane %v1037_v56, 5  ;;  %v1402_v37 = vrot.slane %v5190_v5, 5  ;;  %v1492_v16 = vld [vmem:[#allocation2 + $0x3c] sm:$0xf] }
  0xe1   : > { %v1030_v43 = vsel %vm4512_vm14, %v1025_v52, %v5220_v21  ;;  %v1459_v27 = vsel %vm4365_vm8, %v3966_v35, %v1458_v26  ;;  %v1460_v2 = vrot.slane %v1458_v26, 4  ;;  %v1405_v29 = vrot.slane %v906_v14, 5 }
  0xe2   : > { %v1034_v59 = vor.u32 %v1033_v48, %v5220_v21  ;;  %v1821_v47 = vshrl.u32 %v5280_v51, 16  ;;  %v1824_v28 = vshll.u32 %v5280_v51, 16  ;;  %3427 = vrot.lane.b32.xlu1 %v4141_v25, %s4304_s23  ;;  %v1403_v21 = vsel %vm4365_vm8, %v3958_v18, %v1402_v37  ;;  %v5317_v48 = vpop.permute.xlu1 %3087 }
  0xe3   : > { %v1462_v63 = vsel %vm4365_vm8, %v1460_v2, %v1461_v23  ;;  %v1404_v15 = vrot.slane %v1402_v37, 4  ;;  %v1834_v62 = vshrl.u32 %v5290_v53, 16  ;;  %v4062_v52 = vcombine.low %v5280_v51, %v5290_v53  ;;  %v5323_v51 = vld [vmem:[#allocation2 + $0xa4] sm:$0x1] }
  0xe4   : > { %v1035_v34 = vrot.slane %v1034_v59, 4  ;;  %3411 = vrot.lane.b32.xlu0 %v4133_v50, %s4304_s23  ;;  %v4046_v14 = vcombine.low %v1459_v27, %v1462_v63  ;;  %v1823_v6 = vrot.slane %v1821_v47, 4  ;;  %v1826_v46 = vrot.slane %v1824_v28, 5  ;;  %v5341_v47 = vld [vmem:[#allocation2 + $0x44] sm:$0x1] }
  0xe5   : > { %v1406_v61 = vsel %vm4365_vm8, %v1404_v15, %v1405_v29  ;;  %v3504_v4 = vsel %vm3486_vm1, %v5226_v49, %v5103_v10  ;;  %vm3552_vm4 = vcmask 130048   ;;  %vm3585_vm5 = vcmask 162816   ;;  %v1928_v28 = vld [vmem:[#allocation2 + $0x9c] sm:$0xe] }
  0xe6   : > { %v1040_v5 = vsel %vm4512_vm14, %v1035_v34, %v1039_v42  ;;  %v4038_v50 = vcombine.low %v1403_v21, %v1406_v61  ;;  %2837 = vrot.lane.b32.xlu1 %v4030_v31, %s4302_s21  ;;  %v3537_v56 = vsel %vm3519_vm2, %v3504_v4, %v5039_v17  ;;  %v1629_v35 = vshrl.u32 %v1492_v16, 16  ;;  %v5330_v31 = vpop.permute.xlu0 %3071  ;;  %v5343_v63 = vpop.permute.xlu1 %3167 }
  0xe7   : > { %v4022_v25 = vcombine.low %v1030_v43, %v1040_v5  ;;  %v1632_v26 = vshll.u32 %v1492_v16, 16  ;;  %v1642_v43 = vshrl.u32 %v5308_v24, 16  ;;  %v3570_v10 = vsel %vm3552_vm4, %v3537_v56, %v5170_v58  ;;  %v1920_v56 = vld [vmem:[#allocation2 + $0x3c] sm:$0xe] }
  0xe8   : > { %v4054_v49 = vcombine.low %v1492_v16, %v5308_v24  ;;  %v1827_v59 = vor.u32 %v1826_v46, %v1823_v6  ;;  %v1830_v23 = vshll.u32 %v5290_v53, 16  ;;  %v3603_v17 = vsel %vm3585_vm5, %v3570_v10, %v5113_v22 }
  0xe9   : > { %2821 = vrot.lane.b32.xlu0 %v4022_v25, %s4302_s21  ;;  %v1631_v18 = vrot.slane %v1629_v35, 4  ;;  %v1634_v42 = vrot.slane %v1632_v26, 5  ;;  %v1836_v27 = vrot.slane %v1834_v62, 4  ;;  %v1840_v34 = vshll.u32 %v5323_v51, 16 }
  0xea   : > { %v1828_v2 = vrot.slane %v1827_v59, 4  ;;  %v1832_v37 = vrot.slane %v1830_v23, 5  ;;  %v3521_v58 = vsel %vm3519_vm2, %v5187_v13, %v5030_v19  ;;  %2917 = vrot.lane.b32.xlu1 %v4046_v14, %s4299_s18  ;;  %vm3618_vm6 = vcmask 195584   ;;  %v5356_v61 = vpop.permute.xlu0 %3151  ;;  %v332_v59 = vld [vmem:[%s4372_s17 + $0xd8] sm:$0xff]  ;;  %v5378_v23 = vpop.permute.xlu1 %3263 }
  0xeb   : > { %v3554_v29 = vsel %vm3552_vm4, %v3521_v58, %v5192_v33  ;;  %vm3651_vm9 = vcmask 228352   ;;  %v1635_v22 = vor.u32 %v1634_v42, %v1631_v18  ;;  %v1842_v19 = vrot.slane %v1840_v34, 5 }
  0xec   : > { %v1833_v21 = vsel %vm4512_vm14, %v1828_v2, %v1832_v37  ;;  %v1837_v15 = vor.u32 %v1836_v27, %v1832_v37  ;;  %v3587_v13 = vsel %vm3585_vm5, %v3554_v29, %v5107_v20  ;;  %v3636_v33 = vsel %vm3618_vm6, %v3603_v17, %v5068_v12 }
  0xed   : > { %2901 = vrot.lane.b32.xlu0 %v4038_v50, %s4299_s18  ;;  %v1636_v62 = vrot.slane %v1635_v22, 4  ;;  %v1638_v5 = vshll.u32 %v5308_v24, 16  ;;  %v1644_v14 = vrot.slane %v1642_v43, 4  ;;  %v3669_v46 = vsel %vm3651_vm9, %v3636_v33, %v5209_v38 }
  0xee   : > { %v1838_v6 = vrot.slane %v1837_v15, 4  ;;  %v1648_v16 = vshll.u32 %v5341_v47, 16  ;;  %v3982_v25 = vrot.slane %v1928_v28, 9  ;;  %3013 = vrot.lane.b32.xlu1 %v4062_v52, %s4300_s19  ;;  %v2066_v4 = vrot.slane %v5290_v53, 5  ;;  %v5391_v34 = vpop.permute.xlu0 %3247  ;;  %v213_v15 = vld [vmem:[#allocation2 + $0x48] sm:$0x1] }
  0xef   : > { %v1640_v20 = vrot.slane %v1638_v5, 5  ;;  %v2069_v12 = vrot.slane %v5323_v51, 5  ;;  %v3620_v50 = vsel %vm3618_vm6, %v3587_v13, %v5041_v36  ;;  %v6285_v52 = vcombine.low %v5230_v55, %v5232_v30  ;;  %v4269_v5 = vld [vmem:[#allocation2 + $0x10] sm:$0xf] }
  0xf0   : > { %v1843_v38 = vsel %vm4512_vm14, %v1838_v6, %v1842_v19  ;;  %v1650_v35 = vrot.slane %v1648_v16, 5  ;;  %v3653_v26 = vsel %vm3651_vm9, %v3620_v50, %v5228_v54  ;;  %v2067_v10 = vsel %vm4365_vm8, %v3982_v25, %v2066_v4  ;;  %v315_v6 = vld [vmem:[%s4372_s17 + $0x50] sm:$0xff] }
  0xf1   : > { %2997 = vrot.lane.b32.xlu0 %v4054_v49, %s4300_s19  ;;  %v3467_v53 = vsel %vm3437_vm15, %v6285_v52, %v5239_v57  ;;  %v4078_v43 = vcombine.low %v1833_v21, %v1843_v38  ;;  %v1641_v36 = vsel %vm4512_vm14, %v1636_v62, %v1640_v20  ;;  %v1645_v51 = vor.u32 %v1644_v14, %v1640_v20  ;;  %v237_v49 = vld [vmem:[#allocation2 + $0xa8] sm:$0x1]  ;;  %v4268_v62 = vld [vmem:[#allocation2 + $0xc] sm:$0xf] }
  0xf2   : > { %v2068_v17 = vrot.slane %v2066_v4, 4  ;;  %vm3684_vm12 = vcmask 261120   ;;  %vm3718_vm13 = vcmask 293888   ;;  %v3974_v54 = vrot.slane %v1920_v56, 9  ;;  %v5405_v16 = vpop.permute.xlu1 %3343  ;;  %v293_v4 = vld [vmem:[#allocation2 + $0xb0] sm:$0x1] }
  0xf3   : > { %3093 = vrot.lane.b32.xlu1 %v4078_v43, %s4305_s24  ;;  %v1646_v55 = vrot.slane %v1645_v51, 4  ;;  %v3702_v30 = vsel %vm3684_vm12, %v3669_v46, %v5140_v8  ;;  %v2010_v57 = vrot.slane %v5308_v24, 5  ;;  %v2013_v18 = vrot.slane %v5341_v47, 5  ;;  %v316_v46 = vld [vmem:[%s4372_s17 + $0x58] sm:$0xff]  ;;  %v5418_v51 = vld [vmem:[#allocation2 + $0xa0] sm:$0xf] }
  0xf4   : > { %v2070_v42 = vsel %vm4365_vm8, %v2068_v17, %v2069_v12  ;;  %4203 = vmatprep.subr.msk.bf16.mxu0 %vm3718_vm13, %v3702_v30  ;;  %v238_v27 = vsel %vm4340_vm3, 0, %v237_v49  ;;  %v4180_v2 = vpack.c.bf16 %v332_v59, %v332_v59  ;;  %v657_v37 = vshrl.u32 %v5236_v44, 16  ;;  %v269_v12 = vld [vmem:[#allocation2 + $0x50] sm:$0x1] }
  0xf5   : > { %v1651_v8 = vsel %vm4512_vm14, %v1646_v55, %v1650_v35  ;;  %v4094_v58 = vcombine.low %v2067_v10, %v2070_v42  ;;  %v2011_v24 = vsel %vm4365_vm8, %v3974_v54, %v2010_v57  ;;  %v2012_v29 = vrot.slane %v2010_v57, 4  ;;  %239 = vst [vmem:[#allocation2 + $0xa8] sm:$0x1] %v238_v27  ;;  %v5420_v10 = vpop.permute.xlu0 %3327 }
  0xf6   : > { %v4070_v47 = vcombine.low %v1641_v36, %v1651_v8  ;;  %v659_v22 = vrot.slane %v657_v37, 7  ;;  %v660_v28 = vshll.u32 %v5236_v44, 16  ;;  %v665_v21 = vshrl.u32 %v4180_v2, 16  ;;  %v896_v36 = vld [vmem:[#allocation2 + $0x9c] sm:$0xf] }
  0xf7   : > { %3173 = vrot.lane.b32.xlu1 %v4094_v58, %s4303_s22  ;;  %v2014_v19 = vsel %vm4365_vm8, %v2012_v29, %v2013_v18  ;;  %v668_v13 = vshll.u32 %v4180_v2, 16  ;;  %v3686_v33 = vsel %vm3684_vm12, %v3653_v26, %v5129_v32  ;;  %v4003_v14 = vcombine.low %v4268_v62, %v4269_v5  ;;  %v5441_v2 = vpop.permute.xlu1 %3423 }
  0xf8   : > { %3077 = vrot.lane.b32.xlu0 %v4070_v47, %s4305_s24  ;;  %v4086_v44 = vcombine.low %v2011_v24, %v2014_v19  ;;  %v663_v25 = vrot.slane %v659_v22, 4  ;;  %v5408_v20 = vrot.slane %v665_v21, 7  ;;  %v662_v50 = vor.u32 %v660_v28, %v659_v22  ;;  %v5448_v19 = vld [vmem:[#allocation2 + $0x3c] sm:$0xf] }
  0xf9   : > { %v3722_v56 = vsel %vm3718_vm13, %v3686_v33, 0  ;;  %v3443_v32 = vsel %vm3437_vm15, %v4003_v14, %v5245_v39  ;;  %v214_v38 = vsel %vm4340_vm3, 0, %v213_v15  ;;  %v3506_v26 = vsel %vm3486_vm1, %v3467_v53, %v5250_v7  ;;  %v5429_v7 = vld [vmem:[#allocation2 + $0xa4] sm:$0x1]  ;;  %v5452_v33 = vpop.permute.xlu0 %3407 }
  0xfa   : > { %v670_v35 = vor.u32 %v668_v13, %v5408_v20  ;;  %4186 = vmatpush3.bf16.xpose.msra.mxu0 %v3722_v56  ;;  %215 = vst [vmem:[#allocation2 + $0x48] sm:$0x1] %v214_v38  ;;  %v4163_v52 = vpack.c.bf16 %v315_v6, %v315_v6  ;;  %v4164_v43 = vpack.c.bf16 %v316_v46, %v316_v46  ;;  %v672_v49 = vrot.slane %v5408_v20, 4  ;;  %v5450_v13 = vld [vmem:[#allocation2 + $0x40] sm:$0xf] }
  0xfb   : > { %v294_v39 = vsel %vm4357_vm7, 0, %v293_v4  ;;  %v3490_v59 = vsel %vm3486_vm1, %v3443_v32, %v5265_v0  ;;  %v270_v17 = vsel %vm4357_vm7, 0, %v269_v12  ;;  %v3539_v42 = vsel %vm3519_vm2, %v3506_v26, %v5282_v41 }
  0xfc   : > { %3157 = vrot.lane.b32.xlu0 %v4086_v44, %s4303_s22  ;;  %v671_v53 = vsel %vm4405_vm11, %v663_v25, %v670_v35  ;;  %v849_v54 = vld [vmem:[#allocation2 + $0xa8] sm:$0xf]  ;;  %v521_v55 = vshrl.u32 %v4163_v52, 16  ;;  %v524_v30 = vshll.u32 %v4163_v52, 16  ;;  %v529_v57 = vshrl.u32 %v4164_v43, 16  ;;  %v5466_v35 = vpop.permute.xlu1 %2833 }
  0xfd   : > { %295 = vst [vmem:[#allocation2 + $0xb0] sm:$0x1] %v294_v39  ;;  %271 = vst [vmem:[#allocation2 + $0x50] sm:$0x1] %v270_v17  ;;  %v850_v18 = vsel %vm4397_vm10, %v662_v50, %v849_v54  ;;  %v532_v0 = vshll.u32 %v4164_v43, 16  ;;  %v3523_v27 = vsel %vm3519_vm2, %v3490_v59, %v5297_v60  ;;  %v1234_v58 = vshrl.u32 %v896_v36, 16 }
  0xfe   : > { %852 = vst.msk [vmem:[#allocation2 + $0xac] sm:$0xf] %vm183_vm0, %v671_v53  ;;  %851 = vst [vmem:[#allocation2 + $0xa8] sm:$0xf] %v850_v18  ;;  %v523_v37 = vrot.slane %v521_v55, 7  ;;  %v531_v8 = vrot.slane %v529_v57, 7  ;;  %v3572_v29 = vsel %vm3552_vm4, %v3539_v42, %v5317_v48  ;;  %v3556_v20 = vsel %vm3552_vm4, %v3523_v27, %v5330_v31 }
  0xff   : > { %v1237_v24 = vshll.u32 %v896_v36, 16  ;;  %v1243_v47 = vshll.u32 %v5418_v51, 16  ;;  %v1247_v22 = vshrl.u32 %v5418_v51, 16  ;;  %v1253_v28 = vshll.u32 %v5429_v7, 16 }
 0x100   : > { %v526_v41 = vor.u32 %v524_v30, %v523_v37  ;;  %v527_v21 = vrot.slane %v523_v37, 4  ;;  %v534_v15 = vor.u32 %v532_v0, %v531_v8  ;;  %v536_v60 = vrot.slane %v531_v8, 4  ;;  %v5478_v0 = vpop.permute.xlu0 %2817 }
 0x101   : > { %v793_v62 = vld [vmem:[#allocation2 + $0x48] sm:$0xf]  ;;  %v1236_v5 = vrot.slane %v1234_v58, 4  ;;  %v1239_v14 = vrot.slane %v1237_v24, 5  ;;  %v5454_v48 = vrot.slane %v1243_v47, 5  ;;  %v1249_v6 = vrot.slane %v1247_v22, 4 }
 0x102   : > { %v535_v46 = vsel %vm4405_vm11, %v527_v21, %v534_v15  ;;  %v794_v44 = vsel %vm4397_vm10, %v526_v41, %v793_v62  ;;  %v1255_v25 = vrot.slane %v1253_v28, 5  ;;  %v1042_v32 = vshrl.u32 %v5448_v19, 16  ;;  %v5496_v15 = vpop.permute.xlu1 %2913 }
 0x103   : > { %795 = vst [vmem:[#allocation2 + $0x48] sm:$0xf] %v794_v44  ;;  %796 = vst.msk [vmem:[#allocation2 + $0x4c] sm:$0xf] %vm183_vm0, %v535_v46  ;;  %v1240_v50 = vor.u32 %v1239_v14, %v1236_v5  ;;  %v1250_v56 = vor.u32 %v1249_v6, %v5454_v48  ;;  %v1045_v38 = vshll.u32 %v5448_v19, 16  ;;  %v1051_v43 = vshll.u32 %v5450_v13, 16 }
 0x104   : > { %v853_v4 = vld [vmem:[#allocation2 + $0xb0] sm:$0x1]  ;;  %v1055_v36 = vshrl.u32 %v5450_v13, 16  ;;  %v3605_v54 = vsel %vm3585_vm5, %v3572_v29, %v5343_v63  ;;  %v3589_v55 = vsel %vm3585_vm5, %v3556_v20, %v5356_v61  ;;  %v5490_v28 = vrot.slane %v1042_v32, 4 }
 0x105   : > { %v797_v12 = vld [vmem:[#allocation2 + $0x50] sm:$0x1]  ;;  %v2118_v26 = vld [vmem:[#allocation2 + $0xac] sm:$0xf]  ;;  %v854_v52 = vsel %vm4340_vm3, %v672_v49, %v853_v4  ;;  %v2117_v39 = vld [vmem:[#allocation2 + $0xa8] sm:$0xf]  ;;  %v3638_v63 = vsel %vm3618_vm6, %v3605_v54, %v5378_v23 }
 0x106   : > { %v798_v31 = vsel %vm4340_vm3, %v536_v60, %v797_v12  ;;  %v2443_v59 = vshrl.u32 %v2118_v26, 16  ;;  %855 = vst [vmem:[#allocation2 + $0xb0] sm:$0x1] %v854_v52  ;;  %v2439_v17 = vshll.u32 %v2118_v26, 16  ;;  %v2537_v53 = vld [vmem:[#allocation2 + $0xa8] sm:$0xe]  ;;  %v4110_v57 = vcombine.low %v2117_v39, %v2118_v26  ;;  %v5508_v52 = vpop.permute.xlu0 %2897 }
 0x107   : > { %799 = vst [vmem:[#allocation2 + $0x50] sm:$0x1] %v798_v31  ;;  %v2430_v49 = vshrl.u32 %v2117_v39, 16  ;;  %v2433_v30 = vshll.u32 %v2117_v39, 16  ;;  %v3998_v18 = vrot.slane %v2537_v53, 9  ;;  %v2675_v37 = vrot.slane %v2118_v26, 5 }
 0x108   : > { %v2441_v42 = vrot.slane %v2439_v17, 5  ;;  %v2445_v27 = vrot.slane %v2443_v59, 4  ;;  %v1241_v8 = vrot.slane %v1240_v50, 4  ;;  %3269 = vrot.lane.b32.xlu1 %v4110_v57, %s4301_s20  ;;  %v1251_v47 = vrot.slane %v1250_v56, 4  ;;  %v5492_v41 = vld [vmem:[#allocation2 + $0xa8] sm:$0xf] }
 0x109   : > { %v2432_v58 = vrot.slane %v2430_v49, 4  ;;  %v2435_v24 = vrot.slane %v2433_v30, 5  ;;  %v5485_v61 = vsel %vm4365_vm8, %v3998_v18, %v2675_v37  ;;  %v5494_v21 = vld [vmem:[#allocation2 + $0xac] sm:$0xf]  ;;  %v2677_v5 = vrot.slane %v2675_v37, 4 }
 0x10a   : > { %v2446_v29 = vor.u32 %v2445_v27, %v2441_v42  ;;  %v1246_v22 = vsel %vm4512_vm14, %v1241_v8, %v5454_v48  ;;  %v2101_v60 = vld [vmem:[#allocation2 + $0x48] sm:$0xf]  ;;  %v2102_v62 = vld [vmem:[#allocation2 + $0x4c] sm:$0xf]  ;;  %v1256_v14 = vsel %vm4512_vm14, %v1251_v47, %v1255_v25  ;;  %v4063_v6 = vcombine.low %v5492_v41, %v5494_v21  ;;  %v5517_v27 = vpop.permute.xlu1 %3009 }
 0x10b   : > { %v2436_v23 = vor.u32 %v2435_v24, %v2432_v58  ;;  %v2238_v46 = vshrl.u32 %v2101_v60, 16  ;;  %v2241_v48 = vshll.u32 %v2101_v60, 16  ;;  %v2251_v44 = vshrl.u32 %v2102_v62, 16  ;;  %v2529_v17 = vld [vmem:[#allocation2 + $0x48] sm:$0xe] }
 0x10c   : > { %v4102_v20 = vcombine.low %v2101_v60, %v2102_v62  ;;  %v2447_v50 = vrot.slane %v2446_v29, 4  ;;  %v5502_v32 = vcombine.low %v1246_v22, %v1256_v14  ;;  %v5506_v26 = vsel %vm3618_vm6, %v3589_v55, %v5391_v34  ;;  %v907_v22 = vld [vmem:[#allocation2 + $0x44] sm:$0x1] }
 0x10d   : > { %v2137_v4 = vld [vmem:[#allocation2 + $0xb0] sm:$0x1]  ;;  %v2437_v12 = vrot.slane %v2436_v23, 4  ;;  %v2240_v25 = vrot.slane %v2238_v46, 4  ;;  %v2243_v31 = vrot.slane %v2241_v48, 5  ;;  %v2247_v59 = vshll.u32 %v2102_v62, 16  ;;  %v5526_v48 = vpop.permute.xlu0 %2993 }
 0x10e   : > { %v2129_v56 = vld [vmem:[#allocation2 + $0x50] sm:$0x1]  ;;  %3253 = vrot.lane.b32.xlu0 %v4102_v20, %s4301_s20  ;;  %v2449_v39 = vshll.u32 %v2137_v4, 16  ;;  %v2253_v53 = vrot.slane %v2251_v44, 4  ;;  %v2678_v49 = vrot.slane %v2137_v4, 5  ;;  %v5513_v30 = vsel %vm3651_vm9, %v3638_v63, %v5405_v16 }
 0x10f   : > { %v2257_v54 = vshll.u32 %v2129_v56, 16  ;;  %v2442_v34 = vsel %vm4512_vm14, %v2437_v12, %v2441_v42  ;;  %v2244_v57 = vor.u32 %v2243_v31, %v2240_v25  ;;  %v2249_v18 = vrot.slane %v2247_v59, 5  ;;  %v1318_v46 = vld [vmem:[#allocation2 + $0x9c] sm:$0xe] }
 0x110   : > { %v2451_v55 = vrot.slane %v2449_v39, 5  ;;  %v2679_v37 = vsel %vm4365_vm8, %v2677_v5, %v2678_v49  ;;  %v3990_v8 = vrot.slane %v2529_v17, 9  ;;  %v2619_v58 = vrot.slane %v2102_v62, 5  ;;  %v1310_v12 = vld [vmem:[#allocation2 + $0x3c] sm:$0xe] }
 0x111   : > { %v2622_v24 = vrot.slane %v2129_v56, 5  ;;  %v2245_v29 = vrot.slane %v2244_v57, 4  ;;  %v2254_v16 = vor.u32 %v2253_v53, %v2249_v18  ;;  %v2259_v63 = vrot.slane %v2257_v54, 5 }
 0x112   : > { %v2452_v47 = vsel %vm4512_vm14, %v2447_v50, %v2451_v55  ;;  %v4142_v42 = vcombine.low %v5485_v61, %v2679_v37  ;;  %v2621_v23 = vrot.slane %v2619_v58, 4  ;;  %v1047_v14 = vrot.slane %v1045_v38, 5  ;;  %v5554_v37 = vpop.permute.xlu0 %3073 }
 0x113   : > { %v4126_v60 = vcombine.low %v2442_v34, %v2452_v47  ;;  %v2250_v62 = vsel %vm4512_vm14, %v2245_v29, %v2249_v18  ;;  %v2255_v5 = vrot.slane %v2254_v16, 4  ;;  %v1053_v44 = vrot.slane %v1051_v43, 5  ;;  %v5552_v18 = vld [vmem:[#allocation2 + $0x48] sm:$0xf]  ;;  %v5563_v47 = vld [vmem:[#allocation2 + $0x4c] sm:$0xf] }
 0x114   : > { %v1057_v20 = vrot.slane %v1055_v36, 4  ;;  %v2620_v61 = vsel %vm4365_vm8, %v3990_v8, %v2619_v58  ;;  %v2623_v19 = vsel %vm4365_vm8, %v2621_v23, %v2622_v24  ;;  %v1048_v38 = vor.u32 %v1047_v14, %v5490_v28  ;;  %v5543_v36 = vpop.permute.xlu1 %3089  ;;  %v1529_v14 = vld [vmem:[#allocation2 + $0xb0] sm:$0x1] }
 0x115   : > { %3349 = vrot.lane.b32.xlu1 %v4126_v60, %s4306_s25  ;;  %v1061_v4 = vshll.u32 %v907_v22, 16  ;;  %v2260_v50 = vsel %vm4512_vm14, %v2255_v5, %v2259_v63  ;;  %v3967_v43 = vrot.slane %v1318_v46, 9  ;;  %v1465_v25 = vrot.slane %v5418_v51, 5 }
 0x116   : > { %v1058_v56 = vor.u32 %v1057_v20, %v1053_v44  ;;  %v4118_v31 = vcombine.low %v2250_v62, %v2260_v50  ;;  %v1049_v39 = vrot.slane %v1048_v38, 4  ;;  %v1468_v17 = vrot.slane %v5429_v7, 5 }
 0x117   : > { %v1063_v59 = vrot.slane %v1061_v4, 5  ;;  %v4134_v53 = vcombine.low %v2620_v61, %v2623_v19  ;;  %v1467_v49 = vrot.slane %v1465_v25, 4  ;;  %v3959_v28 = vrot.slane %v1310_v12, 9  ;;  %v5581_v12 = vld [vmem:[#allocation2 + $0x50] sm:$0x1] }
 0x118   : > { %v1059_v54 = vrot.slane %v1058_v56, 4  ;;  %3333 = vrot.lane.b32.xlu0 %v4118_v31, %s4306_s25  ;;  %v1054_v34 = vsel %vm4512_vm14, %v1049_v39, %v1053_v44  ;;  %v1409_v51 = vrot.slane %v5450_v13, 5  ;;  %v1412_v55 = vrot.slane %v907_v22, 5  ;;  %v5570_v46 = vpop.permute.xlu1 %3169  ;;  %v5583_v31 = vpop.permute.xlu0 %3153 }
 0x119   : > { %3429 = vrot.lane.b32.xlu1 %v4142_v42, %s4304_s23  ;;  %v1845_v57 = vshrl.u32 %v5492_v41, 16  ;;  %v1466_v8 = vsel %vm4365_vm8, %v3967_v43, %v1465_v25  ;;  %v1469_v58 = vsel %vm4365_vm8, %v1467_v49, %v1468_v17  ;;  %v1848_v24 = vshll.u32 %v5492_v41, 16  ;;  %v1929_v25 = vld [vmem:[#allocation2 + $0xa8] sm:$0xe] }
 0x11a   : > { %v1064_v7 = vsel %vm4512_vm14, %v1059_v54, %v1063_v59  ;;  %v1410_v29 = vsel %vm4365_vm8, %v3959_v28, %v1409_v51  ;;  %v1411_v16 = vrot.slane %v1409_v51, 4  ;;  %v1858_v63 = vshrl.u32 %v5494_v21, 16 }
 0x11b   : > { %v4023_v13 = vcombine.low %v1054_v34, %v1064_v7  ;;  %v1847_v22 = vrot.slane %v1845_v57, 4  ;;  %v1850_v60 = vrot.slane %v1848_v24, 5  ;;  %v1653_v42 = vshrl.u32 %v5552_v18, 16 }
 0x11c   : > { %v1656_v23 = vshll.u32 %v5552_v18, 16  ;;  %3413 = vrot.lane.b32.xlu0 %v4134_v53, %s4304_s23  ;;  %v4047_v62 = vcombine.low %v1466_v8, %v1469_v58  ;;  %v1413_v5 = vsel %vm4365_vm8, %v1411_v16, %v1412_v55  ;;  %v1666_v44 = vshrl.u32 %v5563_v47, 16  ;;  %v240_v16 = vld [vmem:[#allocation2 + $0xb4] sm:$0x1] }
 0x11d   : > { %2839 = vrot.lane.b32.xlu1 %v5502_v32, %s4302_s21  ;;  %v1854_v20 = vshll.u32 %v5494_v21, 16  ;;  %v1655_v61 = vrot.slane %v1653_v42, 4  ;;  %v4055_v38 = vcombine.low %v5552_v18, %v5563_v47  ;;  %v1851_v4 = vor.u32 %v1850_v60, %v1847_v22  ;;  %v5596_v18 = vpop.permute.xlu1 %3265 }
 0x11e   : > { %v1658_v19 = vrot.slane %v1656_v23, 5  ;;  %v4039_v50 = vcombine.low %v1410_v29, %v1413_v5  ;;  %v1860_v43 = vrot.slane %v1858_v63, 4  ;;  %v1864_v32 = vshll.u32 %v1529_v14, 16  ;;  %v333_v63 = vld [vmem:[%s4372_s17 + $0xe0] sm:$0xff]  ;;  %v4270_v5 = vld [vmem:[#allocation2 + $0x78] sm:$0xf] }
 0x11f   : > { %v1856_v56 = vrot.slane %v1854_v20, 5  ;;  %v1852_v39 = vrot.slane %v1851_v4, 4  ;;  %v3704_v59 = vsel %vm3684_vm12, %v5513_v30, %v5441_v2  ;;  %v1662_v53 = vshll.u32 %v5563_v47, 16  ;;  %v1921_v30 = vld [vmem:[#allocation2 + $0x48] sm:$0xe] }
 0x120   : > { %v1659_v17 = vor.u32 %v1658_v19, %v1655_v61  ;;  %2823 = vrot.lane.b32.xlu0 %v4023_v13, %s4302_s21  ;;  %v1866_v49 = vrot.slane %v1864_v32, 5  ;;  %v1668_v28 = vrot.slane %v1666_v44, 4  ;;  %v1672_v34 = vshll.u32 %v5581_v12, 16  ;;  %4204 = vmatprep.subr.msk.bf16.mxu0 %vm3718_vm13, %v3704_v59  ;;  %v4271_v44 = vld [vmem:[#allocation2 + $0x7c] sm:$0xf]  ;;  %v334_v19 = vld [vmem:[%s4372_s17 + $0xe8] sm:$0xff] }
 0x121   : > { %2919 = vrot.lane.b32.xlu1 %v4047_v62, %s4299_s18  ;;  %v1861_v54 = vor.u32 %v1860_v43, %v1856_v56  ;;  %v3655_v51 = vsel %vm3651_vm9, %v5506_v26, %v5420_v10  ;;  %v1664_v57 = vrot.slane %v1662_v53, 5  ;;  %v3983_v2 = vrot.slane %v1929_v25, 9  ;;  %v5628_v32 = vpop.permute.xlu1 %3345  ;;  %v317_v53 = vld [vmem:[%s4372_s17 + $0x60] sm:$0xff] }
 0x122   : > { %v1660_v55 = vrot.slane %v1659_v17, 4  ;;  %v1857_v7 = vsel %vm4512_vm14, %v1852_v39, %v1856_v56  ;;  %v2073_v58 = vrot.slane %v5494_v21, 5  ;;  %v2076_v24 = vrot.slane %v1529_v14, 5  ;;  %v5615_v14 = vpop.permute.xlu0 %3249  ;;  %v216_v17 = vld [vmem:[#allocation2 + $0x54] sm:$0x1] }
 0x123   : > { %v1862_v8 = vrot.slane %v1861_v54, 4  ;;  %v1669_v10 = vor.u32 %v1668_v28, %v1664_v57  ;;  %v1674_v26 = vrot.slane %v1672_v34, 5  ;;  %v3688_v29 = vsel %vm3684_vm12, %v3655_v51, %v5452_v33  ;;  %v318_v54 = vld [vmem:[%s4372_s17 + $0x68] sm:$0xff]  ;;  %v4272_v51 = vld [vmem:[#allocation2 + $0x18] sm:$0xf] }
 0x124   : > { %v1665_v13 = vsel %vm4512_vm14, %v1660_v55, %v1664_v57  ;;  %2903 = vrot.lane.b32.xlu0 %v4039_v50, %s4299_s18  ;;  %v2074_v60 = vsel %vm4365_vm8, %v3983_v2, %v2073_v58  ;;  %v2075_v42 = vrot.slane %v2073_v58, 4  ;;  %v3975_v23 = vrot.slane %v1921_v30, 9  ;;  %v4273_v55 = vld [vmem:[#allocation2 + $0x1c] sm:$0xf] }
 0x125   : > { %3015 = vrot.lane.b32.xlu1 %v4063_v6, %s4300_s19  ;;  %v1867_v22 = vsel %vm4512_vm14, %v1862_v8, %v1866_v49  ;;  %v1670_v62 = vrot.slane %v1669_v10, 4  ;;  %v4012_v20 = vcombine.low %v4270_v5, %v4271_v44  ;;  %v2017_v61 = vrot.slane %v5563_v47, 5  ;;  %v296_v57 = vld [vmem:[#allocation2 + $0xbc] sm:$0x1] }
 0x126   : > { %v4079_v33 = vcombine.low %v1857_v7, %v1867_v22  ;;  %v2077_v41 = vsel %vm4365_vm8, %v2075_v42, %v2076_v24  ;;  %v2020_v21 = vrot.slane %v5581_v12, 5  ;;  %v241_v6 = vsel %vm4340_vm3, 0, %v240_v16  ;;  %v5639_v58 = vpop.permute.xlu0 %3329  ;;  %v272_v22 = vld [vmem:[#allocation2 + $0x5c] sm:$0x1] }
 0x127   : > { %v4181_v4 = vpack.c.bf16 %v333_v63, %v333_v63  ;;  %v1675_v50 = vsel %vm4512_vm14, %v1670_v62, %v1674_v26  ;;  %v4095_v56 = vcombine.low %v2074_v60, %v2077_v41  ;;  %v2018_v43 = vsel %vm4365_vm8, %v3975_v23, %v2017_v61  ;;  %242 = vst [vmem:[#allocation2 + $0xb4] sm:$0x1] %v241_v6  ;;  %v5649_v62 = vpop.permute.xlu1 %3425 }
 0x128   : > { %v2019_v47 = vrot.slane %v2017_v61, 4  ;;  %2999 = vrot.lane.b32.xlu0 %v4055_v38, %s4300_s19  ;;  %v4071_v12 = vcombine.low %v1665_v13, %v1675_v50  ;;  %v4182_v25 = vpack.c.bf16 %v334_v19, %v334_v19  ;;  %v3470_v49 = vsel %vm3437_vm15, %v4012_v20, %v5466_v35  ;;  %v5659_v50 = vld [vmem:[#allocation2 + $0xac] sm:$0xf] }
 0x129   : > { %3095 = vrot.lane.b32.xlu1 %v4079_v33, %s4305_s24  ;;  %v674_v39 = vshrl.u32 %v4181_v4, 16  ;;  %v677_v59 = vshll.u32 %v4181_v4, 16  ;;  %v3724_v34 = vsel %vm3718_vm13, %v3688_v29, 0  ;;  %v4004_v38 = vcombine.low %v4272_v51, %v4273_v55  ;;  %v898_v33 = vld [vmem:[#allocation2 + $0xa8] sm:$0xf] }
 0x12a   : > { %v2021_v28 = vsel %vm4365_vm8, %v2019_v47, %v2020_v21  ;;  %v682_v7 = vshrl.u32 %v4182_v25, 16  ;;  %v685_v8 = vshll.u32 %v4182_v25, 16  ;;  %4188 = vmatpush3.bf16.xpose.msra.mxu0 %v3724_v34  ;;  %v217_v35 = vsel %vm4340_vm3, 0, %v216_v17 }
 0x12b   : > { %v4087_v2 = vcombine.low %v2018_v43, %v2021_v28  ;;  %v676_v30 = vrot.slane %v674_v39, 7  ;;  %v3446_v24 = vsel %vm3437_vm15, %v4004_v38, %v5478_v0  ;;  %v4165_v13 = vpack.c.bf16 %v317_v53, %v317_v53  ;;  %218 = vst [vmem:[#allocation2 + $0x54] sm:$0x1] %v217_v35  ;;  %v5668_v43 = vld [vmem:[#allocation2 + $0xb0] sm:$0x1] }
 0x12c   : > { %v4166_v10 = vpack.c.bf16 %v318_v54, %v318_v54  ;;  %3079 = vrot.lane.b32.xlu0 %v4071_v12, %s4305_s24  ;;  %v684_v16 = vrot.slane %v682_v7, 7  ;;  %v297_v63 = vsel %vm4357_vm7, 0, %v296_v57  ;;  %v3508_v61 = vsel %vm3486_vm1, %v3470_v49, %v5496_v15  ;;  %v5670_v12 = vpop.permute.xlu0 %3409  ;;  %v5675_v53 = vld [vmem:[#allocation2 + $0x48] sm:$0xf]  ;;  %v5679_v28 = vld [vmem:[#allocation2 + $0x4c] sm:$0xf] }
 0x12d   : > { %3175 = vrot.lane.b32.xlu1 %v4095_v56, %s4303_s22  ;;  %v679_v26 = vor.u32 %v677_v59, %v676_v30  ;;  %v680_v29 = vrot.slane %v676_v30, 4  ;;  %v538_v60 = vshrl.u32 %v4165_v13, 16  ;;  %v541_v42 = vshll.u32 %v4165_v13, 16  ;;  %298 = vst [vmem:[#allocation2 + $0xbc] sm:$0x1] %v297_v63 }
 0x12e   : > { %v546_v0 = vshrl.u32 %v4166_v10, 16  ;;  %v549_v23 = vshll.u32 %v4166_v10, 16  ;;  %v687_v5 = vor.u32 %v685_v8, %v684_v16  ;;  %v689_v44 = vrot.slane %v684_v16, 4  ;;  %v856_v20 = vld [vmem:[#allocation2 + $0xb4] sm:$0xf] }
 0x12f   : > { %v3492_v19 = vsel %vm3486_vm1, %v3446_v24, %v5508_v52  ;;  %v857_v41 = vsel %vm4397_vm10, %v679_v26, %v856_v20  ;;  %v540_v21 = vrot.slane %v538_v60, 7  ;;  %v273_v4 = vsel %vm4357_vm7, 0, %v272_v22  ;;  %v335_v60 = vld [vmem:[%s4372_s17 + $0xf0] sm:$0xff]  ;;  %v5717_v20 = vld [vmem:[#allocation2 + $0x88] sm:$0xf] }
 0x130   : > { %v548_v6 = vrot.slane %v546_v0, 7  ;;  %3159 = vrot.lane.b32.xlu0 %v4087_v2, %s4303_s22  ;;  %v688_v56 = vsel %vm4405_vm11, %v680_v29, %v687_v5  ;;  %858 = vst [vmem:[#allocation2 + $0xb4] sm:$0xf] %v857_v41  ;;  %v3541_v15 = vsel %vm3519_vm2, %v3508_v61, %v5517_v27  ;;  %274 = vst [vmem:[#allocation2 + $0x5c] sm:$0x1] %v273_v4  ;;  %v1258_v47 = vshrl.u32 %v898_v33, 16 }
 0x131   : > { %v3525_v52 = vsel %vm3519_vm2, %v3492_v19, %v5526_v48  ;;  %859 = vst.msk [vmem:[#allocation2 + $0xb8] sm:$0xf] %vm183_vm0, %v688_v56  ;;  %v543_v25 = vor.u32 %v541_v42, %v540_v21  ;;  %v544_v39 = vrot.slane %v540_v21, 4  ;;  %v3574_v17 = vsel %vm3552_vm4, %v3541_v15, %v5543_v36  ;;  %v5685_v36 = vpop.permute.xlu1 %2835  ;;  %v5704_v42 = vpop.permute.xlu0 %2819 }
 0x132   : > { %v551_v59 = vor.u32 %v549_v23, %v548_v6  ;;  %v1260_v27 = vrot.slane %v1258_v47, 4  ;;  %v1261_v54 = vshll.u32 %v898_v33, 16  ;;  %v1267_v49 = vshll.u32 %v5659_v50, 16  ;;  %v800_v55 = vld [vmem:[#allocation2 + $0x54] sm:$0xf] }
 0x133   : > { %v1271_v48 = vshrl.u32 %v5659_v50, 16  ;;  %v553_v51 = vrot.slane %v548_v6, 4  ;;  %v1277_v38 = vshll.u32 %v5668_v43, 16  ;;  %v1475_v57 = vrot.slane %v5668_v43, 5 }
 0x134   : > { %v552_v34 = vsel %vm4405_vm11, %v544_v39, %v551_v59  ;;  %v801_v2 = vsel %vm4397_vm10, %v543_v25, %v800_v55  ;;  %v860_v30 = vld [vmem:[#allocation2 + $0xbc] sm:$0x1]  ;;  %v1263_v7 = vrot.slane %v1261_v54, 5  ;;  %v5690_v8 = vrot.slane %v1267_v49, 5 }
 0x135   : > { %803 = vst.msk [vmem:[#allocation2 + $0x58] sm:$0xf] %vm183_vm0, %v552_v34  ;;  %v1273_v24 = vrot.slane %v1271_v48, 4  ;;  %802 = vst [vmem:[#allocation2 + $0x54] sm:$0xf] %v801_v2  ;;  %v861_v35 = vsel %vm4340_vm3, %v689_v44, %v860_v30  ;;  %v5694_v13 = vrot.slane %v1277_v38, 5  ;;  %v3558_v10 = vsel %vm3552_vm4, %v3525_v52, %v5554_v37  ;;  %v5723_v52 = vpop.permute.xlu1 %2915  ;;  %v5734_v30 = vpop.permute.xlu0 %2899 }
 0x136   : > { %v3607_v26 = vsel %vm3585_vm5, %v3574_v17, %v5570_v46  ;;  %862 = vst [vmem:[#allocation2 + $0xbc] sm:$0x1] %v861_v35  ;;  %v1264_v29 = vor.u32 %v1263_v7, %v1260_v27  ;;  %v1066_v16 = vshrl.u32 %v5675_v53, 16  ;;  %v1069_v63 = vshll.u32 %v5675_v53, 16  ;;  %v5715_v44 = vld [vmem:[#allocation2 + $0x84] sm:$0xf] }
 0x137   : > { %v1075_v22 = vshll.u32 %v5679_v28, 16  ;;  %v2119_v0 = vld [vmem:[#allocation2 + $0xb4] sm:$0xf]  ;;  %v804_v23 = vld [vmem:[#allocation2 + $0x5c] sm:$0x1]  ;;  %v1274_v5 = vor.u32 %v1273_v24, %v5690_v8  ;;  %v5709_v37 = vsel %vm3585_vm5, %v3558_v10, %v5583_v31  ;;  %v5713_v46 = vsel %vm3618_vm6, %v3607_v26, %v5596_v18 }
 0x138   : > { %v2538_v33 = vld [vmem:[#allocation2 + $0xb4] sm:$0xe]  ;;  %v4013_v61 = vcombine.low %v5715_v44, %v5717_v20  ;;  %v2120_v19 = vld [vmem:[#allocation2 + $0xb8] sm:$0xf]  ;;  %v2454_v41 = vshrl.u32 %v2119_v0, 16  ;;  %v2457_v21 = vshll.u32 %v2119_v0, 16  ;;  %v805_v6 = vsel %vm4340_vm3, %v553_v51, %v804_v23 }
 0x139   : > { %v3999_v4 = vrot.slane %v2538_v33, 9  ;;  %v2467_v31 = vshrl.u32 %v2120_v19, 16  ;;  %v4111_v56 = vcombine.low %v2119_v0, %v2120_v19  ;;  %v2463_v15 = vshll.u32 %v2120_v19, 16  ;;  %806 = vst [vmem:[#allocation2 + $0x5c] sm:$0x1] %v805_v6  ;;  %v5737_v6 = vpop.permute.xlu1 %3011 }
 0x13a   : > { %v2682_v18 = vrot.slane %v2120_v19, 5  ;;  %v2456_v47 = vrot.slane %v2454_v41, 4  ;;  %v2459_v25 = vrot.slane %v2457_v21, 5  ;;  %v5725_v39 = vrot.slane %v1264_v29, 4 }
 0x13b   : > { %v5727_v59 = vpack.c.bf16 %v335_v60, %v335_v60  ;;  %3271 = vrot.lane.b32.xlu1 %v4111_v56, %s4301_s20  ;;  %v2465_v27 = vrot.slane %v2463_v15, 5  ;;  %v2469_v54 = vrot.slane %v2467_v31, 4  ;;  %v1275_v48 = vrot.slane %v1274_v5, 4 }
 0x13c   : > { %v2104_v17 = vld [vmem:[#allocation2 + $0x58] sm:$0xf]  ;;  %v5732_v49 = vsel %vm4365_vm8, %v3999_v4, %v2682_v18  ;;  %v2103_v34 = vld [vmem:[#allocation2 + $0x54] sm:$0xf]  ;;  %v2460_v55 = vor.u32 %v2459_v25, %v2456_v47  ;;  %v2684_v2 = vrot.slane %v2682_v18, 4  ;;  %v3624_v43 = vsel %vm3618_vm6, %v5709_v37, %v5615_v14 }
 0x13d   : > { %v2275_v51 = vshrl.u32 %v2104_v17, 16  ;;  %v2271_v38 = vshll.u32 %v2104_v17, 16  ;;  %v2262_v7 = vshrl.u32 %v2103_v34, 16  ;;  %v2265_v24 = vshll.u32 %v2103_v34, 16  ;;  %v2138_v10 = vld [vmem:[#allocation2 + $0xbc] sm:$0x1] }
 0x13e   : > { %v4103_v35 = vcombine.low %v2103_v34, %v2104_v17  ;;  %v2470_v26 = vor.u32 %v2469_v54, %v2465_v27  ;;  %v2530_v29 = vld [vmem:[#allocation2 + $0x54] sm:$0xe]  ;;  %v2461_v60 = vrot.slane %v2460_v55, 4  ;;  %v2473_v0 = vshll.u32 %v2138_v10, 16 }
 0x13f   : > { %v2273_v23 = vrot.slane %v2271_v38, 5  ;;  %v2277_v33 = vrot.slane %v2275_v51, 4  ;;  %v2264_v19 = vrot.slane %v2262_v7, 4  ;;  %v2267_v41 = vrot.slane %v2265_v24, 5  ;;  %v5749_v7 = vpop.permute.xlu0 %2995 }
 0x140   : > { %3255 = vrot.lane.b32.xlu0 %v4103_v35, %s4301_s20  ;;  %v2471_v5 = vrot.slane %v2470_v26, 4  ;;  %v2685_v21 = vrot.slane %v2138_v10, 5  ;;  %v2466_v4 = vsel %vm4512_vm14, %v2461_v60, %v2465_v27  ;;  %v2475_v31 = vrot.slane %v2473_v0, 5  ;;  %v2130_v56 = vld [vmem:[#allocation2 + $0x5c] sm:$0x1] }
 0x141   : > { %v2278_v15 = vor.u32 %v2277_v33, %v2273_v23  ;;  %v3991_v18 = vrot.slane %v2530_v29, 9  ;;  %v2268_v47 = vor.u32 %v2267_v41, %v2264_v19  ;;  %v2281_v25 = vshll.u32 %v2130_v56, 16  ;;  %v1319_v26 = vld [vmem:[#allocation2 + $0xa8] sm:$0xe]  ;;  %v5768_v41 = vpop.permute.xlu1 %3091  ;;  %v5821_v14 = vld [vmem:[#allocation2 + $0x5c] sm:$0x1] }
 0x142   : > { %v2626_v54 = vrot.slane %v2104_v17, 5  ;;  %v1270_v34 = vsel %vm4512_vm14, %v5725_v39, %v5690_v8  ;;  %v2476_v51 = vsel %vm4512_vm14, %v2471_v5, %v2475_v31  ;;  %v2686_v38 = vsel %vm4365_vm8, %v2684_v2, %v2685_v21  ;;  %v908_v39 = vld [vmem:[#allocation2 + $0x50] sm:$0x1]  ;;  %v5773_v21 = vld [vmem:[#allocation2 + $0xb4] sm:$0xf] }
 0x143   : > { %v2279_v55 = vrot.slane %v2278_v15, 4  ;;  %v2629_v27 = vrot.slane %v2130_v56, 5  ;;  %v4127_v24 = vcombine.low %v2466_v4, %v2476_v51  ;;  %v2269_v35 = vrot.slane %v2268_v47, 4  ;;  %v5777_v47 = vpop.permute.xlu0 %3075  ;;  %v5781_v51 = vld [vmem:[#allocation2 + $0xb8] sm:$0xf] }
 0x144   : > { %v2283_v10 = vrot.slane %v2281_v25, 5  ;;  %v2627_v17 = vsel %vm4365_vm8, %v3991_v18, %v2626_v54  ;;  %v2628_v29 = vrot.slane %v2626_v54, 4  ;;  %v1280_v8 = vsel %vm4512_vm14, %v1275_v48, %v5694_v13  ;;  %v1311_v48 = vld [vmem:[#allocation2 + $0x48] sm:$0xe] }
 0x145   : > { %v1068_v60 = vrot.slane %v1066_v16, 4  ;;  %v1071_v2 = vrot.slane %v1069_v63, 5  ;;  %3351 = vrot.lane.b32.xlu1 %v4127_v24, %s4306_s25  ;;  %v2274_v0 = vsel %vm4512_vm14, %v2269_v35, %v2273_v23  ;;  %v4143_v19 = vcombine.low %v5732_v49, %v2686_v38 }
 0x146   : > { %v2284_v33 = vsel %vm4512_vm14, %v2279_v55, %v2283_v10  ;;  %v1077_v13 = vrot.slane %v1075_v22, 5  ;;  %v2630_v53 = vsel %vm4365_vm8, %v2628_v29, %v2629_v27  ;;  %v1079_v5 = vshrl.u32 %v5679_v28, 16  ;;  %v5789_v29 = vld [vmem:[#allocation2 + $0x54] sm:$0xf] }
 0x147   : > { %v4119_v16 = vcombine.low %v2274_v0, %v2284_v33  ;;  %v1072_v63 = vor.u32 %v1071_v2, %v1068_v60  ;;  %v4135_v23 = vcombine.low %v2627_v17, %v2630_v53  ;;  %v4032_v4 = vcombine.low %v1270_v34, %v1280_v8  ;;  %v5801_v0 = vld [vmem:[#allocation2 + $0x58] sm:$0xf] }
 0x148   : > { %v1085_v31 = vshll.u32 %v908_v39, 16  ;;  %v3968_v56 = vrot.slane %v1319_v26, 9  ;;  %v1081_v22 = vrot.slane %v1079_v5, 4  ;;  %v1472_v15 = vrot.slane %v5659_v50, 5  ;;  %v5818_v5 = vpop.permute.xlu0 %3155 }
 0x149   : > { %3335 = vrot.lane.b32.xlu0 %v4119_v16, %s4306_s25  ;;  %v1073_v49 = vrot.slane %v1072_v63, 4  ;;  %v3960_v18 = vrot.slane %v1311_v48, 9  ;;  %3431 = vrot.lane.b32.xlu1 %v4143_v19, %s4304_s23  ;;  %v1419_v25 = vrot.slane %v908_v39, 5  ;;  %v1416_v54 = vrot.slane %v5679_v28, 5  ;;  %v5791_v28 = vpop.permute.xlu1 %3171  ;;  %v1530_v63 = vld [vmem:[#allocation2 + $0xbc] sm:$0x1] }
 0x14a   : > { %v1869_v34 = vshrl.u32 %v5773_v21, 16  ;;  %v1872_v55 = vshll.u32 %v5773_v21, 16  ;;  %v1082_v38 = vor.u32 %v1081_v22, %v1077_v13  ;;  %v1087_v27 = vrot.slane %v1085_v31, 5 }
 0x14b   : > { %v1473_v24 = vsel %vm4365_vm8, %v3968_v56, %v1472_v15  ;;  %v1474_v50 = vrot.slane %v1472_v15, 4  ;;  %v1078_v35 = vsel %vm4512_vm14, %v1073_v49, %v1077_v13  ;;  %v1418_v10 = vrot.slane %v1416_v54, 4 }
 0x14c   : > { %v1871_v17 = vrot.slane %v1869_v34, 4  ;;  %v1874_v26 = vrot.slane %v1872_v55, 5  ;;  %v1083_v8 = vrot.slane %v1082_v38, 4  ;;  %v1417_v60 = vsel %vm4365_vm8, %v3960_v18, %v1416_v54 }
 0x14d   : > { %3415 = vrot.lane.b32.xlu0 %v4135_v23, %s4304_s23  ;;  %v1476_v39 = vsel %vm4365_vm8, %v1474_v50, %v1475_v57  ;;  %v1882_v2 = vshrl.u32 %v5781_v51, 16  ;;  %2841 = vrot.lane.b32.xlu1 %v4032_v4, %s4302_s21  ;;  %v1420_v19 = vsel %vm4365_vm8, %v1418_v10, %v1419_v25  ;;  %v4064_v13 = vcombine.low %v5773_v21, %v5781_v51  ;;  %v5830_v54 = vpop.permute.xlu1 %3267 }
 0x14e   : > { %v4048_v33 = vcombine.low %v1473_v24, %v1476_v39  ;;  %v1088_v57 = vsel %vm4512_vm14, %v1083_v8, %v1087_v27  ;;  %v3673_v48 = vsel %vm3651_vm9, %v5713_v46, %v5628_v32  ;;  %v1677_v16 = vshrl.u32 %v5789_v29, 16  ;;  %v1930_v32 = vld [vmem:[#allocation2 + $0xb4] sm:$0xe]  ;;  %v5838_v39 = vpop.permute.xlu0 %3251 }
 0x14f   : > { %v1680_v53 = vshll.u32 %v5789_v29, 16  ;;  %v4024_v23 = vcombine.low %v1078_v35, %v1088_v57  ;;  %v4040_v21 = vcombine.low %v1417_v60, %v1420_v19  ;;  %v1690_v4 = vshrl.u32 %v5801_v0, 16  ;;  %v1922_v8 = vld [vmem:[#allocation2 + $0x54] sm:$0xe] }
 0x150   : > { %v1875_v31 = vor.u32 %v1874_v26, %v1871_v17  ;;  %v1679_v37 = vrot.slane %v1677_v16, 4  ;;  %v1878_v49 = vshll.u32 %v5781_v51, 16  ;;  %v1884_v22 = vrot.slane %v1882_v2, 4 }
 0x151   : > { %v1682_v56 = vrot.slane %v1680_v53, 5  ;;  %2825 = vrot.lane.b32.xlu0 %v4024_v23, %s4302_s21  ;;  %2921 = vrot.lane.b32.xlu1 %v4048_v33, %s4299_s18  ;;  %v4056_v46 = vcombine.low %v5789_v29, %v5801_v0  ;;  %v1888_v18 = vshll.u32 %v1530_v63, 16  ;;  %v3706_v25 = vsel %vm3684_vm12, %v3673_v48, %v5649_v62  ;;  %v243_v48 = vld [vmem:[#allocation2 + $0xc0] sm:$0x1] }
 0x152   : > { %v1876_v15 = vrot.slane %v1875_v31, 4  ;;  %v1880_v34 = vrot.slane %v1878_v49, 5  ;;  %v1686_v38 = vshll.u32 %v5801_v0, 16  ;;  %v1692_v27 = vrot.slane %v1690_v4, 4  ;;  %4205 = vmatprep.subr.msk.bf16.mxu0 %vm3718_vm13, %v3706_v25  ;;  %v5854_v4 = vpop.permute.xlu1 %3347 }
 0x153   : > { %v1683_v55 = vor.u32 %v1682_v56, %v1679_v37  ;;  %v3657_v24 = vsel %vm3651_vm9, %v3624_v43, %v5639_v58  ;;  %v1696_v50 = vshll.u32 %v5821_v14, 16  ;;  %v3984_v35 = vrot.slane %v1930_v32, 9 }
 0x154   : > { %v2080_v10 = vrot.slane %v5781_v51, 5  ;;  %v1885_v17 = vor.u32 %v1884_v22, %v1880_v34  ;;  %v1890_v26 = vrot.slane %v1888_v18, 5  ;;  %v1688_v29 = vrot.slane %v1686_v38, 5 }
 0x155   : > { %v1684_v62 = vrot.slane %v1683_v55, 4  ;;  %2905 = vrot.lane.b32.xlu0 %v4040_v21, %s4299_s18  ;;  %3017 = vrot.lane.b32.xlu1 %v4064_v13, %s4300_s19  ;;  %v1881_v58 = vsel %vm4512_vm14, %v1876_v15, %v1880_v34  ;;  %v2083_v51 = vrot.slane %v1530_v63, 5  ;;  %v1698_v57 = vrot.slane %v1696_v50, 5  ;;  %v336_v21 = vld [vmem:[%s4372_s17 + $0xf8] sm:$0xff] }
 0x156   : > { %v2081_v60 = vsel %vm4365_vm8, %v3984_v35, %v2080_v10  ;;  %v2082_v2 = vrot.slane %v2080_v10, 4  ;;  %v1886_v33 = vrot.slane %v1885_v17, 4  ;;  %v1693_v43 = vor.u32 %v1692_v27, %v1688_v29  ;;  %v4276_v27 = vld [vmem:[#allocation2 + $0x24] sm:$0xf] }
 0x157   : > { %v1689_v19 = vsel %vm4512_vm14, %v1684_v62, %v1688_v29  ;;  %v3690_v13 = vsel %vm3684_vm12, %v3657_v24, %v5670_v12  ;;  %v3976_v53 = vrot.slane %v1922_v8, 9  ;;  %v2024_v23 = vrot.slane %v5801_v0, 5  ;;  %v4277_v24 = vld [vmem:[#allocation2 + $0x28] sm:$0xf]  ;;  %v2106_v35 = vld [vmem:[#allocation2 + $0x64] sm:$0xf] }
 0x158   : > { %v2084_v16 = vsel %vm4365_vm8, %v2082_v2, %v2083_v51  ;;  %v1891_v63 = vsel %vm4512_vm14, %v1886_v33, %v1890_v26  ;;  %v1694_v31 = vrot.slane %v1693_v43, 4  ;;  %v2027_v56 = vrot.slane %v5821_v14, 5  ;;  %v5868_v14 = vld [vmem:[#allocation2 + $0x60] sm:$0xf]  ;;  %v299_v62 = vld [vmem:[#allocation2 + $0xc8] sm:$0x1]  ;;  %v5886_v2 = vpop.permute.xlu1 %3427 }
 0x159   : > { %v4096_v37 = vcombine.low %v2081_v60, %v2084_v16  ;;  %3001 = vrot.lane.b32.xlu0 %v4056_v46, %s4300_s19  ;;  %v4080_v49 = vcombine.low %v1881_v58, %v1891_v63  ;;  %v2025_v22 = vsel %vm4365_vm8, %v3976_v53, %v2024_v23  ;;  %v2026_v12 = vrot.slane %v2024_v23, 4  ;;  %v5870_v46 = vpop.permute.xlu0 %3331  ;;  %v2131_v51 = vld [vmem:[#allocation2 + $0x68] sm:$0x1]  ;;  %v2531_v53 = vld [vmem:[#allocation2 + $0x60] sm:$0xe] }
 0x15a   : > { %v244_v0 = vsel %vm4340_vm3, 0, %v243_v48  ;;  %v1699_v32 = vsel %vm4512_vm14, %v1694_v31, %v1698_v57  ;;  %v4184_v15 = vpack.c.bf16 %v336_v21, %v336_v21  ;;  %v691_v18 = vshrl.u32 %v5727_v59, 16  ;;  %v5896_v23 = vld [vmem:[#allocation2 + $0xb4] sm:$0xf] }
 0x15b   : > { %245 = vst [vmem:[#allocation2 + $0xc0] sm:$0x1] %v244_v0  ;;  %v694_v25 = vshll.u32 %v5727_v59, 16  ;;  %3097 = vrot.lane.b32.xlu1 %v4080_v49, %s4305_s24  ;;  %v4072_v34 = vcombine.low %v1689_v19, %v1699_v32  ;;  %v2028_v55 = vsel %vm4365_vm8, %v2026_v12, %v2027_v56  ;;  %v3726_v38 = vsel %vm3718_vm13, %v3690_v13, 0  ;;  %v5909_v0 = vld [vmem:[#allocation2 + $0xb8] sm:$0xf] }
 0x15c   : > { %v4005_v50 = vcombine.low %v4276_v27, %v4277_v24  ;;  %v3473_v59 = vsel %vm3437_vm15, %v4013_v61, %v5685_v36  ;;  %v693_v10 = vrot.slane %v691_v18, 7  ;;  %v699_v17 = vshrl.u32 %v4184_v15, 16  ;;  %4190 = vmatpush3.bf16.xpose.msra.mxu0 %v3726_v38  ;;  %v5912_v45 = vpop.permute.xlu1 %2837 }
 0x15d   : > { %v702_v26 = vshll.u32 %v4184_v15, 16  ;;  %3081 = vrot.lane.b32.xlu0 %v4072_v34, %s4305_s24  ;;  %v4088_v29 = vcombine.low %v2025_v22, %v2028_v55  ;;  %v2286_v58 = vshrl.u32 %v5868_v14, 16  ;;  %v2289_v60 = vshll.u32 %v5868_v14, 16  ;;  %v5898_v21 = vpop.permute.xlu0 %3411  ;;  %v5914_v34 = vld [vmem:[#allocation2 + $0xbc] sm:$0x1] }
 0x15e   : > { %v3449_v8 = vsel %vm3437_vm15, %v4005_v50, %v5704_v42  ;;  %v696_v44 = vor.u32 %v694_v25, %v693_v10  ;;  %v697_v20 = vrot.slane %v693_v10, 4  ;;  %v701_v36 = vrot.slane %v699_v17, 7 }
 0x15f   : > { %v2299_v61 = vshrl.u32 %v2106_v35, 16  ;;  %3177 = vrot.lane.b32.xlu1 %v4096_v37, %s4303_s22  ;;  %v3510_v33 = vsel %vm3486_vm1, %v3473_v59, %v5723_v52  ;;  %v2288_v19 = vrot.slane %v2286_v58, 4  ;;  %v2291_v43 = vrot.slane %v2289_v60, 5 }
 0x160   : > { %v300_v42 = vsel %vm4357_vm7, 0, %v299_v62  ;;  %v704_v57 = vor.u32 %v702_v26, %v701_v36  ;;  %v706_v48 = vrot.slane %v701_v36, 4  ;;  %v4104_v16 = vcombine.low %v5868_v14, %v2106_v35 }
 0x161   : > { %301 = vst [vmem:[#allocation2 + $0xc8] sm:$0x1] %v300_v42  ;;  %v3494_v13 = vsel %vm3486_vm1, %v3449_v8, %v5734_v30  ;;  %3161 = vrot.lane.b32.xlu0 %v4088_v29, %s4303_s22  ;;  %v2292_v63 = vor.u32 %v2291_v43, %v2288_v19  ;;  %v2295_v31 = vshll.u32 %v2106_v35, 16  ;;  %v2301_v37 = vrot.slane %v2299_v61, 4  ;;  %v5925_v17 = vpop.permute.xlu0 %2821  ;;  %v5941_v43 = vpop.permute.xlu1 %2917 }
 0x162   : > { %v863_v52 = vld [vmem:[#allocation2 + $0xc0] sm:$0xf]  ;;  %v2305_v56 = vshll.u32 %v2131_v51, 16  ;;  %v705_v49 = vsel %vm4405_vm11, %v697_v20, %v704_v57  ;;  %v3543_v30 = vsel %vm3519_vm2, %v3510_v33, %v5737_v6  ;;  %v3527_v12 = vsel %vm3519_vm2, %v3494_v13, %v5749_v7 }
 0x163   : > { %v864_v22 = vsel %vm4397_vm10, %v696_v44, %v863_v52  ;;  %866 = vst.msk [vmem:[#allocation2 + $0xc4] sm:$0xf] %vm183_vm0, %v705_v49  ;;  %v2293_v32 = vrot.slane %v2292_v63, 4  ;;  %v2297_v15 = vrot.slane %v2295_v31, 5  ;;  %v3992_v25 = vrot.slane %v2531_v53, 9 }
 0x164   : > { %865 = vst [vmem:[#allocation2 + $0xc0] sm:$0xf] %v864_v22  ;;  %v2307_v18 = vrot.slane %v2305_v56, 5  ;;  %v2633_v14 = vrot.slane %v2106_v35, 5  ;;  %v2636_v40 = vrot.slane %v2131_v51, 5  ;;  %v1282_v6 = vshrl.u32 %v5896_v23, 16 }
 0x165   : > { %v1285_v55 = vshll.u32 %v5896_v23, 16  ;;  %3257 = vrot.lane.b32.xlu0 %v4104_v16, %s4301_s20  ;;  %v2298_v7 = vsel %vm4512_vm14, %v2293_v32, %v2297_v15  ;;  %v2302_v38 = vor.u32 %v2301_v37, %v2297_v15  ;;  %v1291_v27 = vshll.u32 %v5909_v0, 16  ;;  %v5953_v56 = vld [vmem:[#allocation2 + $0x64] sm:$0xf]  ;;  %v5958_v32 = vpop.permute.xlu0 %2901 }
 0x166   : > { %v1295_v24 = vshrl.u32 %v5909_v0, 16  ;;  %v2634_v50 = vsel %vm4365_vm8, %v3992_v25, %v2633_v14  ;;  %v2635_v35 = vrot.slane %v2633_v14, 4  ;;  %v1284_v59 = vrot.slane %v1282_v6, 4  ;;  %v5961_v14 = vld [vmem:[#allocation2 + $0x58] sm:$0xf] }
 0x167   : > { %v1287_v10 = vrot.slane %v1285_v55, 5  ;;  %v2303_v62 = vrot.slane %v2302_v38, 4  ;;  %v5927_v29 = vrot.slane %v1291_v27, 5  ;;  %v1301_v58 = vshll.u32 %v5914_v34, 16 }
 0x168   : > { %v867_v26 = vld [vmem:[#allocation2 + $0xc8] sm:$0x1]  ;;  %v1297_v8 = vrot.slane %v1295_v24, 4  ;;  %v3576_v44 = vsel %vm3552_vm4, %v3543_v30, %v5768_v41  ;;  %v2637_v20 = vsel %vm4365_vm8, %v2635_v35, %v2636_v40  ;;  %v3560_v19 = vsel %vm3552_vm4, %v3527_v12, %v5777_v47  ;;  %v5951_v47 = vld [vmem:[#allocation2 + $0x60] sm:$0xf]  ;;  %v5974_v35 = vpop.permute.xlu1 %3013 }
 0x169   : > { %v868_v60 = vsel %vm4340_vm3, %v706_v48, %v867_v26  ;;  %v1288_v36 = vor.u32 %v1287_v10, %v1284_v59  ;;  %v2308_v61 = vsel %vm4512_vm14, %v2303_v62, %v2307_v18  ;;  %v1303_v33 = vrot.slane %v1301_v58, 5  ;;  %v909_v62 = vld [vmem:[#allocation2 + $0x5c] sm:$0x1] }
 0x16a   : > { %869 = vst [vmem:[#allocation2 + $0xc8] sm:$0x1] %v868_v60  ;;  %v1298_v51 = vor.u32 %v1297_v8, %v5927_v29  ;;  %v2122_v57 = vld [vmem:[#allocation2 + $0xc4] sm:$0xf]  ;;  %v4120_v48 = vcombine.low %v2298_v7, %v2308_v61  ;;  %v4136_v16 = vcombine.low %v2634_v50, %v2637_v20  ;;  %v5945_v13 = vsel %vm3585_vm5, %v3576_v44, %v5791_v28  ;;  %v5956_v28 = vld [vmem:[#allocation2 + $0x54] sm:$0xf] }
 0x16b   : > { %v2121_v42 = vld [vmem:[#allocation2 + $0xc0] sm:$0xf]  ;;  %v5949_v53 = vsel %vm3585_vm5, %v3560_v19, %v5818_v5  ;;  %v2491_v31 = vshrl.u32 %v2122_v57, 16  ;;  %v2487_v49 = vshll.u32 %v2122_v57, 16  ;;  %v2689_v30 = vrot.slane %v2122_v57, 5 }
 0x16c   : > { %v2539_v41 = vld [vmem:[#allocation2 + $0xc0] sm:$0xe]  ;;  %v2478_v52 = vshrl.u32 %v2121_v42, 16  ;;  %v2481_v63 = vshll.u32 %v2121_v42, 16  ;;  %v4112_v37 = vcombine.low %v2121_v42, %v2122_v57  ;;  %3337 = vrot.lane.b32.xlu0 %v4120_v48, %s4306_s25  ;;  %v1289_v12 = vrot.slane %v1288_v36, 4  ;;  %v5981_v57 = vpop.permute.xlu0 %2997 }
 0x16d   : > { %v4000_v22 = vrot.slane %v2539_v41, 9  ;;  %v2493_v18 = vrot.slane %v2491_v31, 4  ;;  %v1299_v25 = vrot.slane %v1298_v51, 4  ;;  %v2489_v40 = vrot.slane %v2487_v49, 5  ;;  %v1320_v36 = vld [vmem:[#allocation2 + $0xb4] sm:$0xe] }
 0x16e   : > { %v2480_v5 = vrot.slane %v2478_v52, 4  ;;  %v2483_v15 = vrot.slane %v2481_v63, 5  ;;  %3273 = vrot.lane.b32.xlu1 %v4112_v37, %s4301_s20  ;;  %v2691_v55 = vrot.slane %v2689_v30, 4  ;;  %v4057_v7 = vcombine.low %v5951_v47, %v5953_v56  ;;  %v1312_v49 = vld [vmem:[#allocation2 + $0x54] sm:$0xe] }
 0x16f   : > { %v5965_v6 = vsel %vm4365_vm8, %v4000_v22, %v2689_v30  ;;  %v1294_v27 = vsel %vm4512_vm14, %v1289_v12, %v5927_v29  ;;  %v1090_v24 = vshrl.u32 %v5956_v28, 16  ;;  %v1093_v50 = vshll.u32 %v5956_v28, 16 }
 0x170   : > { %v2484_v38 = vor.u32 %v2483_v15, %v2480_v5  ;;  %v2494_v10 = vor.u32 %v2493_v18, %v2489_v40  ;;  %3417 = vrot.lane.b32.xlu0 %v4136_v16, %s4304_s23  ;;  %v1304_v26 = vsel %vm4512_vm14, %v1299_v25, %v1303_v33  ;;  %v1099_v8 = vshll.u32 %v5961_v14, 16  ;;  %v5991_v15 = vld [vmem:[#allocation2 + $0xc0] sm:$0xf]  ;;  %v5993_v18 = vpop.permute.xlu1 %3093 }
 0x171   : > { %v2139_v59 = vld [vmem:[#allocation2 + $0xc8] sm:$0x1]  ;;  %v1103_v58 = vshrl.u32 %v5961_v14, 16  ;;  %v1092_v20 = vrot.slane %v1090_v24, 4  ;;  %v1095_v51 = vrot.slane %v1093_v50, 5  ;;  %v1109_v16 = vshll.u32 %v909_v62, 16 }
 0x172   : > { %v2485_v60 = vrot.slane %v2484_v38, 4  ;;  %v2497_v29 = vshll.u32 %v2139_v59, 16  ;;  %v2692_v44 = vrot.slane %v2139_v59, 5  ;;  %v2495_v61 = vrot.slane %v2494_v10, 4  ;;  %v6001_v10 = vld [vmem:[#allocation2 + $0xc4] sm:$0xf] }
 0x173   : > { %v1101_v19 = vrot.slane %v1099_v8, 5  ;;  %v1105_v42 = vrot.slane %v1103_v58, 4  ;;  %v4033_v52 = vcombine.low %v1294_v27, %v1304_v26  ;;  %v1096_v63 = vor.u32 %v1095_v51, %v1092_v20  ;;  %v6009_v58 = vpop.permute.xlu0 %3077 }
 0x174   : > { %v2490_v48 = vsel %vm4512_vm14, %v2485_v60, %v2489_v40  ;;  %v2499_v33 = vrot.slane %v2497_v29, 5  ;;  %v2693_v41 = vsel %vm4365_vm8, %v2691_v55, %v2692_v44  ;;  %v3969_v37 = vrot.slane %v1320_v36, 9 }
 0x175   : > { %v1106_v31 = vor.u32 %v1105_v42, %v1101_v19  ;;  %v1111_v30 = vrot.slane %v1109_v16, 5  ;;  %v1479_v12 = vrot.slane %v5909_v0, 5  ;;  %v1482_v5 = vrot.slane %v5914_v34, 5 }
 0x176   : > { %v2500_v22 = vsel %vm4512_vm14, %v2495_v61, %v2499_v33  ;;  %v4144_v40 = vcombine.low %v5965_v6, %v2693_v41  ;;  %v1097_v55 = vrot.slane %v1096_v63, 4  ;;  %v3961_v50 = vrot.slane %v1312_v49, 9 }
 0x177   : > { %v4128_v25 = vcombine.low %v2490_v48, %v2500_v22  ;;  %v1107_v38 = vrot.slane %v1106_v31, 4  ;;  %v5998_v27 = vsel %vm4365_vm8, %v3969_v37, %v1479_v12  ;;  %v1481_v24 = vrot.slane %v1479_v12, 4  ;;  %v6039_v12 = vld [vmem:[#allocation2 + $0x68] sm:$0x1] }
 0x178   : > { %v1423_v59 = vrot.slane %v5961_v14, 5  ;;  %v1102_v34 = vsel %vm4512_vm14, %v1097_v55, %v1101_v19  ;;  %v1426_v26 = vrot.slane %v909_v62, 5  ;;  %v1893_v8 = vshrl.u32 %v5991_v15, 16  ;;  %v6020_v19 = vld [vmem:[#allocation2 + $0xc8] sm:$0x1]  ;;  %v6043_v55 = vpop.permute.xlu0 %3157 }
 0x179   : > { %3353 = vrot.lane.b32.xlu1 %v4128_v25, %s4306_s25  ;;  %v1112_v6 = vsel %vm4512_vm14, %v1107_v38, %v1111_v30  ;;  %v1483_v29 = vsel %vm4365_vm8, %v1481_v24, %v1482_v5  ;;  %v3642_v36 = vsel %vm3618_vm6, %v5945_v13, %v5830_v54  ;;  %v1896_v51 = vshll.u32 %v5991_v15, 16  ;;  %v6031_v13 = vpop.permute.xlu1 %3173 }
 0x17a   : > { %v4025_v60 = vcombine.low %v1102_v34, %v1112_v6  ;;  %v1424_v44 = vsel %vm4365_vm8, %v3961_v50, %v1423_v59  ;;  %v1425_v20 = vrot.slane %v1423_v59, 4  ;;  %v1895_v61 = vrot.slane %v1893_v8, 4 }
 0x17b   : > { %v1906_v62 = vshrl.u32 %v6001_v10, 16  ;;  %v4049_v42 = vcombine.low %v5998_v27, %v1483_v29  ;;  %v4065_v33 = vcombine.low %v5991_v15, %v6001_v10  ;;  %v3626_v54 = vsel %vm3618_vm6, %v5949_v53, %v5838_v39 }
 0x17c   : > { %2827 = vrot.lane.b32.xlu0 %v4025_v60, %s4302_s21  ;;  %v1427_v48 = vsel %vm4365_vm8, %v1425_v20, %v1426_v26  ;;  %v1898_v16 = vrot.slane %v1896_v51, 5  ;;  %v1701_v63 = vshrl.u32 %v5951_v47, 16  ;;  %v1704_v31 = vshll.u32 %v5951_v47, 16 }
 0x17d   : > { %3433 = vrot.lane.b32.xlu1 %v4144_v40, %s4304_s23  ;;  %v4041_v41 = vcombine.low %v1424_v44, %v1427_v48  ;;  %v1714_v37 = vshrl.u32 %v5953_v56, 16  ;;  %v1902_v49 = vshll.u32 %v6001_v10, 16  ;;  %v1908_v22 = vrot.slane %v1906_v62, 4  ;;  %v1931_v40 = vld [vmem:[#allocation2 + $0xc0] sm:$0xe]  ;;  %v6053_v20 = vpop.permute.xlu1 %3269 }
 0x17e   : > { %v1912_v30 = vshll.u32 %v6020_v19, 16  ;;  %v3675_v39 = vsel %vm3651_vm9, %v3642_v36, %v5854_v4  ;;  %v1703_v53 = vrot.slane %v1701_v63, 4  ;;  %v1706_v5 = vrot.slane %v1704_v31, 5  ;;  %v1923_v44 = vld [vmem:[#allocation2 + $0x60] sm:$0xe] }
 0x17f   : > { %v1899_v25 = vor.u32 %v1898_v16, %v1895_v61  ;;  %v1904_v38 = vrot.slane %v1902_v49, 5  ;;  %v3708_v24 = vsel %vm3684_vm12, %v3675_v39, %v5886_v2  ;;  %v1710_v50 = vshll.u32 %v5953_v56, 16 }
 0x180   : > { %2907 = vrot.lane.b32.xlu0 %v4041_v41, %s4299_s18  ;;  %v1914_v27 = vrot.slane %v1912_v30, 5  ;;  %v1707_v34 = vor.u32 %v1706_v5, %v1703_v53  ;;  %v1716_v4 = vrot.slane %v1714_v37, 4  ;;  %v1720_v6 = vshll.u32 %v6039_v12, 16  ;;  %4206 = vmatprep.subr.msk.bf16.mxu0 %vm3718_vm13, %v3708_v24  ;;  %v246_v37 = vld [vmem:[#allocation2 + $0xcc] sm:$0x1]  ;;  %v6071_v47 = vpop.permute.xlu0 %3253 }
 0x181   : > { %2843 = vrot.lane.b32.xlu1 %v4033_v52, %s4302_s21  ;;  %v1900_v59 = vrot.slane %v1899_v25, 4  ;;  %v1909_v26 = vor.u32 %v1908_v22, %v1904_v38  ;;  %v1712_v8 = vrot.slane %v1710_v50, 5  ;;  %v3985_v60 = vrot.slane %v1931_v40, 9  ;;  %v6078_v30 = vld [vmem:[#allocation2 + $0xd0] sm:$0xf] }
 0x182   : > { %v2087_v29 = vrot.slane %v6001_v10, 5  ;;  %v3659_v52 = vsel %vm3651_vm9, %v3626_v54, %v5870_v46  ;;  %v1708_v36 = vrot.slane %v1707_v34, 4  ;;  %v2090_v61 = vrot.slane %v6020_v19, 5  ;;  %v4278_v54 = vld [vmem:[#allocation2 + $0x90] sm:$0xf] }
 0x183   : > { %v1905_v2 = vsel %vm4512_vm14, %v1900_v59, %v1904_v38  ;;  %v1910_v51 = vrot.slane %v1909_v26, 4  ;;  %v1717_v62 = vor.u32 %v1716_v4, %v1712_v8  ;;  %v1722_v48 = vrot.slane %v1720_v6, 5  ;;  %v4279_v19 = vld [vmem:[#allocation2 + $0x94] sm:$0xf]  ;;  %v6085_v40 = vld [vmem:[#allocation2 + $0x6c] sm:$0xf] }
 0x184   : > { %3003 = vrot.lane.b32.xlu0 %v4057_v7, %s4300_s19  ;;  %v2089_v41 = vrot.slane %v2087_v29, 4  ;;  %v1713_v16 = vsel %vm4512_vm14, %v1708_v36, %v1712_v8  ;;  %v6069_v46 = vsel %vm4365_vm8, %v3985_v60, %v2087_v29  ;;  %v4014_v63 = vcombine.low %v4278_v54, %v4279_v19  ;;  %v6093_v24 = vld [vmem:[#allocation2 + $0x70] sm:$0xf]  ;;  %v4281_v4 = vld [vmem:[#allocation2 + $0x34] sm:$0xf] }
 0x185   : > { %2923 = vrot.lane.b32.xlu1 %v4049_v42, %s4299_s18  ;;  %v3977_v31 = vrot.slane %v1923_v44, 9  ;;  %v1915_v7 = vsel %vm4512_vm14, %v1910_v51, %v1914_v27  ;;  %v1718_v49 = vrot.slane %v1717_v62, 4  ;;  %v3692_v42 = vsel %vm3684_vm12, %v3659_v52, %v5898_v21  ;;  %v4280_v34 = vld [vmem:[#allocation2 + $0x30] sm:$0xf] }
 0x186   : > { %v2031_v22 = vrot.slane %v5953_v56, 5  ;;  %v4081_v39 = vcombine.low %v1905_v2, %v1915_v7  ;;  %v2091_v53 = vsel %vm4365_vm8, %v2089_v41, %v2090_v61  ;;  %v3476_v5 = vsel %vm3437_vm15, %v4014_v63, %v5912_v45  ;;  %v6114_v2 = vld [vmem:[#allocation2 + $0x74] sm:$0x1] }
 0x187   : > { %v2034_v25 = vrot.slane %v6039_v12, 5  ;;  %v1723_v38 = vsel %vm4512_vm14, %v1718_v49, %v1722_v48  ;;  %v247_v27 = vsel %vm4340_vm3, 0, %v246_v37  ;;  %v6095_v50 = vpop.permute.xlu1 %3349  ;;  %v2515_v12 = vshrl.u32 %v6078_v30, 16  ;;  %v2540_v48 = vld [vmem:[#allocation2 + $0xcc] sm:$0xe] }
 0x188   : > { %v2032_v21 = vsel %vm4365_vm8, %v3977_v31, %v2031_v22  ;;  %v2033_v56 = vrot.slane %v2031_v22, 4  ;;  %v4073_v45 = vcombine.low %v1713_v16, %v1723_v38  ;;  %248 = vst [vmem:[#allocation2 + $0xcc] sm:$0x1] %v247_v27  ;;  %v3728_v59 = vsel %vm3718_vm13, %v3692_v42, 0 }
 0x189   : > { %3019 = vrot.lane.b32.xlu1 %v4065_v33, %s4300_s19  ;;  %v4006_v6 = vcombine.low %v4280_v34, %v4281_v4  ;;  %v4097_v26 = vcombine.low %v6069_v46, %v2091_v53  ;;  %4192 = vmatpush3.bf16.xpose.msra.mxu0 %v3728_v59  ;;  %v2310_v60 = vshrl.u32 %v6085_v40, 16  ;;  %v2313_v15 = vshll.u32 %v6085_v40, 16 }
 0x18a   : > { %v2035_v8 = vsel %vm4365_vm8, %v2033_v56, %v2034_v25  ;;  %3083 = vrot.lane.b32.xlu0 %v4073_v45, %s4305_s24  ;;  %v3512_v29 = vsel %vm3486_vm1, %v3476_v5, %v5941_v43  ;;  %v2323_v44 = vshrl.u32 %v6093_v24, 16  ;;  %v6116_v52 = vpop.permute.xlu0 %3333  ;;  %v303_v51 = vsel %vm4357_vm7, 0, %v302_v1  ;;  %v2532_v5 = vld [vmem:[#allocation2 + $0x6c] sm:$0xe] }
 0x18b   : > { %v4089_v10 = vcombine.low %v2032_v21, %v2035_v8  ;;  %v3452_v33 = vsel %vm3437_vm15, %v4006_v6, %v5925_v17  ;;  %v2312_v36 = vrot.slane %v2310_v60, 4  ;;  %v2315_v61 = vrot.slane %v2313_v15, 5  ;;  %304 = vst [vmem:[#allocation2 + $0xd4] sm:$0x1] %v303_v51  ;;  %v3430_v63 = vpop.permute.xlu1 %3429 }
 0x18c   : > { %v2511_v62 = vshll.u32 %v6078_v30, 16  ;;  %v4105_v17 = vcombine.low %v6085_v40, %v6093_v24  ;;  %v2517_v43 = vrot.slane %v2515_v12, 4  ;;  %v3496_v41 = vsel %vm3486_vm1, %v3452_v33, %v5958_v32 }
 0x18d   : > { %3099 = vrot.lane.b32.xlu1 %v4081_v39, %s4305_s24  ;;  %v2319_v16 = vshll.u32 %v6093_v24, 16  ;;  %v2316_v54 = vor.u32 %v2315_v61, %v2312_v36  ;;  %v2325_v9 = vrot.slane %v2323_v44, 4  ;;  %v2329_v19 = vshll.u32 %v6114_v2, 16 }
 0x18e   : > { %v6127_v46 = vrot.slane %v2511_v62, 5  ;;  %3163 = vrot.lane.b32.xlu0 %v4089_v10, %s4303_s22  ;;  %v3545_v31 = vsel %vm3519_vm2, %v3512_v29, %v5974_v35  ;;  %v4001_v7 = vrot.slane %v2540_v48, 9  ;;  %v2696_v49 = vrot.slane %v6078_v30, 5  ;;  %v3414_v21 = vpop.permute.xlu0 %3413  ;;  %v6156_v29 = vld [vmem:[%s6268_s1] sm:$0x3] }
 0x18f   : > { %v2321_v37 = vrot.slane %v2319_v16, 5  ;;  %v2123_v42 = vld [vmem:[#allocation2 + $0xcc] sm:$0xf]  ;;  %v2317_v22 = vrot.slane %v2316_v54, 4  ;;  %v2331_v39 = vrot.slane %v2329_v19, 5  ;;  %v3529_v53 = vsel %vm3519_vm2, %v3496_v41, %v5981_v57  ;;  %v2840_v60 = vpop.permute.xlu1 %2839  ;;  %4201 = vmatprep.mubr.msk.bf16.mxu0 %vm3718_vm13, %v6156_v29 }
 0x190   : > { %v2518_v32 = vor.u32 %v2517_v43, %v6127_v46  ;;  %v2502_v25 = vshrl.u32 %v2123_v42, 16  ;;  %v2505_v40 = vshll.u32 %v2123_v42, 16  ;;  %v4113_v38 = vcombine.low %v2123_v42, %v6078_v30 }
 0x191   : > { %3179 = vrot.lane.b32.xlu1 %v4097_v26, %s4303_s22  ;;  %v2326_v35 = vor.u32 %v2325_v9, %v2321_v37  ;;  %v2322_v27 = vsel %vm4512_vm14, %v2317_v22, %v2321_v37  ;;  %v2697_v45 = vsel %vm4365_vm8, %v4001_v7, %v2696_v49  ;;  %v3578_v12 = vsel %vm3552_vm4, %v3545_v31, %v5993_v18  ;;  %v4282_v22 = vld [vmem:[#allocation2 + $0x9c] sm:$0xf] }
 0x192   : > { %v2519_v56 = vrot.slane %v2518_v32, 4  ;;  %v2504_v57 = vrot.slane %v2502_v25, 4  ;;  %v2507_v59 = vrot.slane %v2505_v40, 5  ;;  %3259 = vrot.lane.b32.xlu0 %v4105_v17, %s4301_s20  ;;  %v3993_v4 = vrot.slane %v2532_v5, 9  ;;  %v2140_v6 = vld [vmem:[#allocation2 + $0xd4] sm:$0x1]  ;;  %v2824_v48 = vpop.permute.xlu0 %2823 }
 0x193   : > { %v2327_v34 = vrot.slane %v2326_v35, 4  ;;  %v2698_v30 = vrot.slane %v2696_v49, 4  ;;  %v2640_v1 = vrot.slane %v6093_v24, 5  ;;  %v2643_v26 = vrot.slane %v6114_v2, 5  ;;  %v4284_v40 = vld [vmem:[#allocation2 + $0x3c] sm:$0xf] }
 0x194   : > { %v3562_v8 = vsel %vm3552_vm4, %v3529_v53, %v6009_v58  ;;  %v2508_v15 = vor.u32 %v2507_v59, %v2504_v57  ;;  %v2521_v18 = vshll.u32 %v2140_v6, 16  ;;  %v2699_v33 = vrot.slane %v2140_v6, 5 }
 0x195   : > { %3275 = vrot.lane.b32.xlu1 %v4113_v38, %s4301_s20  ;;  %v2332_v10 = vsel %vm4512_vm14, %v2327_v34, %v2331_v39  ;;  %v2641_v44 = vsel %vm4365_vm8, %v3993_v4, %v2640_v1  ;;  %v2642_v2 = vrot.slane %v2640_v1, 4  ;;  %v3611_v58 = vsel %vm3585_vm5, %v3578_v12, %v6031_v13  ;;  %v4283_v39 = vld [vmem:[#allocation2 + $0xa0] sm:$0xf] }
 0x196   : > { %v4121_v24 = vcombine.low %v2322_v27, %v2332_v10  ;;  %v2509_v36 = vrot.slane %v2508_v15, 4  ;;  %v2523_v61 = vrot.slane %v2521_v18, 5  ;;  %v3595_v51 = vsel %vm3585_vm5, %v3562_v8, %v6043_v55  ;;  %v4285_v38 = vld [vmem:[#allocation2 + $0x40] sm:$0xf] }
 0x197   : > { %v3644_v62 = vsel %vm3618_vm6, %v3611_v58, %v6053_v20  ;;  %v2700_v17 = vsel %vm4365_vm8, %v2698_v30, %v2699_v33  ;;  %v2644_v13 = vsel %vm4365_vm8, %v2642_v2, %v2643_v26  ;;  %v3628_v43 = vsel %vm3618_vm6, %v3595_v51, %v6071_v47  ;;  %v2920_v47 = vpop.permute.xlu1 %2919 }
 0x198   : > { %3339 = vrot.lane.b32.xlu0 %v4121_v24, %s4306_s25  ;;  %v3677_v41 = vsel %vm3651_vm9, %v3644_v62, %v6095_v50  ;;  %v2514_v55 = vsel %vm4512_vm14, %v2509_v36, %v6127_v46  ;;  %v2524_v20 = vsel %vm4512_vm14, %v2519_v56, %v2523_v61  ;;  %v4137_v16 = vcombine.low %v2641_v44, %v2644_v13 }
 0x199   : > { %v3661_v54 = vsel %vm3651_vm9, %v3628_v43, %v6116_v52  ;;  %v4129_v9 = vcombine.low %v2514_v55, %v2524_v20  ;;  %v3710_v11 = vsel %vm3684_vm12, %v3677_v41, %v3430_v63  ;;  %v4145_v46 = vcombine.low %v2697_v45, %v2700_v17  ;;  %v2904_v63 = vpop.permute.xlu0 %2903  ;;  %v4286_v55 = vld [vmem:[#allocation2 + $0x48] sm:$0xf]  ;;  %v4287_v20 = vld [vmem:[#allocation2 + $0x4c] sm:$0xf] }
 0x19a   : > { %v3694_v19 = vsel %vm3684_vm12, %v3661_v54, %v3414_v21  ;;  %4207 = vmatprep.subr.msk.bf16.mxu0 %vm3718_vm13, %v3710_v11  ;;  %v4017_v3 = vcombine.low %v5896_v23, %v5909_v0  ;;  %v4009_v52 = vcombine.low %v5956_v28, %v5961_v14  ;;  %v4015_v53 = vcombine.low %v4282_v22, %v4283_v39  ;;  %v4289_v11 = vld [vmem:[#allocation2 + $0xac] sm:$0xf] }
 0x19b   : > { %v3730_v50 = vsel %vm3718_vm13, %v3694_v19, 0  ;;  %3355 = vrot.lane.b32.xlu1 %v4129_v9, %s4306_s25  ;;  %v3016_v31 = vpop.permute.xlu1 %3015  ;;  %v4007_v35 = vcombine.low %v4284_v40, %v4285_v38  ;;  %v4288_v9 = vld [vmem:[#allocation2 + $0xa8] sm:$0xf]  ;;  %vm3795_vm0 = vcmask 1043456   ;;  %vm3808_vm3 = vcmask 7168  }
 0x19c   : > { %3419 = vrot.lane.b32.xlu0 %v4137_v16, %s4304_s23  ;;  %4194 = vmatpush3.bf16.xpose.msra.mxu0 %v3730_v50  ;;  %v3479_v25 = vsel %vm3437_vm15, %v4015_v53, %v2840_v60  ;;  %v4008_v16 = vcombine.low %v4286_v55, %v4287_v20  ;;  %v4016_v19 = vcombine.low %v4288_v9, %v4289_v11  ;;  %vm3810_vm7 = vcmask 11264  }
 0x19d   : > { %v3000_v37 = vpop.permute.xlu0 %2999  ;;  %v3514_v56 = vsel %vm3486_vm1, %v3479_v25, %v2920_v47  ;;  %v3455_v12 = vsel %vm3437_vm15, %v4007_v35, %v2824_v48 }
 0x19e   : > { %v3547_v27 = vsel %vm3519_vm2, %v3514_v56, %v3016_v31  ;;  %v3498_v59 = vsel %vm3486_vm1, %v3455_v12, %v2904_v63 }
 0x19f   : > { %3435 = vrot.lane.b32.xlu1 %v4145_v46, %s4304_s23  ;;  %v3096_v7 = vpop.permute.xlu1 %3095  ;;  %v3531_v4 = vsel %vm3519_vm2, %v3498_v59, %v3000_v37 }
 0x1a0   : > { %v3580_v57 = vsel %vm3552_vm4, %v3547_v27, %v3096_v7 }
 0x1a1   : > { %v3080_v49 = vpop.permute.xlu0 %3079 }
 0x1a2   : > { %v3564_v1 = vsel %vm3552_vm4, %v3531_v4, %v3080_v49 }
 0x1a3   : > { %v3176_v42 = vpop.permute.xlu1 %3175 }
 0x1a4   : > { %v3613_v34 = vsel %vm3585_vm5, %v3580_v57, %v3176_v42 }
 0x1a5   : > { %v3160_v32 = vpop.permute.xlu0 %3159 }
 0x1a6   : > { %v3597_v60 = vsel %vm3585_vm5, %v3564_v1, %v3160_v32 }
 0x1ad   : > { %v3272_v5 = vpop.permute.xlu1 %3271 }
 0x1ae   : > { %v3646_v6 = vsel %vm3618_vm6, %v3613_v34, %v3272_v5 }
 0x1b2   : > { %v3256_v21 = vpop.permute.xlu0 %3255 }
 0x1b3   : > { %v3630_v18 = vsel %vm3618_vm6, %v3597_v60, %v3256_v21 }
 0x1b7   : > { %v3352_v45 = vpop.permute.xlu1 %3351 }
 0x1b8   : > { %v3679_v26 = vsel %vm3651_vm9, %v3646_v6, %v3352_v45 }
 0x1bb   : > { %v3336_v30 = vpop.permute.xlu0 %3335  ;;  %v3432_v8 = vpop.permute.xlu1 %3431 }
 0x1bc   : > { %v3712_v15 = vsel %vm3684_vm12, %v3679_v26, %v3432_v8  ;;  %v3663_v10 = vsel %vm3651_vm9, %v3630_v18, %v3336_v30 }
 0x1bd   : > { %4208 = vmatprep.subr.msk.bf16.mxu0 %vm3718_vm13, %v3712_v15 }
 0x1bf   : > { %v3416_v33 = vpop.permute.xlu0 %3415  ;;  %v2842_v58 = vpop.permute.xlu1 %2841 }
 0x1c0   : > { %v3696_v24 = vsel %vm3684_vm12, %v3663_v10, %v3416_v33  ;;  %v3482_v63 = vsel %vm3437_vm15, %v4016_v19, %v2842_v58 }
 0x1c1   : > { %v3732_v44 = vsel %vm3718_vm13, %v3696_v24, 0 }
 0x1c2   : > { %4196 = vmatpush3.bf16.xpose.msra.mxu0 %v3732_v44 }
 0x1c3   : > { %v2826_v2 = vpop.permute.xlu0 %2825  ;;  %v2922_v51 = vpop.permute.xlu1 %2921 }
 0x1c4   : > { %v3458_v47 = vsel %vm3437_vm15, %v4008_v16, %v2826_v2  ;;  %v3516_v42 = vsel %vm3486_vm1, %v3482_v63, %v2922_v51 }
 0x1c7   : > { %v2906_v36 = vpop.permute.xlu0 %2905  ;;  %v3018_v48 = vpop.permute.xlu1 %3017 }
 0x1c8   : > { %v3500_v46 = vsel %vm3486_vm1, %v3458_v47, %v2906_v36  ;;  %v3549_v22 = vsel %vm3519_vm2, %v3516_v42, %v3018_v48 }
 0x1cb   : > { %v3002_v61 = vpop.permute.xlu0 %3001 }
 0x1cc   : > { %v3533_v31 = vsel %vm3519_vm2, %v3500_v46, %v3002_v61 }
 0x1cd   : > { %v3098_v13 = vpop.permute.xlu1 %3097 }
 0x1ce   : > { %v3582_v5 = vsel %vm3552_vm4, %v3549_v22, %v3098_v13 }
 0x1cf   : > { %v3082_v62 = vpop.permute.xlu0 %3081 }
 0x1d0   : > { %v3566_v37 = vsel %vm3552_vm4, %v3533_v31, %v3082_v62 }
 0x1d1   : > { %v3178_v41 = vpop.permute.xlu1 %3177 }
 0x1d2   : > { %v3615_v40 = vsel %vm3585_vm5, %v3582_v5, %v3178_v41 }
 0x1d3   : > { %v3162_v17 = vpop.permute.xlu0 %3161 }
 0x1d4   : > { %v3599_v49 = vsel %vm3585_vm5, %v3566_v37, %v3162_v17 }
 0x1d7   : > { %v3258_v43 = vpop.permute.xlu0 %3257 }
 0x1d8   : > { %v3632_v32 = vsel %vm3618_vm6, %v3599_v49, %v3258_v43 }
 0x1de   : > { %v3338_v54 = vpop.permute.xlu0 %3337 }
 0x1df   : > { %v3665_v53 = vsel %vm3651_vm9, %v3632_v32, %v3338_v54 }
 0x1e0   : > { %v3274_v50 = vpop.permute.xlu1 %3273 }
 0x1e1   : > { %v3648_v38 = vsel %vm3618_vm6, %v3615_v40, %v3274_v50 }
 0x1e2   : > { %v3418_v7 = vpop.permute.xlu0 %3417 }
 0x1e3   : > { %v3698_v25 = vsel %vm3684_vm12, %v3665_v53, %v3418_v7 }
 0x1e4   : > { %v3734_v27 = vsel %vm3718_vm13, %v3698_v25, 0 }
 0x1eb   : > { %v3354_v39 = vpop.permute.xlu1 %3353 }
 0x1ec   : > { %v3681_v21 = vsel %vm3651_vm9, %v3648_v38, %v3354_v39 }
 0x1ee   : > { %v2828_v35 = vpop.permute.xlu0 %2827 }
 0x1ef   : > { %v3434_v56 = vpop.permute.xlu1 %3433  ;;  %v3461_v60 = vsel %vm3437_vm15, %v4009_v52, %v2828_v35 }
 0x1f0   : > { %v3714_v45 = vsel %vm3684_vm12, %v3681_v21, %v3434_v56 }
 0x1f1   : > { %4209 = vmatprep.subr.msk.bf16.mxu0 %vm3718_vm13, %v3714_v45 }
 0x1f2   : > { %4198 = vmatpush3.bf16.xpose.msra.mxu0 %v3734_v27  ;;  %v2908_v12 = vpop.permute.xlu0 %2907 }
 0x1f3   : > { %v2844_v57 = vpop.permute.xlu1 %2843  ;;  %v3502_v18 = vsel %vm3486_vm1, %v3461_v60, %v2908_v12 }
 0x1f4   : > { %v3485_v10 = vsel %vm3437_vm15, %v4017_v3, %v2844_v57 }
 0x1f6   : > { %v3004_v34 = vpop.permute.xlu0 %3003 }
 0x1f7   : > { %v2924_v59 = vpop.permute.xlu1 %2923  ;;  %v3535_v33 = vsel %vm3519_vm2, %v3502_v18, %v3004_v34 }
 0x1f8   : > { %v3518_v58 = vsel %vm3486_vm1, %v3485_v10, %v2924_v59 }
 0x1fb   : > { %v3020_v4 = vpop.permute.xlu1 %3019 }
 0x1fc   : > { %v3084_v6 = vpop.permute.xlu0 %3083  ;;  %v3551_v14 = vsel %vm3519_vm2, %v3518_v58, %v3020_v4 }
 0x1fd   : > { %v3568_v44 = vsel %vm3552_vm4, %v3535_v33, %v3084_v6 }
 0x1ff   : > { %v3100_v30 = vpop.permute.xlu1 %3099 }
 0x200   : > { %v3164_v1 = vpop.permute.xlu0 %3163  ;;  %v3584_v0 = vsel %vm3552_vm4, %v3551_v14, %v3100_v30 }
 0x201   : > { %v3601_v2 = vsel %vm3585_vm5, %v3568_v44, %v3164_v1 }
 0x203   : > { %v3180_v26 = vpop.permute.xlu1 %3179 }
 0x204   : > { %v3260_v8 = vpop.permute.xlu0 %3259  ;;  %v3617_v61 = vsel %vm3585_vm5, %v3584_v0, %v3180_v26 }
 0x205   : > { %v3634_v28 = vsel %vm3618_vm6, %v3601_v2, %v3260_v8 }
 0x207   : > { %v3276_v15 = vpop.permute.xlu1 %3275 }
 0x208   : > { %v3650_v51 = vsel %vm3618_vm6, %v3617_v61, %v3276_v15 }
 0x20a   : > { %v3340_v24 = vpop.permute.xlu0 %3339 }
 0x20b   : > { %v3667_v36 = vsel %vm3651_vm9, %v3634_v28, %v3340_v24 }
 0x20d   : > { %v3356_v52 = vpop.permute.xlu1 %3355 }
 0x20e   : > { %v3420_v23 = vpop.permute.xlu0 %3419  ;;  %v3683_v62 = vsel %vm3651_vm9, %v3650_v51, %v3356_v52 }
 0x20f   : > { %v3700_v3 = vsel %vm3684_vm12, %v3667_v36, %v3420_v23 }
 0x210   : > { %v3736_v17 = vsel %vm3718_vm13, %v3700_v3, 0 }
 0x211   : > { %v3436_v48 = vpop.permute.xlu1 %3435 }
 0x212   : > { %v3716_v13 = vsel %vm3684_vm12, %v3683_v62, %v3436_v48 }
 0x213   : > { %4210 = vmatprep.subr.msk.bf16.mxu0 %vm3718_vm13, %v3716_v13 }
 0x214   : > { %4200 = vmatpush3.bf16.xpose.msra.mxu0 %v3736_v17 }
 0x21b   : > { %4202 = vmatmul.mubr.msk.bf16.vlgmr.msra.gmra.mrb[0].mxu0 %vm3718_vm13, %v6156_v29 }
 0x2ee   : > { %v3788_v43 = vpop.f32.mrb[0].mxu0 }
 0x2ef   : > { %v3796_v41 = vsel %vm3795_vm0, %v3788_v43, 0.0  ;;  %v3801_v55 = vmul.f32 %v3788_v43, %v3788_v43  ;;  %v3790_v20 = vpop.f32.mrb[1].mxu0 }
 0x2f0   : > { %v3797_v16 = vsel %vm3795_vm0, %v3790_v20, 0.0  ;;  %v3802_v54 = vmul.f32 %v3790_v20, %v3790_v20  ;;  %v4147_v9 = vpack.c.bf16 %v3790_v20, %v3788_v43  ;;  %v3792_v11 = vpop.f32.mrb[2].mxu0 }
 0x2f1   : > { %v3793_v19 = vpop.f32.mrb[3].mxu0  ;;  %v3798_v47 = vadd.f32 %v3797_v16, %v3796_v41  ;;  %v3803_v50 = vsel %vm3795_vm0, %v3801_v55, 0.0 }
 0x2f2   : > { %4148 = vst.sshfl [vmem:[%s177_s4] sm:$0x33 pattern:$0x76325410] %v4147_v9  ;;  %v3804_v46 = vsel %vm3795_vm0, %v3802_v54, 0.0 }
 0x2f3   : > { %3799 = vadd.xlane.f32.xlu0 %v3798_v47  ;;  %v3805_v29 = vadd.f32 %v3804_v46, %v3803_v50 }
 0x2f5   : > { %3806 = vadd.xlane.f32.xlu1 %v3805_v29 }
 0x380   : > { %v3800_v63 = vpop.xlane.xlu0 %3799 }
 0x382   : > { %v3807_v31 = vpop.xlane.xlu1 %3806 }
 0x383   : > { %v3809_v37 = vsel %vm3808_vm3, %v3800_v63, %v3807_v31 }
 0x384   : > { %3811 = vst.msk [vmem:[%s181_s7] sm:$0xf] %vm3810_vm7, %v3809_v37 }
 0x385 PF: > { %s14_s12 = sadd.s32 1, %s4296_s12  }
 0x386   : > { %p11_p4 = scmp.ge.s32.totalorder %s14_s12, 4  }
 0x388   :  { %13 = sbr.rel (!%p11_p4) target bundleno = 1 (0x1), region = 73 }

</bundles_post_ra>
